<compile_context>
chip_gen: v5e
topology: v5e:2x2
jax: 0.10.0
libtpu: 0.0.40
codegen_flags: <defaults>
</compile_context>

<pallas_src>
import math

import jax
import jax.numpy as jnp
from jax.experimental import pallas as pl
from jax.experimental.pallas import tpu as pltpu

# ----- model hyper-parameters (match the PyTorch module defaults) -----
OBS_DIM = 7
STATE_DIM = 7
TEAM_DIM = 5
ACTION_DIM = 4
EMBED = 64
HEADS = 4
HEAD_DIM = EMBED // HEADS
NEG = -1e30


# --------------------------------------------------------------------------
# kernel
# --------------------------------------------------------------------------
def _attention_pool(x_ref, maskneg, w_q, b_q, w_k, b_k, w_v, b_v, hh, seq_len):
    """Multi-head self-attention + mean pool over the sequence, batched over N_TILE.

    x_ref   : Ref (seq_len, NT, C) raw per-position features
    maskneg : (NT, seq_len) additive key mask (0 keep / -1e30 drop)
    w_q/... : fused (C, 64) q/k/v projections (scale folded into w_q, b_q)
    hh      : (64, 64) block-diagonal ones; (q*k) @ hh gives each head's score
              replicated across that head's 16 lanes.
    Returns (NT, 64): mean over query positions of the attention output
    (pre out_proj; out_proj is folded into fc_shared by the wrapper).
    """
    xs = [x_ref[s] for s in range(seq_len)]                       # (NT, C)
    q = [jnp.dot(xs[s], w_q, preferred_element_type=jnp.float32) + b_q
         for s in range(seq_len)]
    k = [jnp.dot(xs[s], w_k, preferred_element_type=jnp.float32) + b_k
         for s in range(seq_len)]
    v = [jnp.dot(xs[s], w_v, preferred_element_type=jnp.float32) + b_v
         for s in range(seq_len)]
    mneg = [maskneg[:, j:j + 1] for j in range(seq_len)]          # (NT, 1)

    acc = jnp.zeros_like(q[0])                                    # (NT, 64)
    for i in range(seq_len):
        # per-head masked scores, replicated over each head's 16 lanes
        s_ij = [jnp.dot(q[i] * k[j], hh,
                        preferred_element_type=jnp.float32) + mneg[j]
                for j in range(seq_len)]
        m = s_ij[0]
        for j in range(1, seq_len):
            m = jnp.maximum(m, s_ij[j])
        e = [jnp.exp(s_ij[j] - m) for j in range(seq_len)]
        denom = e[0]
        num = e[0] * v[0]
        for j in range(1, seq_len):
            denom = denom + e[j]
            num = num + e[j] * v[j]
        acc = acc + num * pl.reciprocal(denom, approx=True)
    return acc * (1.0 / seq_len)


def agent_kernel(state_ref, obs_ref, omask_ref, team_ref, tmask_ref,
                 ow_q, ob_q, ow_k, ob_k, ow_v, ob_v,
                 tw_q, tb_q, tw_k, tb_k, tw_v, tb_v,
                 hh_ref,
                 w_sh_s, w_sh_o, w_sh_t, b_sh,
                 w_h1, b_h1, w_p2, b_p2, w_v2, b_v2,
                 out_ref):
    hh = hh_ref[...]
    so = obs_ref.shape[0]
    t = team_ref.shape[0]

    obs_pool = _attention_pool(obs_ref, omask_ref[...],
                               ow_q[...], ob_q[...], ow_k[...], ob_k[...],
                               ow_v[...], ob_v[...], hh, so)
    team_pool = _attention_pool(team_ref, tmask_ref[...],
                                tw_q[...], tb_q[...], tw_k[...], tb_k[...],
                                tw_v[...], tb_v[...], hh, t)

    # fc_shared with split weights (state-embedding and out_proj already fused)
    shared = (jnp.dot(state_ref[...], w_sh_s[...], preferred_element_type=jnp.float32)
              + jnp.dot(obs_pool, w_sh_o[...], preferred_element_type=jnp.float32)
              + jnp.dot(team_pool, w_sh_t[...], preferred_element_type=jnp.float32)
              + b_sh[...])
    shared = jnp.maximum(shared, 0.0)                              # (NT, 128)

    # fused policy/value hidden layer: lanes 0:64 policy, 64:128 value
    hid = jnp.maximum(jnp.dot(shared, w_h1[...],
                              preferred_element_type=jnp.float32) + b_h1[...], 0.0)

    logits = jnp.dot(hid, w_p2[...], preferred_element_type=jnp.float32) + b_p2[...]
    val4 = jnp.dot(hid, w_v2[...], preferred_element_type=jnp.float32) + b_v2[...]

    logits = logits - jnp.max(logits, axis=-1, keepdims=True)
    e = jnp.exp(logits)
    probs = e / jnp.sum(e, axis=-1, keepdims=True)                 # exact: sums to 1

    out_ref[:, 0:ACTION_DIM] = probs                               # lanes 0:4
    out_ref[:, ACTION_DIM:2 * ACTION_DIM] = val4                   # lane 4 = value


# --------------------------------------------------------------------------
# parameters + wrapper-side exact fusions
# --------------------------------------------------------------------------
def init_params(key):
    """Synthetic parameters with the PyTorch module's shapes (orthogonal/xavier
    init not replicated).  Weights are stored pre-transposed as (in, out)."""
    specs = [
        ('w_state', (STATE_DIM, EMBED)), ('b_state', (1, EMBED)),
        ('w_obs', (OBS_DIM, EMBED)), ('b_obs', (1, EMBED)),
        ('w_team', (TEAM_DIM, EMBED)), ('b_team', (1, EMBED)),
        ('oa_in_w', (EMBED, 3 * EMBED)), ('oa_in_b', (1, 3 * EMBED)),
        ('oa_out_w', (EMBED, EMBED)), ('oa_out_b', (1, EMBED)),
        ('ta_in_w', (EMBED, 3 * EMBED)), ('ta_in_b', (1, 3 * EMBED)),
        ('ta_out_w', (EMBED, EMBED)), ('ta_out_b', (1, EMBED)),
        ('w_sh', (3 * EMBED, 128)), ('b_sh', (1, 128)),
        ('w_p1', (128, 64)), ('b_p1', (1, 64)),
        ('w_p2', (64, ACTION_DIM)), ('b_p2', (1, ACTION_DIM)),
        ('w_v1', (128, 64)), ('b_v1', (1, 64)),
        ('w_v2', (64, 1)), ('b_v2', (1, 1)),
    ]
    keys = jax.random.split(key, len(specs))
    p = {}
    for (name, shape), k in zip(specs, keys):
        if name.startswith('b') or name.endswith('_b'):
            # small nonzero biases so the bias-fusion paths are exercised
            p[name] = 0.1 * jax.random.normal(k, shape, jnp.float32)
        else:
            fan_in = shape[0]
            p[name] = jax.random.normal(k, shape, jnp.float32) * (1.0 / fan_in) ** 0.5
    return p


def _fuse_params(p):
    """Exact algebraic fusion of the module's linear layers into kernel weights."""
    scale = 1.0 / math.sqrt(HEAD_DIM)

    def fuse_qkv(w_emb, b_emb, in_w, in_b):
        wq = w_emb @ in_w[:, 0:EMBED]
        bq = b_emb @ in_w[:, 0:EMBED] + in_b[:, 0:EMBED]
        wk = w_emb @ in_w[:, EMBED:2 * EMBED]
        bk = b_emb @ in_w[:, EMBED:2 * EMBED] + in_b[:, EMBED:2 * EMBED]
        wv = w_emb @ in_w[:, 2 * EMBED:]
        bv = b_emb @ in_w[:, 2 * EMBED:] + in_b[:, 2 * EMBED:]
        return [wq * scale, bq * scale, wk, bk, wv, bv]

    o_qkv = fuse_qkv(p['w_obs'], p['b_obs'], p['oa_in_w'], p['oa_in_b'])
    t_qkv = fuse_qkv(p['w_team'], p['b_team'], p['ta_in_w'], p['ta_in_b'])

    head_id = jnp.arange(EMBED) // HEAD_DIM
    hh = (head_id[:, None] == head_id[None, :]).astype(jnp.float32)   # (64, 64)

    w_sh = p['w_sh']
    w_sh_s = p['w_state'] @ w_sh[0:EMBED]
    w_sh_o = p['oa_out_w'] @ w_sh[EMBED:2 * EMBED]
    w_sh_t = p['ta_out_w'] @ w_sh[2 * EMBED:]
    b_sh = (p['b_state'] @ w_sh[0:EMBED]
            + p['oa_out_b'] @ w_sh[EMBED:2 * EMBED]
            + p['ta_out_b'] @ w_sh[2 * EMBED:]
            + p['b_sh'])

    w_h1 = jnp.concatenate([p['w_p1'], p['w_v1']], axis=1)             # (128, 128)
    b_h1 = jnp.concatenate([p['b_p1'], p['b_v1']], axis=1)             # (1, 128)
    w_p2 = jnp.zeros((128, ACTION_DIM), jnp.float32).at[0:64, :].set(p['w_p2'])
    b_p2 = p['b_p2']
    w_v2 = jnp.zeros((128, ACTION_DIM), jnp.float32).at[64:128, 0:1].set(p['w_v2'])
    b_v2 = jnp.zeros((1, ACTION_DIM), jnp.float32).at[:, 0:1].set(p['b_v2'])

    return (o_qkv + t_qkv
            + [hh, w_sh_s, w_sh_o, w_sh_t, b_sh, w_h1, b_h1, w_p2, b_p2, w_v2, b_v2])


# --------------------------------------------------------------------------
# forward wrapper
# --------------------------------------------------------------------------
@jax.jit
def agent_network_forward(observations, obs_mask, team_states, team_mask, params):
    B, P, S, _ = observations.shape
    T = team_states.shape[2]
    N = B * P
    So = S - 1

    n_tile = 256
    if N < n_tile:
        n_tile = max(8, -(-N // 8) * 8)
    n_pad = -(-N // n_tile) * n_tile
    grid = (n_pad // n_tile,)

    # wrapper-side (free in XLA) layout work: split state/obs, transpose so the
    # sequence axis is leading and the (b,p) axis lands on sublanes.
    obs_all = observations.reshape(N, S, OBS_DIM).astype(jnp.float32)
    state = obs_all[:, 0, :STATE_DIM]                                   # (N, 7)
    obs = jnp.transpose(obs_all[:, 1:, :], (1, 0, 2))                   # (So, N, 7)
    team = jnp.transpose(
        team_states.reshape(N, T, TEAM_DIM).astype(jnp.float32), (1, 0, 2))  # (T, N, 5)
    omaskneg = jnp.where(obs_mask.reshape(N, S)[:, 1:], NEG, 0.0).astype(jnp.float32)
    tmaskneg = jnp.where(team_mask.reshape(N, T), NEG, 0.0).astype(jnp.float32)

    if n_pad != N:
        pad = n_pad - N
        state = jnp.pad(state, ((0, pad), (0, 0)))
        obs = jnp.pad(obs, ((0, 0), (0, pad), (0, 0)))
        team = jnp.pad(team, ((0, 0), (0, pad), (0, 0)))
        omaskneg = jnp.pad(omaskneg, ((0, pad), (0, 0)))
        tmaskneg = jnp.pad(tmaskneg, ((0, pad), (0, 0)))

    weights = _fuse_params(params)

    def row_spec(width):
        return pl.BlockSpec((n_tile, width), lambda i: (i, 0))

    def seq_spec(length, width):
        return pl.BlockSpec((length, n_tile, width), lambda i: (0, i, 0))

    def whole(w):
        return pl.BlockSpec(w.shape, lambda i: (0, 0))

    in_specs = ([row_spec(STATE_DIM),
                 seq_spec(So, OBS_DIM),
                 row_spec(So),
                 seq_spec(T, TEAM_DIM),
                 row_spec(T)]
                + [whole(w) for w in weights])
    out_spec = pl.BlockSpec((n_tile, 2 * ACTION_DIM), lambda i: (i, 0))
    out_shape = jax.ShapeDtypeStruct((n_pad, 2 * ACTION_DIM), jnp.float32)

    packed = pl.pallas_call(
        agent_kernel,
        grid=grid,
        in_specs=in_specs,
        out_specs=out_spec,
        out_shape=out_shape,
        compiler_params=pltpu.CompilerParams(
            dimension_semantics=("parallel",),
            vmem_limit_bytes=48 * 1024 * 1024),
    )(state, obs, omaskneg, team, tmaskneg, *weights)

    action_probs = packed[:N, 0:ACTION_DIM].reshape(B, P, ACTION_DIM)
    value = packed[:N, ACTION_DIM].reshape(B, P)
    return action_probs, value


# --------------------------------------------------------------------------
# plain-JAX reference of the PyTorch module (for correctness checking)
# --------------------------------------------------------------------------
def reference_forward(observations, obs_mask, team_states, team_mask, p):
    B, P, S, _ = observations.shape
    scale = 1.0 / math.sqrt(HEAD_DIM)
    obs_f = observations.astype(jnp.float32)
    state = obs_f[:, :, 0, :STATE_DIM]
    obs = obs_f[:, :, 1:, :]
    om = obs_mask[:, :, 1:]
    state_emb = state @ p['w_state'] + p['b_state'][0]
    obs_emb = obs @ p['w_obs'] + p['b_obs'][0]
    team_emb = team_states.astype(jnp.float32) @ p['w_team'] + p['b_team'][0]

    def mha(x, mask, in_w, in_b, out_w, out_b):
        L = x.shape[2]
        qkv = x @ in_w + in_b[0]
        q = (qkv[..., 0:EMBED] * scale).reshape(B, P, L, HEADS, HEAD_DIM)
        k = qkv[..., EMBED:2 * EMBED].reshape(B, P, L, HEADS, HEAD_DIM)
        v = qkv[..., 2 * EMBED:].reshape(B, P, L, HEADS, HEAD_DIM)
        s = jnp.einsum('bpqhd,bpkhd->bphqk', q, k)
        s = jnp.where(mask[:, :, None, None, :], NEG, s)
        w = jax.nn.softmax(s, axis=-1)
        o = jnp.einsum('bphqk,bpkhd->bpqhd', w, v).reshape(B, P, L, EMBED)
        return o @ out_w + out_b[0]

    oa = mha(obs_emb, om, p['oa_in_w'], p['oa_in_b'], p['oa_out_w'], p['oa_out_b'])
    ta = mha(team_emb, team_mask, p['ta_in_w'], p['ta_in_b'],
             p['ta_out_w'], p['ta_out_b'])
    combined = jnp.concatenate([state_emb, oa.mean(axis=2), ta.mean(axis=2)], axis=-1)
    shared = jax.nn.relu(combined @ p['w_sh'] + p['b_sh'][0])
    ph = jax.nn.relu(shared @ p['w_p1'] + p['b_p1'][0])
    probs = jax.nn.softmax(ph @ p['w_p2'] + p['b_p2'][0], axis=-1)
    vh = jax.nn.relu(shared @ p['w_v1'] + p['b_v1'][0])
    value = (vh @ p['w_v2'] + p['b_v2'][0])[..., 0]
    return probs, value


if __name__ == "__main__":
    key = jax.random.PRNGKey(0)
    k_obs, k_team, k_m1, k_m2, k_params = jax.random.split(key, 5)

    B, P, S, T = 2, 3, 8, 6   # batch, players, obs seq (incl. state slot), team seq

    observations = jax.random.normal(k_obs, (B, P, S, OBS_DIM), jnp.float32)
    team_states = jax.random.normal(k_team, (B, P, T, TEAM_DIM), jnp.float32)

    obs_mask = jax.random.bernoulli(k_m1, 0.3, (B, P, S))
    team_mask = jax.random.bernoulli(k_m2, 0.3, (B, P, T))
    # guarantee at least one valid key per sequence (PyTorch gives NaN otherwise)
    obs_mask = obs_mask.at[..., :2].set(False)
    team_mask = team_mask.at[..., 0].set(False)

    params = init_params(k_params)

    action_probs, value = agent_network_forward(
        observations, obs_mask, team_states, team_mask, params)
    jax.block_until_ready((action_probs, value))

    # structural checks
    assert action_probs.shape == (B, P, ACTION_DIM)
    assert value.shape == (B, P)
    assert bool(jnp.all(jnp.isfinite(action_probs)))
    assert bool(jnp.all(jnp.isfinite(value)))
    assert bool(jnp.allclose(jnp.sum(action_probs, axis=-1), 1.0, atol=1e-4))

    # numerical check against a plain-JAX reference of the PyTorch module
    ref_probs, ref_value = reference_forward(
        observations, obs_mask, team_states, team_mask, params)
    assert bool(jnp.allclose(action_probs, ref_probs, atol=5e-3)), (
        float(jnp.max(jnp.abs(action_probs - ref_probs))))
    assert bool(jnp.allclose(value, ref_value, atol=1e-2, rtol=1e-2)), (
        float(jnp.max(jnp.abs(value - ref_value))))

    print("KERNEL_OK")
</pallas_src>

<mosaic_0001>
module attributes {stable_mosaic.version = 11 : i64} {
  func.func @agent_kernel(%arg0: i32, %arg1: memref<8x7xf32, #tpu.memory_space<vmem>>, %arg2: memref<7x8x7xf32, #tpu.memory_space<vmem>>, %arg3: memref<8x7xf32, #tpu.memory_space<vmem>>, %arg4: memref<6x8x5xf32, #tpu.memory_space<vmem>>, %arg5: memref<8x6xf32, #tpu.memory_space<vmem>>, %arg6: memref<7x64xf32, #tpu.memory_space<vmem>>, %arg7: memref<1x64xf32, #tpu.memory_space<vmem>>, %arg8: memref<7x64xf32, #tpu.memory_space<vmem>>, %arg9: memref<1x64xf32, #tpu.memory_space<vmem>>, %arg10: memref<7x64xf32, #tpu.memory_space<vmem>>, %arg11: memref<1x64xf32, #tpu.memory_space<vmem>>, %arg12: memref<5x64xf32, #tpu.memory_space<vmem>>, %arg13: memref<1x64xf32, #tpu.memory_space<vmem>>, %arg14: memref<5x64xf32, #tpu.memory_space<vmem>>, %arg15: memref<1x64xf32, #tpu.memory_space<vmem>>, %arg16: memref<5x64xf32, #tpu.memory_space<vmem>>, %arg17: memref<1x64xf32, #tpu.memory_space<vmem>>, %arg18: memref<64x64xf32, #tpu.memory_space<vmem>>, %arg19: memref<7x128xf32, #tpu.memory_space<vmem>>, %arg20: memref<64x128xf32, #tpu.memory_space<vmem>>, %arg21: memref<64x128xf32, #tpu.memory_space<vmem>>, %arg22: memref<1x128xf32, #tpu.memory_space<vmem>>, %arg23: memref<128x128xf32, #tpu.memory_space<vmem>>, %arg24: memref<1x128xf32, #tpu.memory_space<vmem>>, %arg25: memref<128x4xf32, #tpu.memory_space<vmem>>, %arg26: memref<1x4xf32, #tpu.memory_space<vmem>>, %arg27: memref<128x4xf32, #tpu.memory_space<vmem>>, %arg28: memref<1x4xf32, #tpu.memory_space<vmem>>, %arg29: memref<8x8xf32, #tpu.memory_space<vmem>>) attributes {dimension_semantics = [#tpu.dimension_semantics<parallel>], iteration_bounds = array<i64: 1>, scalar_prefetch = 0 : i64, scratch_operands = 0 : i64, tpu.core_type = #tpu.core_type<tc>, window_params = [{transform_indices = @transform_0, window_bounds = array<i64: 8, 7>}, {transform_indices = @transform_1, window_bounds = array<i64: 7, 8, 7>}, {transform_indices = @transform_2, window_bounds = array<i64: 8, 7>}, {transform_indices = @transform_3, window_bounds = array<i64: 6, 8, 5>}, {transform_indices = @transform_4, window_bounds = array<i64: 8, 6>}, {pipeline_mode = #tpu.pipeline_mode<synchronous>, transform_indices = @transform_5, window_bounds = array<i64: 7, 64>}, {pipeline_mode = #tpu.pipeline_mode<synchronous>, transform_indices = @transform_6, window_bounds = array<i64: 1, 64>}, {pipeline_mode = #tpu.pipeline_mode<synchronous>, transform_indices = @transform_7, window_bounds = array<i64: 7, 64>}, {pipeline_mode = #tpu.pipeline_mode<synchronous>, transform_indices = @transform_8, window_bounds = array<i64: 1, 64>}, {pipeline_mode = #tpu.pipeline_mode<synchronous>, transform_indices = @transform_9, window_bounds = array<i64: 7, 64>}, {pipeline_mode = #tpu.pipeline_mode<synchronous>, transform_indices = @transform_10, window_bounds = array<i64: 1, 64>}, {pipeline_mode = #tpu.pipeline_mode<synchronous>, transform_indices = @transform_11, window_bounds = array<i64: 5, 64>}, {pipeline_mode = #tpu.pipeline_mode<synchronous>, transform_indices = @transform_12, window_bounds = array<i64: 1, 64>}, {pipeline_mode = #tpu.pipeline_mode<synchronous>, transform_indices = @transform_13, window_bounds = array<i64: 5, 64>}, {pipeline_mode = #tpu.pipeline_mode<synchronous>, transform_indices = @transform_14, window_bounds = array<i64: 1, 64>}, {pipeline_mode = #tpu.pipeline_mode<synchronous>, transform_indices = @transform_15, window_bounds = array<i64: 5, 64>}, {pipeline_mode = #tpu.pipeline_mode<synchronous>, transform_indices = @transform_16, window_bounds = array<i64: 1, 64>}, {pipeline_mode = #tpu.pipeline_mode<synchronous>, transform_indices = @transform_17, window_bounds = array<i64: 64, 64>}, {pipeline_mode = #tpu.pipeline_mode<synchronous>, transform_indices = @transform_18, window_bounds = array<i64: 7, 128>}, {pipeline_mode = #tpu.pipeline_mode<synchronous>, transform_indices = @transform_19, window_bounds = array<i64: 64, 128>}, {pipeline_mode = #tpu.pipeline_mode<synchronous>, transform_indices = @transform_20, window_bounds = array<i64: 64, 128>}, {pipeline_mode = #tpu.pipeline_mode<synchronous>, transform_indices = @transform_21, window_bounds = array<i64: 1, 128>}, {pipeline_mode = #tpu.pipeline_mode<synchronous>, transform_indices = @transform_22, window_bounds = array<i64: 128, 128>}, {pipeline_mode = #tpu.pipeline_mode<synchronous>, transform_indices = @transform_23, window_bounds = array<i64: 1, 128>}, {pipeline_mode = #tpu.pipeline_mode<synchronous>, transform_indices = @transform_24, window_bounds = array<i64: 128, 4>}, {pipeline_mode = #tpu.pipeline_mode<synchronous>, transform_indices = @transform_25, window_bounds = array<i64: 1, 4>}, {pipeline_mode = #tpu.pipeline_mode<synchronous>, transform_indices = @transform_26, window_bounds = array<i64: 128, 4>}, {pipeline_mode = #tpu.pipeline_mode<synchronous>, transform_indices = @transform_27, window_bounds = array<i64: 1, 4>}, {transform_indices = @transform_28, window_bounds = array<i64: 8, 8>}]} {
    %c0 = arith.constant 0 : index
    %c0_0 = arith.constant 0 : index
    %0 = vector.load %arg18[%c0, %c0_0] : memref<64x64xf32, #tpu.memory_space<vmem>>, vector<64x64xf32>
    %c0_1 = arith.constant 0 : index
    %c0_2 = arith.constant 0 : index
    %1 = vector.load %arg3[%c0_1, %c0_2] : memref<8x7xf32, #tpu.memory_space<vmem>>, vector<8x7xf32>
    %c0_3 = arith.constant 0 : index
    %c0_4 = arith.constant 0 : index
    %2 = vector.load %arg6[%c0_3, %c0_4] : memref<7x64xf32, #tpu.memory_space<vmem>>, vector<7x64xf32>
    %c0_5 = arith.constant 0 : index
    %c0_6 = arith.constant 0 : index
    %3 = vector.load %arg7[%c0_5, %c0_6] : memref<1x64xf32, #tpu.memory_space<vmem>>, vector<1x64xf32>
    %c0_7 = arith.constant 0 : index
    %c0_8 = arith.constant 0 : index
    %4 = vector.load %arg8[%c0_7, %c0_8] : memref<7x64xf32, #tpu.memory_space<vmem>>, vector<7x64xf32>
    %c0_9 = arith.constant 0 : index
    %c0_10 = arith.constant 0 : index
    %5 = vector.load %arg9[%c0_9, %c0_10] : memref<1x64xf32, #tpu.memory_space<vmem>>, vector<1x64xf32>
    %c0_11 = arith.constant 0 : index
    %c0_12 = arith.constant 0 : index
    %6 = vector.load %arg10[%c0_11, %c0_12] : memref<7x64xf32, #tpu.memory_space<vmem>>, vector<7x64xf32>
    %c0_13 = arith.constant 0 : index
    %c0_14 = arith.constant 0 : index
    %7 = vector.load %arg11[%c0_13, %c0_14] : memref<1x64xf32, #tpu.memory_space<vmem>>, vector<1x64xf32>
    %c0_15 = arith.constant 0 : index
    %c0_16 = arith.constant 0 : index
    %c0_17 = arith.constant 0 : index
    %8 = vector.load %arg2[%c0_15, %c0_16, %c0_17] : memref<7x8x7xf32, #tpu.memory_space<vmem>>, vector<1x8x7xf32>
    %9 = vector.shape_cast %8 : vector<1x8x7xf32> to vector<8x7xf32>
    %c1 = arith.constant 1 : index
    %c0_18 = arith.constant 0 : index
    %c0_19 = arith.constant 0 : index
    %10 = vector.load %arg2[%c1, %c0_18, %c0_19] : memref<7x8x7xf32, #tpu.memory_space<vmem>>, vector<1x8x7xf32>
    %11 = vector.shape_cast %10 : vector<1x8x7xf32> to vector<8x7xf32>
    %c2 = arith.constant 2 : index
    %c0_20 = arith.constant 0 : index
    %c0_21 = arith.constant 0 : index
    %12 = vector.load %arg2[%c2, %c0_20, %c0_21] : memref<7x8x7xf32, #tpu.memory_space<vmem>>, vector<1x8x7xf32>
    %13 = vector.shape_cast %12 : vector<1x8x7xf32> to vector<8x7xf32>
    %c3 = arith.constant 3 : index
    %c0_22 = arith.constant 0 : index
    %c0_23 = arith.constant 0 : index
    %14 = vector.load %arg2[%c3, %c0_22, %c0_23] : memref<7x8x7xf32, #tpu.memory_space<vmem>>, vector<1x8x7xf32>
    %15 = vector.shape_cast %14 : vector<1x8x7xf32> to vector<8x7xf32>
    %c4 = arith.constant 4 : index
    %c0_24 = arith.constant 0 : index
    %c0_25 = arith.constant 0 : index
    %16 = vector.load %arg2[%c4, %c0_24, %c0_25] : memref<7x8x7xf32, #tpu.memory_space<vmem>>, vector<1x8x7xf32>
    %17 = vector.shape_cast %16 : vector<1x8x7xf32> to vector<8x7xf32>
    %c5 = arith.constant 5 : index
    %c0_26 = arith.constant 0 : index
    %c0_27 = arith.constant 0 : index
    %18 = vector.load %arg2[%c5, %c0_26, %c0_27] : memref<7x8x7xf32, #tpu.memory_space<vmem>>, vector<1x8x7xf32>
    %19 = vector.shape_cast %18 : vector<1x8x7xf32> to vector<8x7xf32>
    %c6 = arith.constant 6 : index
    %c0_28 = arith.constant 0 : index
    %c0_29 = arith.constant 0 : index
    %20 = vector.load %arg2[%c6, %c0_28, %c0_29] : memref<7x8x7xf32, #tpu.memory_space<vmem>>, vector<1x8x7xf32>
    %21 = vector.shape_cast %20 : vector<1x8x7xf32> to vector<8x7xf32>
    %cst = arith.constant dense<0.000000e+00> : vector<8x64xf32>
    %22 = tpu.matmul %9, %2, %cst {dimension_numbers = #tpu.dot_dimension_numbers<[1], [0], [0], [1], [0, 0, 1, 1], [], []>} : vector<8x7xf32>, vector<7x64xf32>, vector<8x64xf32> -> vector<8x64xf32>
    %23 = vector.broadcast %3 : vector<1x64xf32> to vector<8x64xf32>
    %24 = arith.addf %22, %23 : vector<8x64xf32>
    %cst_30 = arith.constant dense<0.000000e+00> : vector<8x64xf32>
    %25 = tpu.matmul %11, %2, %cst_30 {dimension_numbers = #tpu.dot_dimension_numbers<[1], [0], [0], [1], [0, 0, 1, 1], [], []>} : vector<8x7xf32>, vector<7x64xf32>, vector<8x64xf32> -> vector<8x64xf32>
    %26 = vector.broadcast %3 : vector<1x64xf32> to vector<8x64xf32>
    %27 = arith.addf %25, %26 : vector<8x64xf32>
    %cst_31 = arith.constant dense<0.000000e+00> : vector<8x64xf32>
    %28 = tpu.matmul %13, %2, %cst_31 {dimension_numbers = #tpu.dot_dimension_numbers<[1], [0], [0], [1], [0, 0, 1, 1], [], []>} : vector<8x7xf32>, vector<7x64xf32>, vector<8x64xf32> -> vector<8x64xf32>
    %29 = vector.broadcast %3 : vector<1x64xf32> to vector<8x64xf32>
    %30 = arith.addf %28, %29 : vector<8x64xf32>
    %cst_32 = arith.constant dense<0.000000e+00> : vector<8x64xf32>
    %31 = tpu.matmul %15, %2, %cst_32 {dimension_numbers = #tpu.dot_dimension_numbers<[1], [0], [0], [1], [0, 0, 1, 1], [], []>} : vector<8x7xf32>, vector<7x64xf32>, vector<8x64xf32> -> vector<8x64xf32>
    %32 = vector.broadcast %3 : vector<1x64xf32> to vector<8x64xf32>
    %33 = arith.addf %31, %32 : vector<8x64xf32>
    %cst_33 = arith.constant dense<0.000000e+00> : vector<8x64xf32>
    %34 = tpu.matmul %17, %2, %cst_33 {dimension_numbers = #tpu.dot_dimension_numbers<[1], [0], [0], [1], [0, 0, 1, 1], [], []>} : vector<8x7xf32>, vector<7x64xf32>, vector<8x64xf32> -> vector<8x64xf32>
    %35 = vector.broadcast %3 : vector<1x64xf32> to vector<8x64xf32>
    %36 = arith.addf %34, %35 : vector<8x64xf32>
    %cst_34 = arith.constant dense<0.000000e+00> : vector<8x64xf32>
    %37 = tpu.matmul %19, %2, %cst_34 {dimension_numbers = #tpu.dot_dimension_numbers<[1], [0], [0], [1], [0, 0, 1, 1], [], []>} : vector<8x7xf32>, vector<7x64xf32>, vector<8x64xf32> -> vector<8x64xf32>
    %38 = vector.broadcast %3 : vector<1x64xf32> to vector<8x64xf32>
    %39 = arith.addf %37, %38 : vector<8x64xf32>
    %cst_35 = arith.constant dense<0.000000e+00> : vector<8x64xf32>
    %40 = tpu.matmul %21, %2, %cst_35 {dimension_numbers = #tpu.dot_dimension_numbers<[1], [0], [0], [1], [0, 0, 1, 1], [], []>} : vector<8x7xf32>, vector<7x64xf32>, vector<8x64xf32> -> vector<8x64xf32>
    %41 = vector.broadcast %3 : vector<1x64xf32> to vector<8x64xf32>
    %42 = arith.addf %40, %41 : vector<8x64xf32>
    %cst_36 = arith.constant dense<0.000000e+00> : vector<8x64xf32>
    %43 = tpu.matmul %9, %4, %cst_36 {dimension_numbers = #tpu.dot_dimension_numbers<[1], [0], [0], [1], [0, 0, 1, 1], [], []>} : vector<8x7xf32>, vector<7x64xf32>, vector<8x64xf32> -> vector<8x64xf32>
    %44 = vector.broadcast %5 : vector<1x64xf32> to vector<8x64xf32>
    %45 = arith.addf %43, %44 : vector<8x64xf32>
    %cst_37 = arith.constant dense<0.000000e+00> : vector<8x64xf32>
    %46 = tpu.matmul %11, %4, %cst_37 {dimension_numbers = #tpu.dot_dimension_numbers<[1], [0], [0], [1], [0, 0, 1, 1], [], []>} : vector<8x7xf32>, vector<7x64xf32>, vector<8x64xf32> -> vector<8x64xf32>
    %47 = vector.broadcast %5 : vector<1x64xf32> to vector<8x64xf32>
    %48 = arith.addf %46, %47 : vector<8x64xf32>
    %cst_38 = arith.constant dense<0.000000e+00> : vector<8x64xf32>
    %49 = tpu.matmul %13, %4, %cst_38 {dimension_numbers = #tpu.dot_dimension_numbers<[1], [0], [0], [1], [0, 0, 1, 1], [], []>} : vector<8x7xf32>, vector<7x64xf32>, vector<8x64xf32> -> vector<8x64xf32>
    %50 = vector.broadcast %5 : vector<1x64xf32> to vector<8x64xf32>
    %51 = arith.addf %49, %50 : vector<8x64xf32>
    %cst_39 = arith.constant dense<0.000000e+00> : vector<8x64xf32>
    %52 = tpu.matmul %15, %4, %cst_39 {dimension_numbers = #tpu.dot_dimension_numbers<[1], [0], [0], [1], [0, 0, 1, 1], [], []>} : vector<8x7xf32>, vector<7x64xf32>, vector<8x64xf32> -> vector<8x64xf32>
    %53 = vector.broadcast %5 : vector<1x64xf32> to vector<8x64xf32>
    %54 = arith.addf %52, %53 : vector<8x64xf32>
    %cst_40 = arith.constant dense<0.000000e+00> : vector<8x64xf32>
    %55 = tpu.matmul %17, %4, %cst_40 {dimension_numbers = #tpu.dot_dimension_numbers<[1], [0], [0], [1], [0, 0, 1, 1], [], []>} : vector<8x7xf32>, vector<7x64xf32>, vector<8x64xf32> -> vector<8x64xf32>
    %56 = vector.broadcast %5 : vector<1x64xf32> to vector<8x64xf32>
    %57 = arith.addf %55, %56 : vector<8x64xf32>
    %cst_41 = arith.constant dense<0.000000e+00> : vector<8x64xf32>
    %58 = tpu.matmul %19, %4, %cst_41 {dimension_numbers = #tpu.dot_dimension_numbers<[1], [0], [0], [1], [0, 0, 1, 1], [], []>} : vector<8x7xf32>, vector<7x64xf32>, vector<8x64xf32> -> vector<8x64xf32>
    %59 = vector.broadcast %5 : vector<1x64xf32> to vector<8x64xf32>
    %60 = arith.addf %58, %59 : vector<8x64xf32>
    %cst_42 = arith.constant dense<0.000000e+00> : vector<8x64xf32>
    %61 = tpu.matmul %21, %4, %cst_42 {dimension_numbers = #tpu.dot_dimension_numbers<[1], [0], [0], [1], [0, 0, 1, 1], [], []>} : vector<8x7xf32>, vector<7x64xf32>, vector<8x64xf32> -> vector<8x64xf32>
    %62 = vector.broadcast %5 : vector<1x64xf32> to vector<8x64xf32>
    %63 = arith.addf %61, %62 : vector<8x64xf32>
    %cst_43 = arith.constant dense<0.000000e+00> : vector<8x64xf32>
    %64 = tpu.matmul %9, %6, %cst_43 {dimension_numbers = #tpu.dot_dimension_numbers<[1], [0], [0], [1], [0, 0, 1, 1], [], []>} : vector<8x7xf32>, vector<7x64xf32>, vector<8x64xf32> -> vector<8x64xf32>
    %65 = vector.broadcast %7 : vector<1x64xf32> to vector<8x64xf32>
    %66 = arith.addf %64, %65 : vector<8x64xf32>
    %cst_44 = arith.constant dense<0.000000e+00> : vector<8x64xf32>
    %67 = tpu.matmul %11, %6, %cst_44 {dimension_numbers = #tpu.dot_dimension_numbers<[1], [0], [0], [1], [0, 0, 1, 1], [], []>} : vector<8x7xf32>, vector<7x64xf32>, vector<8x64xf32> -> vector<8x64xf32>
    %68 = vector.broadcast %7 : vector<1x64xf32> to vector<8x64xf32>
    %69 = arith.addf %67, %68 : vector<8x64xf32>
    %cst_45 = arith.constant dense<0.000000e+00> : vector<8x64xf32>
    %70 = tpu.matmul %13, %6, %cst_45 {dimension_numbers = #tpu.dot_dimension_numbers<[1], [0], [0], [1], [0, 0, 1, 1], [], []>} : vector<8x7xf32>, vector<7x64xf32>, vector<8x64xf32> -> vector<8x64xf32>
    %71 = vector.broadcast %7 : vector<1x64xf32> to vector<8x64xf32>
    %72 = arith.addf %70, %71 : vector<8x64xf32>
    %cst_46 = arith.constant dense<0.000000e+00> : vector<8x64xf32>
    %73 = tpu.matmul %15, %6, %cst_46 {dimension_numbers = #tpu.dot_dimension_numbers<[1], [0], [0], [1], [0, 0, 1, 1], [], []>} : vector<8x7xf32>, vector<7x64xf32>, vector<8x64xf32> -> vector<8x64xf32>
    %74 = vector.broadcast %7 : vector<1x64xf32> to vector<8x64xf32>
    %75 = arith.addf %73, %74 : vector<8x64xf32>
    %cst_47 = arith.constant dense<0.000000e+00> : vector<8x64xf32>
    %76 = tpu.matmul %17, %6, %cst_47 {dimension_numbers = #tpu.dot_dimension_numbers<[1], [0], [0], [1], [0, 0, 1, 1], [], []>} : vector<8x7xf32>, vector<7x64xf32>, vector<8x64xf32> -> vector<8x64xf32>
    %77 = vector.broadcast %7 : vector<1x64xf32> to vector<8x64xf32>
    %78 = arith.addf %76, %77 : vector<8x64xf32>
    %cst_48 = arith.constant dense<0.000000e+00> : vector<8x64xf32>
    %79 = tpu.matmul %19, %6, %cst_48 {dimension_numbers = #tpu.dot_dimension_numbers<[1], [0], [0], [1], [0, 0, 1, 1], [], []>} : vector<8x7xf32>, vector<7x64xf32>, vector<8x64xf32> -> vector<8x64xf32>
    %80 = vector.broadcast %7 : vector<1x64xf32> to vector<8x64xf32>
    %81 = arith.addf %79, %80 : vector<8x64xf32>
    %cst_49 = arith.constant dense<0.000000e+00> : vector<8x64xf32>
    %82 = tpu.matmul %21, %6, %cst_49 {dimension_numbers = #tpu.dot_dimension_numbers<[1], [0], [0], [1], [0, 0, 1, 1], [], []>} : vector<8x7xf32>, vector<7x64xf32>, vector<8x64xf32> -> vector<8x64xf32>
    %83 = vector.broadcast %7 : vector<1x64xf32> to vector<8x64xf32>
    %84 = arith.addf %82, %83 : vector<8x64xf32>
    %85 = vector.extract_strided_slice %1 {offsets = [0, 0], sizes = [8, 1], strides = [1, 1]} : vector<8x7xf32> to vector<8x1xf32>
    %86 = vector.extract_strided_slice %1 {offsets = [0, 1], sizes = [8, 1], strides = [1, 1]} : vector<8x7xf32> to vector<8x1xf32>
    %87 = vector.extract_strided_slice %1 {offsets = [0, 2], sizes = [8, 1], strides = [1, 1]} : vector<8x7xf32> to vector<8x1xf32>
    %88 = vector.extract_strided_slice %1 {offsets = [0, 3], sizes = [8, 1], strides = [1, 1]} : vector<8x7xf32> to vector<8x1xf32>
    %89 = vector.extract_strided_slice %1 {offsets = [0, 4], sizes = [8, 1], strides = [1, 1]} : vector<8x7xf32> to vector<8x1xf32>
    %90 = vector.extract_strided_slice %1 {offsets = [0, 5], sizes = [8, 1], strides = [1, 1]} : vector<8x7xf32> to vector<8x1xf32>
    %91 = vector.extract_strided_slice %1 {offsets = [0, 6], sizes = [8, 1], strides = [1, 1]} : vector<8x7xf32> to vector<8x1xf32>
    %cst_50 = arith.constant 0.000000e+00 : f32
    %92 = vector.broadcast %cst_50 : f32 to vector<8x64xf32>
    %93 = arith.mulf %24, %45 : vector<8x64xf32>
    %cst_51 = arith.constant dense<0.000000e+00> : vector<8x64xf32>
    %94 = tpu.matmul %93, %0, %cst_51 {dimension_numbers = #tpu.dot_dimension_numbers<[1], [0], [0], [1], [0, 0, 1, 1], [], []>} : vector<8x64xf32>, vector<64x64xf32>, vector<8x64xf32> -> vector<8x64xf32>
    %95 = vector.broadcast %85 : vector<8x1xf32> to vector<8x64xf32>
    %96 = arith.addf %94, %95 : vector<8x64xf32>
    %97 = arith.mulf %24, %48 : vector<8x64xf32>
    %cst_52 = arith.constant dense<0.000000e+00> : vector<8x64xf32>
    %98 = tpu.matmul %97, %0, %cst_52 {dimension_numbers = #tpu.dot_dimension_numbers<[1], [0], [0], [1], [0, 0, 1, 1], [], []>} : vector<8x64xf32>, vector<64x64xf32>, vector<8x64xf32> -> vector<8x64xf32>
    %99 = vector.broadcast %86 : vector<8x1xf32> to vector<8x64xf32>
    %100 = arith.addf %98, %99 : vector<8x64xf32>
    %101 = arith.mulf %24, %51 : vector<8x64xf32>
    %cst_53 = arith.constant dense<0.000000e+00> : vector<8x64xf32>
    %102 = tpu.matmul %101, %0, %cst_53 {dimension_numbers = #tpu.dot_dimension_numbers<[1], [0], [0], [1], [0, 0, 1, 1], [], []>} : vector<8x64xf32>, vector<64x64xf32>, vector<8x64xf32> -> vector<8x64xf32>
    %103 = vector.broadcast %87 : vector<8x1xf32> to vector<8x64xf32>
    %104 = arith.addf %102, %103 : vector<8x64xf32>
    %105 = arith.mulf %24, %54 : vector<8x64xf32>
    %cst_54 = arith.constant dense<0.000000e+00> : vector<8x64xf32>
    %106 = tpu.matmul %105, %0, %cst_54 {dimension_numbers = #tpu.dot_dimension_numbers<[1], [0], [0], [1], [0, 0, 1, 1], [], []>} : vector<8x64xf32>, vector<64x64xf32>, vector<8x64xf32> -> vector<8x64xf32>
    %107 = vector.broadcast %88 : vector<8x1xf32> to vector<8x64xf32>
    %108 = arith.addf %106, %107 : vector<8x64xf32>
    %109 = arith.mulf %24, %57 : vector<8x64xf32>
    %cst_55 = arith.constant dense<0.000000e+00> : vector<8x64xf32>
    %110 = tpu.matmul %109, %0, %cst_55 {dimension_numbers = #tpu.dot_dimension_numbers<[1], [0], [0], [1], [0, 0, 1, 1], [], []>} : vector<8x64xf32>, vector<64x64xf32>, vector<8x64xf32> -> vector<8x64xf32>
    %111 = vector.broadcast %89 : vector<8x1xf32> to vector<8x64xf32>
    %112 = arith.addf %110, %111 : vector<8x64xf32>
    %113 = arith.mulf %24, %60 : vector<8x64xf32>
    %cst_56 = arith.constant dense<0.000000e+00> : vector<8x64xf32>
    %114 = tpu.matmul %113, %0, %cst_56 {dimension_numbers = #tpu.dot_dimension_numbers<[1], [0], [0], [1], [0, 0, 1, 1], [], []>} : vector<8x64xf32>, vector<64x64xf32>, vector<8x64xf32> -> vector<8x64xf32>
    %115 = vector.broadcast %90 : vector<8x1xf32> to vector<8x64xf32>
    %116 = arith.addf %114, %115 : vector<8x64xf32>
    %117 = arith.mulf %24, %63 : vector<8x64xf32>
    %cst_57 = arith.constant dense<0.000000e+00> : vector<8x64xf32>
    %118 = tpu.matmul %117, %0, %cst_57 {dimension_numbers = #tpu.dot_dimension_numbers<[1], [0], [0], [1], [0, 0, 1, 1], [], []>} : vector<8x64xf32>, vector<64x64xf32>, vector<8x64xf32> -> vector<8x64xf32>
    %119 = vector.broadcast %91 : vector<8x1xf32> to vector<8x64xf32>
    %120 = arith.addf %118, %119 : vector<8x64xf32>
    %121 = arith.maximumf %96, %100 : vector<8x64xf32>
    %122 = arith.maximumf %121, %104 : vector<8x64xf32>
    %123 = arith.maximumf %122, %108 : vector<8x64xf32>
    %124 = arith.maximumf %123, %112 : vector<8x64xf32>
    %125 = arith.maximumf %124, %116 : vector<8x64xf32>
    %126 = arith.maximumf %125, %120 : vector<8x64xf32>
    %127 = arith.subf %96, %126 : vector<8x64xf32>
    %128 = math.exp %127 : vector<8x64xf32>
    %129 = arith.subf %100, %126 : vector<8x64xf32>
    %130 = math.exp %129 : vector<8x64xf32>
    %131 = arith.subf %104, %126 : vector<8x64xf32>
    %132 = math.exp %131 : vector<8x64xf32>
    %133 = arith.subf %108, %126 : vector<8x64xf32>
    %134 = math.exp %133 : vector<8x64xf32>
    %135 = arith.subf %112, %126 : vector<8x64xf32>
    %136 = math.exp %135 : vector<8x64xf32>
    %137 = arith.subf %116, %126 : vector<8x64xf32>
    %138 = math.exp %137 : vector<8x64xf32>
    %139 = arith.subf %120, %126 : vector<8x64xf32>
    %140 = math.exp %139 : vector<8x64xf32>
    %141 = arith.mulf %128, %66 : vector<8x64xf32>
    %142 = arith.addf %128, %130 : vector<8x64xf32>
    %143 = arith.mulf %130, %69 : vector<8x64xf32>
    %144 = arith.addf %141, %143 : vector<8x64xf32>
    %145 = arith.addf %142, %132 : vector<8x64xf32>
    %146 = arith.mulf %132, %72 : vector<8x64xf32>
    %147 = arith.addf %144, %146 : vector<8x64xf32>
    %148 = arith.addf %145, %134 : vector<8x64xf32>
    %149 = arith.mulf %134, %75 : vector<8x64xf32>
    %150 = arith.addf %147, %149 : vector<8x64xf32>
    %151 = arith.addf %148, %136 : vector<8x64xf32>
    %152 = arith.mulf %136, %78 : vector<8x64xf32>
    %153 = arith.addf %150, %152 : vector<8x64xf32>
    %154 = arith.addf %151, %138 : vector<8x64xf32>
    %155 = arith.mulf %138, %81 : vector<8x64xf32>
    %156 = arith.addf %153, %155 : vector<8x64xf32>
    %157 = arith.addf %154, %140 : vector<8x64xf32>
    %158 = arith.mulf %140, %84 : vector<8x64xf32>
    %159 = arith.addf %156, %158 : vector<8x64xf32>
    %160 = tpu.reciprocal %157 {approx = true} : vector<8x64xf32> -> vector<8x64xf32>
    %161 = arith.mulf %159, %160 : vector<8x64xf32>
    %162 = arith.addf %92, %161 : vector<8x64xf32>
    %163 = arith.mulf %27, %45 : vector<8x64xf32>
    %cst_58 = arith.constant dense<0.000000e+00> : vector<8x64xf32>
    %164 = tpu.matmul %163, %0, %cst_58 {dimension_numbers = #tpu.dot_dimension_numbers<[1], [0], [0], [1], [0, 0, 1, 1], [], []>} : vector<8x64xf32>, vector<64x64xf32>, vector<8x64xf32> -> vector<8x64xf32>
    %165 = vector.broadcast %85 : vector<8x1xf32> to vector<8x64xf32>
    %166 = arith.addf %164, %165 : vector<8x64xf32>
    %167 = arith.mulf %27, %48 : vector<8x64xf32>
    %cst_59 = arith.constant dense<0.000000e+00> : vector<8x64xf32>
    %168 = tpu.matmul %167, %0, %cst_59 {dimension_numbers = #tpu.dot_dimension_numbers<[1], [0], [0], [1], [0, 0, 1, 1], [], []>} : vector<8x64xf32>, vector<64x64xf32>, vector<8x64xf32> -> vector<8x64xf32>
    %169 = vector.broadcast %86 : vector<8x1xf32> to vector<8x64xf32>
    %170 = arith.addf %168, %169 : vector<8x64xf32>
    %171 = arith.mulf %27, %51 : vector<8x64xf32>
    %cst_60 = arith.constant dense<0.000000e+00> : vector<8x64xf32>
    %172 = tpu.matmul %171, %0, %cst_60 {dimension_numbers = #tpu.dot_dimension_numbers<[1], [0], [0], [1], [0, 0, 1, 1], [], []>} : vector<8x64xf32>, vector<64x64xf32>, vector<8x64xf32> -> vector<8x64xf32>
    %173 = vector.broadcast %87 : vector<8x1xf32> to vector<8x64xf32>
    %174 = arith.addf %172, %173 : vector<8x64xf32>
    %175 = arith.mulf %27, %54 : vector<8x64xf32>
    %cst_61 = arith.constant dense<0.000000e+00> : vector<8x64xf32>
    %176 = tpu.matmul %175, %0, %cst_61 {dimension_numbers = #tpu.dot_dimension_numbers<[1], [0], [0], [1], [0, 0, 1, 1], [], []>} : vector<8x64xf32>, vector<64x64xf32>, vector<8x64xf32> -> vector<8x64xf32>
    %177 = vector.broadcast %88 : vector<8x1xf32> to vector<8x64xf32>
    %178 = arith.addf %176, %177 : vector<8x64xf32>
    %179 = arith.mulf %27, %57 : vector<8x64xf32>
    %cst_62 = arith.constant dense<0.000000e+00> : vector<8x64xf32>
    %180 = tpu.matmul %179, %0, %cst_62 {dimension_numbers = #tpu.dot_dimension_numbers<[1], [0], [0], [1], [0, 0, 1, 1], [], []>} : vector<8x64xf32>, vector<64x64xf32>, vector<8x64xf32> -> vector<8x64xf32>
    %181 = vector.broadcast %89 : vector<8x1xf32> to vector<8x64xf32>
    %182 = arith.addf %180, %181 : vector<8x64xf32>
    %183 = arith.mulf %27, %60 : vector<8x64xf32>
    %cst_63 = arith.constant dense<0.000000e+00> : vector<8x64xf32>
    %184 = tpu.matmul %183, %0, %cst_63 {dimension_numbers = #tpu.dot_dimension_numbers<[1], [0], [0], [1], [0, 0, 1, 1], [], []>} : vector<8x64xf32>, vector<64x64xf32>, vector<8x64xf32> -> vector<8x64xf32>
    %185 = vector.broadcast %90 : vector<8x1xf32> to vector<8x64xf32>
    %186 = arith.addf %184, %185 : vector<8x64xf32>
    %187 = arith.mulf %27, %63 : vector<8x64xf32>
    %cst_64 = arith.constant dense<0.000000e+00> : vector<8x64xf32>
    %188 = tpu.matmul %187, %0, %cst_64 {dimension_numbers = #tpu.dot_dimension_numbers<[1], [0], [0], [1], [0, 0, 1, 1], [], []>} : vector<8x64xf32>, vector<64x64xf32>, vector<8x64xf32> -> vector<8x64xf32>
    %189 = vector.broadcast %91 : vector<8x1xf32> to vector<8x64xf32>
    %190 = arith.addf %188, %189 : vector<8x64xf32>
    %191 = arith.maximumf %166, %170 : vector<8x64xf32>
    %192 = arith.maximumf %191, %174 : vector<8x64xf32>
    %193 = arith.maximumf %192, %178 : vector<8x64xf32>
    %194 = arith.maximumf %193, %182 : vector<8x64xf32>
    %195 = arith.maximumf %194, %186 : vector<8x64xf32>
    %196 = arith.maximumf %195, %190 : vector<8x64xf32>
    %197 = arith.subf %166, %196 : vector<8x64xf32>
    %198 = math.exp %197 : vector<8x64xf32>
    %199 = arith.subf %170, %196 : vector<8x64xf32>
    %200 = math.exp %199 : vector<8x64xf32>
    %201 = arith.subf %174, %196 : vector<8x64xf32>
    %202 = math.exp %201 : vector<8x64xf32>
    %203 = arith.subf %178, %196 : vector<8x64xf32>
    %204 = math.exp %203 : vector<8x64xf32>
    %205 = arith.subf %182, %196 : vector<8x64xf32>
    %206 = math.exp %205 : vector<8x64xf32>
    %207 = arith.subf %186, %196 : vector<8x64xf32>
    %208 = math.exp %207 : vector<8x64xf32>
    %209 = arith.subf %190, %196 : vector<8x64xf32>
    %210 = math.exp %209 : vector<8x64xf32>
    %211 = arith.mulf %198, %66 : vector<8x64xf32>
    %212 = arith.addf %198, %200 : vector<8x64xf32>
    %213 = arith.mulf %200, %69 : vector<8x64xf32>
    %214 = arith.addf %211, %213 : vector<8x64xf32>
    %215 = arith.addf %212, %202 : vector<8x64xf32>
    %216 = arith.mulf %202, %72 : vector<8x64xf32>
    %217 = arith.addf %214, %216 : vector<8x64xf32>
    %218 = arith.addf %215, %204 : vector<8x64xf32>
    %219 = arith.mulf %204, %75 : vector<8x64xf32>
    %220 = arith.addf %217, %219 : vector<8x64xf32>
    %221 = arith.addf %218, %206 : vector<8x64xf32>
    %222 = arith.mulf %206, %78 : vector<8x64xf32>
    %223 = arith.addf %220, %222 : vector<8x64xf32>
    %224 = arith.addf %221, %208 : vector<8x64xf32>
    %225 = arith.mulf %208, %81 : vector<8x64xf32>
    %226 = arith.addf %223, %225 : vector<8x64xf32>
    %227 = arith.addf %224, %210 : vector<8x64xf32>
    %228 = arith.mulf %210, %84 : vector<8x64xf32>
    %229 = arith.addf %226, %228 : vector<8x64xf32>
    %230 = tpu.reciprocal %227 {approx = true} : vector<8x64xf32> -> vector<8x64xf32>
    %231 = arith.mulf %229, %230 : vector<8x64xf32>
    %232 = arith.addf %162, %231 : vector<8x64xf32>
    %233 = arith.mulf %30, %45 : vector<8x64xf32>
    %cst_65 = arith.constant dense<0.000000e+00> : vector<8x64xf32>
    %234 = tpu.matmul %233, %0, %cst_65 {dimension_numbers = #tpu.dot_dimension_numbers<[1], [0], [0], [1], [0, 0, 1, 1], [], []>} : vector<8x64xf32>, vector<64x64xf32>, vector<8x64xf32> -> vector<8x64xf32>
    %235 = vector.broadcast %85 : vector<8x1xf32> to vector<8x64xf32>
    %236 = arith.addf %234, %235 : vector<8x64xf32>
    %237 = arith.mulf %30, %48 : vector<8x64xf32>
    %cst_66 = arith.constant dense<0.000000e+00> : vector<8x64xf32>
    %238 = tpu.matmul %237, %0, %cst_66 {dimension_numbers = #tpu.dot_dimension_numbers<[1], [0], [0], [1], [0, 0, 1, 1], [], []>} : vector<8x64xf32>, vector<64x64xf32>, vector<8x64xf32> -> vector<8x64xf32>
    %239 = vector.broadcast %86 : vector<8x1xf32> to vector<8x64xf32>
    %240 = arith.addf %238, %239 : vector<8x64xf32>
    %241 = arith.mulf %30, %51 : vector<8x64xf32>
    %cst_67 = arith.constant dense<0.000000e+00> : vector<8x64xf32>
    %242 = tpu.matmul %241, %0, %cst_67 {dimension_numbers = #tpu.dot_dimension_numbers<[1], [0], [0], [1], [0, 0, 1, 1], [], []>} : vector<8x64xf32>, vector<64x64xf32>, vector<8x64xf32> -> vector<8x64xf32>
    %243 = vector.broadcast %87 : vector<8x1xf32> to vector<8x64xf32>
    %244 = arith.addf %242, %243 : vector<8x64xf32>
    %245 = arith.mulf %30, %54 : vector<8x64xf32>
    %cst_68 = arith.constant dense<0.000000e+00> : vector<8x64xf32>
    %246 = tpu.matmul %245, %0, %cst_68 {dimension_numbers = #tpu.dot_dimension_numbers<[1], [0], [0], [1], [0, 0, 1, 1], [], []>} : vector<8x64xf32>, vector<64x64xf32>, vector<8x64xf32> -> vector<8x64xf32>
    %247 = vector.broadcast %88 : vector<8x1xf32> to vector<8x64xf32>
    %248 = arith.addf %246, %247 : vector<8x64xf32>
    %249 = arith.mulf %30, %57 : vector<8x64xf32>
    %cst_69 = arith.constant dense<0.000000e+00> : vector<8x64xf32>
    %250 = tpu.matmul %249, %0, %cst_69 {dimension_numbers = #tpu.dot_dimension_numbers<[1], [0], [0], [1], [0, 0, 1, 1], [], []>} : vector<8x64xf32>, vector<64x64xf32>, vector<8x64xf32> -> vector<8x64xf32>
    %251 = vector.broadcast %89 : vector<8x1xf32> to vector<8x64xf32>
    %252 = arith.addf %250, %251 : vector<8x64xf32>
    %253 = arith.mulf %30, %60 : vector<8x64xf32>
    %cst_70 = arith.constant dense<0.000000e+00> : vector<8x64xf32>
    %254 = tpu.matmul %253, %0, %cst_70 {dimension_numbers = #tpu.dot_dimension_numbers<[1], [0], [0], [1], [0, 0, 1, 1], [], []>} : vector<8x64xf32>, vector<64x64xf32>, vector<8x64xf32> -> vector<8x64xf32>
    %255 = vector.broadcast %90 : vector<8x1xf32> to vector<8x64xf32>
    %256 = arith.addf %254, %255 : vector<8x64xf32>
    %257 = arith.mulf %30, %63 : vector<8x64xf32>
    %cst_71 = arith.constant dense<0.000000e+00> : vector<8x64xf32>
    %258 = tpu.matmul %257, %0, %cst_71 {dimension_numbers = #tpu.dot_dimension_numbers<[1], [0], [0], [1], [0, 0, 1, 1], [], []>} : vector<8x64xf32>, vector<64x64xf32>, vector<8x64xf32> -> vector<8x64xf32>
    %259 = vector.broadcast %91 : vector<8x1xf32> to vector<8x64xf32>
    %260 = arith.addf %258, %259 : vector<8x64xf32>
    %261 = arith.maximumf %236, %240 : vector<8x64xf32>
    %262 = arith.maximumf %261, %244 : vector<8x64xf32>
    %263 = arith.maximumf %262, %248 : vector<8x64xf32>
    %264 = arith.maximumf %263, %252 : vector<8x64xf32>
    %265 = arith.maximumf %264, %256 : vector<8x64xf32>
    %266 = arith.maximumf %265, %260 : vector<8x64xf32>
    %267 = arith.subf %236, %266 : vector<8x64xf32>
    %268 = math.exp %267 : vector<8x64xf32>
    %269 = arith.subf %240, %266 : vector<8x64xf32>
    %270 = math.exp %269 : vector<8x64xf32>
    %271 = arith.subf %244, %266 : vector<8x64xf32>
    %272 = math.exp %271 : vector<8x64xf32>
    %273 = arith.subf %248, %266 : vector<8x64xf32>
    %274 = math.exp %273 : vector<8x64xf32>
    %275 = arith.subf %252, %266 : vector<8x64xf32>
    %276 = math.exp %275 : vector<8x64xf32>
    %277 = arith.subf %256, %266 : vector<8x64xf32>
    %278 = math.exp %277 : vector<8x64xf32>
    %279 = arith.subf %260, %266 : vector<8x64xf32>
    %280 = math.exp %279 : vector<8x64xf32>
    %281 = arith.mulf %268, %66 : vector<8x64xf32>
    %282 = arith.addf %268, %270 : vector<8x64xf32>
    %283 = arith.mulf %270, %69 : vector<8x64xf32>
    %284 = arith.addf %281, %283 : vector<8x64xf32>
    %285 = arith.addf %282, %272 : vector<8x64xf32>
    %286 = arith.mulf %272, %72 : vector<8x64xf32>
    %287 = arith.addf %284, %286 : vector<8x64xf32>
    %288 = arith.addf %285, %274 : vector<8x64xf32>
    %289 = arith.mulf %274, %75 : vector<8x64xf32>
    %290 = arith.addf %287, %289 : vector<8x64xf32>
    %291 = arith.addf %288, %276 : vector<8x64xf32>
    %292 = arith.mulf %276, %78 : vector<8x64xf32>
    %293 = arith.addf %290, %292 : vector<8x64xf32>
    %294 = arith.addf %291, %278 : vector<8x64xf32>
    %295 = arith.mulf %278, %81 : vector<8x64xf32>
    %296 = arith.addf %293, %295 : vector<8x64xf32>
    %297 = arith.addf %294, %280 : vector<8x64xf32>
    %298 = arith.mulf %280, %84 : vector<8x64xf32>
    %299 = arith.addf %296, %298 : vector<8x64xf32>
    %300 = tpu.reciprocal %297 {approx = true} : vector<8x64xf32> -> vector<8x64xf32>
    %301 = arith.mulf %299, %300 : vector<8x64xf32>
    %302 = arith.addf %232, %301 : vector<8x64xf32>
    %303 = arith.mulf %33, %45 : vector<8x64xf32>
    %cst_72 = arith.constant dense<0.000000e+00> : vector<8x64xf32>
    %304 = tpu.matmul %303, %0, %cst_72 {dimension_numbers = #tpu.dot_dimension_numbers<[1], [0], [0], [1], [0, 0, 1, 1], [], []>} : vector<8x64xf32>, vector<64x64xf32>, vector<8x64xf32> -> vector<8x64xf32>
    %305 = vector.broadcast %85 : vector<8x1xf32> to vector<8x64xf32>
    %306 = arith.addf %304, %305 : vector<8x64xf32>
    %307 = arith.mulf %33, %48 : vector<8x64xf32>
    %cst_73 = arith.constant dense<0.000000e+00> : vector<8x64xf32>
    %308 = tpu.matmul %307, %0, %cst_73 {dimension_numbers = #tpu.dot_dimension_numbers<[1], [0], [0], [1], [0, 0, 1, 1], [], []>} : vector<8x64xf32>, vector<64x64xf32>, vector<8x64xf32> -> vector<8x64xf32>
    %309 = vector.broadcast %86 : vector<8x1xf32> to vector<8x64xf32>
    %310 = arith.addf %308, %309 : vector<8x64xf32>
    %311 = arith.mulf %33, %51 : vector<8x64xf32>
    %cst_74 = arith.constant dense<0.000000e+00> : vector<8x64xf32>
    %312 = tpu.matmul %311, %0, %cst_74 {dimension_numbers = #tpu.dot_dimension_numbers<[1], [0], [0], [1], [0, 0, 1, 1], [], []>} : vector<8x64xf32>, vector<64x64xf32>, vector<8x64xf32> -> vector<8x64xf32>
    %313 = vector.broadcast %87 : vector<8x1xf32> to vector<8x64xf32>
    %314 = arith.addf %312, %313 : vector<8x64xf32>
    %315 = arith.mulf %33, %54 : vector<8x64xf32>
    %cst_75 = arith.constant dense<0.000000e+00> : vector<8x64xf32>
    %316 = tpu.matmul %315, %0, %cst_75 {dimension_numbers = #tpu.dot_dimension_numbers<[1], [0], [0], [1], [0, 0, 1, 1], [], []>} : vector<8x64xf32>, vector<64x64xf32>, vector<8x64xf32> -> vector<8x64xf32>
    %317 = vector.broadcast %88 : vector<8x1xf32> to vector<8x64xf32>
    %318 = arith.addf %316, %317 : vector<8x64xf32>
    %319 = arith.mulf %33, %57 : vector<8x64xf32>
    %cst_76 = arith.constant dense<0.000000e+00> : vector<8x64xf32>
    %320 = tpu.matmul %319, %0, %cst_76 {dimension_numbers = #tpu.dot_dimension_numbers<[1], [0], [0], [1], [0, 0, 1, 1], [], []>} : vector<8x64xf32>, vector<64x64xf32>, vector<8x64xf32> -> vector<8x64xf32>
    %321 = vector.broadcast %89 : vector<8x1xf32> to vector<8x64xf32>
    %322 = arith.addf %320, %321 : vector<8x64xf32>
    %323 = arith.mulf %33, %60 : vector<8x64xf32>
    %cst_77 = arith.constant dense<0.000000e+00> : vector<8x64xf32>
    %324 = tpu.matmul %323, %0, %cst_77 {dimension_numbers = #tpu.dot_dimension_numbers<[1], [0], [0], [1], [0, 0, 1, 1], [], []>} : vector<8x64xf32>, vector<64x64xf32>, vector<8x64xf32> -> vector<8x64xf32>
    %325 = vector.broadcast %90 : vector<8x1xf32> to vector<8x64xf32>
    %326 = arith.addf %324, %325 : vector<8x64xf32>
    %327 = arith.mulf %33, %63 : vector<8x64xf32>
    %cst_78 = arith.constant dense<0.000000e+00> : vector<8x64xf32>
    %328 = tpu.matmul %327, %0, %cst_78 {dimension_numbers = #tpu.dot_dimension_numbers<[1], [0], [0], [1], [0, 0, 1, 1], [], []>} : vector<8x64xf32>, vector<64x64xf32>, vector<8x64xf32> -> vector<8x64xf32>
    %329 = vector.broadcast %91 : vector<8x1xf32> to vector<8x64xf32>
    %330 = arith.addf %328, %329 : vector<8x64xf32>
    %331 = arith.maximumf %306, %310 : vector<8x64xf32>
    %332 = arith.maximumf %331, %314 : vector<8x64xf32>
    %333 = arith.maximumf %332, %318 : vector<8x64xf32>
    %334 = arith.maximumf %333, %322 : vector<8x64xf32>
    %335 = arith.maximumf %334, %326 : vector<8x64xf32>
    %336 = arith.maximumf %335, %330 : vector<8x64xf32>
    %337 = arith.subf %306, %336 : vector<8x64xf32>
    %338 = math.exp %337 : vector<8x64xf32>
    %339 = arith.subf %310, %336 : vector<8x64xf32>
    %340 = math.exp %339 : vector<8x64xf32>
    %341 = arith.subf %314, %336 : vector<8x64xf32>
    %342 = math.exp %341 : vector<8x64xf32>
    %343 = arith.subf %318, %336 : vector<8x64xf32>
    %344 = math.exp %343 : vector<8x64xf32>
    %345 = arith.subf %322, %336 : vector<8x64xf32>
    %346 = math.exp %345 : vector<8x64xf32>
    %347 = arith.subf %326, %336 : vector<8x64xf32>
    %348 = math.exp %347 : vector<8x64xf32>
    %349 = arith.subf %330, %336 : vector<8x64xf32>
    %350 = math.exp %349 : vector<8x64xf32>
    %351 = arith.mulf %338, %66 : vector<8x64xf32>
    %352 = arith.addf %338, %340 : vector<8x64xf32>
    %353 = arith.mulf %340, %69 : vector<8x64xf32>
    %354 = arith.addf %351, %353 : vector<8x64xf32>
    %355 = arith.addf %352, %342 : vector<8x64xf32>
    %356 = arith.mulf %342, %72 : vector<8x64xf32>
    %357 = arith.addf %354, %356 : vector<8x64xf32>
    %358 = arith.addf %355, %344 : vector<8x64xf32>
    %359 = arith.mulf %344, %75 : vector<8x64xf32>
    %360 = arith.addf %357, %359 : vector<8x64xf32>
    %361 = arith.addf %358, %346 : vector<8x64xf32>
    %362 = arith.mulf %346, %78 : vector<8x64xf32>
    %363 = arith.addf %360, %362 : vector<8x64xf32>
    %364 = arith.addf %361, %348 : vector<8x64xf32>
    %365 = arith.mulf %348, %81 : vector<8x64xf32>
    %366 = arith.addf %363, %365 : vector<8x64xf32>
    %367 = arith.addf %364, %350 : vector<8x64xf32>
    %368 = arith.mulf %350, %84 : vector<8x64xf32>
    %369 = arith.addf %366, %368 : vector<8x64xf32>
    %370 = tpu.reciprocal %367 {approx = true} : vector<8x64xf32> -> vector<8x64xf32>
    %371 = arith.mulf %369, %370 : vector<8x64xf32>
    %372 = arith.addf %302, %371 : vector<8x64xf32>
    %373 = arith.mulf %36, %45 : vector<8x64xf32>
    %cst_79 = arith.constant dense<0.000000e+00> : vector<8x64xf32>
    %374 = tpu.matmul %373, %0, %cst_79 {dimension_numbers = #tpu.dot_dimension_numbers<[1], [0], [0], [1], [0, 0, 1, 1], [], []>} : vector<8x64xf32>, vector<64x64xf32>, vector<8x64xf32> -> vector<8x64xf32>
    %375 = vector.broadcast %85 : vector<8x1xf32> to vector<8x64xf32>
    %376 = arith.addf %374, %375 : vector<8x64xf32>
    %377 = arith.mulf %36, %48 : vector<8x64xf32>
    %cst_80 = arith.constant dense<0.000000e+00> : vector<8x64xf32>
    %378 = tpu.matmul %377, %0, %cst_80 {dimension_numbers = #tpu.dot_dimension_numbers<[1], [0], [0], [1], [0, 0, 1, 1], [], []>} : vector<8x64xf32>, vector<64x64xf32>, vector<8x64xf32> -> vector<8x64xf32>
    %379 = vector.broadcast %86 : vector<8x1xf32> to vector<8x64xf32>
    %380 = arith.addf %378, %379 : vector<8x64xf32>
    %381 = arith.mulf %36, %51 : vector<8x64xf32>
    %cst_81 = arith.constant dense<0.000000e+00> : vector<8x64xf32>
    %382 = tpu.matmul %381, %0, %cst_81 {dimension_numbers = #tpu.dot_dimension_numbers<[1], [0], [0], [1], [0, 0, 1, 1], [], []>} : vector<8x64xf32>, vector<64x64xf32>, vector<8x64xf32> -> vector<8x64xf32>
    %383 = vector.broadcast %87 : vector<8x1xf32> to vector<8x64xf32>
    %384 = arith.addf %382, %383 : vector<8x64xf32>
    %385 = arith.mulf %36, %54 : vector<8x64xf32>
    %cst_82 = arith.constant dense<0.000000e+00> : vector<8x64xf32>
    %386 = tpu.matmul %385, %0, %cst_82 {dimension_numbers = #tpu.dot_dimension_numbers<[1], [0], [0], [1], [0, 0, 1, 1], [], []>} : vector<8x64xf32>, vector<64x64xf32>, vector<8x64xf32> -> vector<8x64xf32>
    %387 = vector.broadcast %88 : vector<8x1xf32> to vector<8x64xf32>
    %388 = arith.addf %386, %387 : vector<8x64xf32>
    %389 = arith.mulf %36, %57 : vector<8x64xf32>
    %cst_83 = arith.constant dense<0.000000e+00> : vector<8x64xf32>
    %390 = tpu.matmul %389, %0, %cst_83 {dimension_numbers = #tpu.dot_dimension_numbers<[1], [0], [0], [1], [0, 0, 1, 1], [], []>} : vector<8x64xf32>, vector<64x64xf32>, vector<8x64xf32> -> vector<8x64xf32>
    %391 = vector.broadcast %89 : vector<8x1xf32> to vector<8x64xf32>
    %392 = arith.addf %390, %391 : vector<8x64xf32>
    %393 = arith.mulf %36, %60 : vector<8x64xf32>
    %cst_84 = arith.constant dense<0.000000e+00> : vector<8x64xf32>
    %394 = tpu.matmul %393, %0, %cst_84 {dimension_numbers = #tpu.dot_dimension_numbers<[1], [0], [0], [1], [0, 0, 1, 1], [], []>} : vector<8x64xf32>, vector<64x64xf32>, vector<8x64xf32> -> vector<8x64xf32>
    %395 = vector.broadcast %90 : vector<8x1xf32> to vector<8x64xf32>
    %396 = arith.addf %394, %395 : vector<8x64xf32>
    %397 = arith.mulf %36, %63 : vector<8x64xf32>
    %cst_85 = arith.constant dense<0.000000e+00> : vector<8x64xf32>
    %398 = tpu.matmul %397, %0, %cst_85 {dimension_numbers = #tpu.dot_dimension_numbers<[1], [0], [0], [1], [0, 0, 1, 1], [], []>} : vector<8x64xf32>, vector<64x64xf32>, vector<8x64xf32> -> vector<8x64xf32>
    %399 = vector.broadcast %91 : vector<8x1xf32> to vector<8x64xf32>
    %400 = arith.addf %398, %399 : vector<8x64xf32>
    %401 = arith.maximumf %376, %380 : vector<8x64xf32>
    %402 = arith.maximumf %401, %384 : vector<8x64xf32>
    %403 = arith.maximumf %402, %388 : vector<8x64xf32>
    %404 = arith.maximumf %403, %392 : vector<8x64xf32>
    %405 = arith.maximumf %404, %396 : vector<8x64xf32>
    %406 = arith.maximumf %405, %400 : vector<8x64xf32>
    %407 = arith.subf %376, %406 : vector<8x64xf32>
    %408 = math.exp %407 : vector<8x64xf32>
    %409 = arith.subf %380, %406 : vector<8x64xf32>
    %410 = math.exp %409 : vector<8x64xf32>
    %411 = arith.subf %384, %406 : vector<8x64xf32>
    %412 = math.exp %411 : vector<8x64xf32>
    %413 = arith.subf %388, %406 : vector<8x64xf32>
    %414 = math.exp %413 : vector<8x64xf32>
    %415 = arith.subf %392, %406 : vector<8x64xf32>
    %416 = math.exp %415 : vector<8x64xf32>
    %417 = arith.subf %396, %406 : vector<8x64xf32>
    %418 = math.exp %417 : vector<8x64xf32>
    %419 = arith.subf %400, %406 : vector<8x64xf32>
    %420 = math.exp %419 : vector<8x64xf32>
    %421 = arith.mulf %408, %66 : vector<8x64xf32>
    %422 = arith.addf %408, %410 : vector<8x64xf32>
    %423 = arith.mulf %410, %69 : vector<8x64xf32>
    %424 = arith.addf %421, %423 : vector<8x64xf32>
    %425 = arith.addf %422, %412 : vector<8x64xf32>
    %426 = arith.mulf %412, %72 : vector<8x64xf32>
    %427 = arith.addf %424, %426 : vector<8x64xf32>
    %428 = arith.addf %425, %414 : vector<8x64xf32>
    %429 = arith.mulf %414, %75 : vector<8x64xf32>
    %430 = arith.addf %427, %429 : vector<8x64xf32>
    %431 = arith.addf %428, %416 : vector<8x64xf32>
    %432 = arith.mulf %416, %78 : vector<8x64xf32>
    %433 = arith.addf %430, %432 : vector<8x64xf32>
    %434 = arith.addf %431, %418 : vector<8x64xf32>
    %435 = arith.mulf %418, %81 : vector<8x64xf32>
    %436 = arith.addf %433, %435 : vector<8x64xf32>
    %437 = arith.addf %434, %420 : vector<8x64xf32>
    %438 = arith.mulf %420, %84 : vector<8x64xf32>
    %439 = arith.addf %436, %438 : vector<8x64xf32>
    %440 = tpu.reciprocal %437 {approx = true} : vector<8x64xf32> -> vector<8x64xf32>
    %441 = arith.mulf %439, %440 : vector<8x64xf32>
    %442 = arith.addf %372, %441 : vector<8x64xf32>
    %443 = arith.mulf %39, %45 : vector<8x64xf32>
    %cst_86 = arith.constant dense<0.000000e+00> : vector<8x64xf32>
    %444 = tpu.matmul %443, %0, %cst_86 {dimension_numbers = #tpu.dot_dimension_numbers<[1], [0], [0], [1], [0, 0, 1, 1], [], []>} : vector<8x64xf32>, vector<64x64xf32>, vector<8x64xf32> -> vector<8x64xf32>
    %445 = vector.broadcast %85 : vector<8x1xf32> to vector<8x64xf32>
    %446 = arith.addf %444, %445 : vector<8x64xf32>
    %447 = arith.mulf %39, %48 : vector<8x64xf32>
    %cst_87 = arith.constant dense<0.000000e+00> : vector<8x64xf32>
    %448 = tpu.matmul %447, %0, %cst_87 {dimension_numbers = #tpu.dot_dimension_numbers<[1], [0], [0], [1], [0, 0, 1, 1], [], []>} : vector<8x64xf32>, vector<64x64xf32>, vector<8x64xf32> -> vector<8x64xf32>
    %449 = vector.broadcast %86 : vector<8x1xf32> to vector<8x64xf32>
    %450 = arith.addf %448, %449 : vector<8x64xf32>
    %451 = arith.mulf %39, %51 : vector<8x64xf32>
    %cst_88 = arith.constant dense<0.000000e+00> : vector<8x64xf32>
    %452 = tpu.matmul %451, %0, %cst_88 {dimension_numbers = #tpu.dot_dimension_numbers<[1], [0], [0], [1], [0, 0, 1, 1], [], []>} : vector<8x64xf32>, vector<64x64xf32>, vector<8x64xf32> -> vector<8x64xf32>
    %453 = vector.broadcast %87 : vector<8x1xf32> to vector<8x64xf32>
    %454 = arith.addf %452, %453 : vector<8x64xf32>
    %455 = arith.mulf %39, %54 : vector<8x64xf32>
    %cst_89 = arith.constant dense<0.000000e+00> : vector<8x64xf32>
    %456 = tpu.matmul %455, %0, %cst_89 {dimension_numbers = #tpu.dot_dimension_numbers<[1], [0], [0], [1], [0, 0, 1, 1], [], []>} : vector<8x64xf32>, vector<64x64xf32>, vector<8x64xf32> -> vector<8x64xf32>
    %457 = vector.broadcast %88 : vector<8x1xf32> to vector<8x64xf32>
    %458 = arith.addf %456, %457 : vector<8x64xf32>
    %459 = arith.mulf %39, %57 : vector<8x64xf32>
    %cst_90 = arith.constant dense<0.000000e+00> : vector<8x64xf32>
    %460 = tpu.matmul %459, %0, %cst_90 {dimension_numbers = #tpu.dot_dimension_numbers<[1], [0], [0], [1], [0, 0, 1, 1], [], []>} : vector<8x64xf32>, vector<64x64xf32>, vector<8x64xf32> -> vector<8x64xf32>
    %461 = vector.broadcast %89 : vector<8x1xf32> to vector<8x64xf32>
    %462 = arith.addf %460, %461 : vector<8x64xf32>
    %463 = arith.mulf %39, %60 : vector<8x64xf32>
    %cst_91 = arith.constant dense<0.000000e+00> : vector<8x64xf32>
    %464 = tpu.matmul %463, %0, %cst_91 {dimension_numbers = #tpu.dot_dimension_numbers<[1], [0], [0], [1], [0, 0, 1, 1], [], []>} : vector<8x64xf32>, vector<64x64xf32>, vector<8x64xf32> -> vector<8x64xf32>
    %465 = vector.broadcast %90 : vector<8x1xf32> to vector<8x64xf32>
    %466 = arith.addf %464, %465 : vector<8x64xf32>
    %467 = arith.mulf %39, %63 : vector<8x64xf32>
    %cst_92 = arith.constant dense<0.000000e+00> : vector<8x64xf32>
    %468 = tpu.matmul %467, %0, %cst_92 {dimension_numbers = #tpu.dot_dimension_numbers<[1], [0], [0], [1], [0, 0, 1, 1], [], []>} : vector<8x64xf32>, vector<64x64xf32>, vector<8x64xf32> -> vector<8x64xf32>
    %469 = vector.broadcast %91 : vector<8x1xf32> to vector<8x64xf32>
    %470 = arith.addf %468, %469 : vector<8x64xf32>
    %471 = arith.maximumf %446, %450 : vector<8x64xf32>
    %472 = arith.maximumf %471, %454 : vector<8x64xf32>
    %473 = arith.maximumf %472, %458 : vector<8x64xf32>
    %474 = arith.maximumf %473, %462 : vector<8x64xf32>
    %475 = arith.maximumf %474, %466 : vector<8x64xf32>
    %476 = arith.maximumf %475, %470 : vector<8x64xf32>
    %477 = arith.subf %446, %476 : vector<8x64xf32>
    %478 = math.exp %477 : vector<8x64xf32>
    %479 = arith.subf %450, %476 : vector<8x64xf32>
    %480 = math.exp %479 : vector<8x64xf32>
    %481 = arith.subf %454, %476 : vector<8x64xf32>
    %482 = math.exp %481 : vector<8x64xf32>
    %483 = arith.subf %458, %476 : vector<8x64xf32>
    %484 = math.exp %483 : vector<8x64xf32>
    %485 = arith.subf %462, %476 : vector<8x64xf32>
    %486 = math.exp %485 : vector<8x64xf32>
    %487 = arith.subf %466, %476 : vector<8x64xf32>
    %488 = math.exp %487 : vector<8x64xf32>
    %489 = arith.subf %470, %476 : vector<8x64xf32>
    %490 = math.exp %489 : vector<8x64xf32>
    %491 = arith.mulf %478, %66 : vector<8x64xf32>
    %492 = arith.addf %478, %480 : vector<8x64xf32>
    %493 = arith.mulf %480, %69 : vector<8x64xf32>
    %494 = arith.addf %491, %493 : vector<8x64xf32>
    %495 = arith.addf %492, %482 : vector<8x64xf32>
    %496 = arith.mulf %482, %72 : vector<8x64xf32>
    %497 = arith.addf %494, %496 : vector<8x64xf32>
    %498 = arith.addf %495, %484 : vector<8x64xf32>
    %499 = arith.mulf %484, %75 : vector<8x64xf32>
    %500 = arith.addf %497, %499 : vector<8x64xf32>
    %501 = arith.addf %498, %486 : vector<8x64xf32>
    %502 = arith.mulf %486, %78 : vector<8x64xf32>
    %503 = arith.addf %500, %502 : vector<8x64xf32>
    %504 = arith.addf %501, %488 : vector<8x64xf32>
    %505 = arith.mulf %488, %81 : vector<8x64xf32>
    %506 = arith.addf %503, %505 : vector<8x64xf32>
    %507 = arith.addf %504, %490 : vector<8x64xf32>
    %508 = arith.mulf %490, %84 : vector<8x64xf32>
    %509 = arith.addf %506, %508 : vector<8x64xf32>
    %510 = tpu.reciprocal %507 {approx = true} : vector<8x64xf32> -> vector<8x64xf32>
    %511 = arith.mulf %509, %510 : vector<8x64xf32>
    %512 = arith.addf %442, %511 : vector<8x64xf32>
    %513 = arith.mulf %42, %45 : vector<8x64xf32>
    %cst_93 = arith.constant dense<0.000000e+00> : vector<8x64xf32>
    %514 = tpu.matmul %513, %0, %cst_93 {dimension_numbers = #tpu.dot_dimension_numbers<[1], [0], [0], [1], [0, 0, 1, 1], [], []>} : vector<8x64xf32>, vector<64x64xf32>, vector<8x64xf32> -> vector<8x64xf32>
    %515 = vector.broadcast %85 : vector<8x1xf32> to vector<8x64xf32>
    %516 = arith.addf %514, %515 : vector<8x64xf32>
    %517 = arith.mulf %42, %48 : vector<8x64xf32>
    %cst_94 = arith.constant dense<0.000000e+00> : vector<8x64xf32>
    %518 = tpu.matmul %517, %0, %cst_94 {dimension_numbers = #tpu.dot_dimension_numbers<[1], [0], [0], [1], [0, 0, 1, 1], [], []>} : vector<8x64xf32>, vector<64x64xf32>, vector<8x64xf32> -> vector<8x64xf32>
    %519 = vector.broadcast %86 : vector<8x1xf32> to vector<8x64xf32>
    %520 = arith.addf %518, %519 : vector<8x64xf32>
    %521 = arith.mulf %42, %51 : vector<8x64xf32>
    %cst_95 = arith.constant dense<0.000000e+00> : vector<8x64xf32>
    %522 = tpu.matmul %521, %0, %cst_95 {dimension_numbers = #tpu.dot_dimension_numbers<[1], [0], [0], [1], [0, 0, 1, 1], [], []>} : vector<8x64xf32>, vector<64x64xf32>, vector<8x64xf32> -> vector<8x64xf32>
    %523 = vector.broadcast %87 : vector<8x1xf32> to vector<8x64xf32>
    %524 = arith.addf %522, %523 : vector<8x64xf32>
    %525 = arith.mulf %42, %54 : vector<8x64xf32>
    %cst_96 = arith.constant dense<0.000000e+00> : vector<8x64xf32>
    %526 = tpu.matmul %525, %0, %cst_96 {dimension_numbers = #tpu.dot_dimension_numbers<[1], [0], [0], [1], [0, 0, 1, 1], [], []>} : vector<8x64xf32>, vector<64x64xf32>, vector<8x64xf32> -> vector<8x64xf32>
    %527 = vector.broadcast %88 : vector<8x1xf32> to vector<8x64xf32>
    %528 = arith.addf %526, %527 : vector<8x64xf32>
    %529 = arith.mulf %42, %57 : vector<8x64xf32>
    %cst_97 = arith.constant dense<0.000000e+00> : vector<8x64xf32>
    %530 = tpu.matmul %529, %0, %cst_97 {dimension_numbers = #tpu.dot_dimension_numbers<[1], [0], [0], [1], [0, 0, 1, 1], [], []>} : vector<8x64xf32>, vector<64x64xf32>, vector<8x64xf32> -> vector<8x64xf32>
    %531 = vector.broadcast %89 : vector<8x1xf32> to vector<8x64xf32>
    %532 = arith.addf %530, %531 : vector<8x64xf32>
    %533 = arith.mulf %42, %60 : vector<8x64xf32>
    %cst_98 = arith.constant dense<0.000000e+00> : vector<8x64xf32>
    %534 = tpu.matmul %533, %0, %cst_98 {dimension_numbers = #tpu.dot_dimension_numbers<[1], [0], [0], [1], [0, 0, 1, 1], [], []>} : vector<8x64xf32>, vector<64x64xf32>, vector<8x64xf32> -> vector<8x64xf32>
    %535 = vector.broadcast %90 : vector<8x1xf32> to vector<8x64xf32>
    %536 = arith.addf %534, %535 : vector<8x64xf32>
    %537 = arith.mulf %42, %63 : vector<8x64xf32>
    %cst_99 = arith.constant dense<0.000000e+00> : vector<8x64xf32>
    %538 = tpu.matmul %537, %0, %cst_99 {dimension_numbers = #tpu.dot_dimension_numbers<[1], [0], [0], [1], [0, 0, 1, 1], [], []>} : vector<8x64xf32>, vector<64x64xf32>, vector<8x64xf32> -> vector<8x64xf32>
    %539 = vector.broadcast %91 : vector<8x1xf32> to vector<8x64xf32>
    %540 = arith.addf %538, %539 : vector<8x64xf32>
    %541 = arith.maximumf %516, %520 : vector<8x64xf32>
    %542 = arith.maximumf %541, %524 : vector<8x64xf32>
    %543 = arith.maximumf %542, %528 : vector<8x64xf32>
    %544 = arith.maximumf %543, %532 : vector<8x64xf32>
    %545 = arith.maximumf %544, %536 : vector<8x64xf32>
    %546 = arith.maximumf %545, %540 : vector<8x64xf32>
    %547 = arith.subf %516, %546 : vector<8x64xf32>
    %548 = math.exp %547 : vector<8x64xf32>
    %549 = arith.subf %520, %546 : vector<8x64xf32>
    %550 = math.exp %549 : vector<8x64xf32>
    %551 = arith.subf %524, %546 : vector<8x64xf32>
    %552 = math.exp %551 : vector<8x64xf32>
    %553 = arith.subf %528, %546 : vector<8x64xf32>
    %554 = math.exp %553 : vector<8x64xf32>
    %555 = arith.subf %532, %546 : vector<8x64xf32>
    %556 = math.exp %555 : vector<8x64xf32>
    %557 = arith.subf %536, %546 : vector<8x64xf32>
    %558 = math.exp %557 : vector<8x64xf32>
    %559 = arith.subf %540, %546 : vector<8x64xf32>
    %560 = math.exp %559 : vector<8x64xf32>
    %561 = arith.mulf %548, %66 : vector<8x64xf32>
    %562 = arith.addf %548, %550 : vector<8x64xf32>
    %563 = arith.mulf %550, %69 : vector<8x64xf32>
    %564 = arith.addf %561, %563 : vector<8x64xf32>
    %565 = arith.addf %562, %552 : vector<8x64xf32>
    %566 = arith.mulf %552, %72 : vector<8x64xf32>
    %567 = arith.addf %564, %566 : vector<8x64xf32>
    %568 = arith.addf %565, %554 : vector<8x64xf32>
    %569 = arith.mulf %554, %75 : vector<8x64xf32>
    %570 = arith.addf %567, %569 : vector<8x64xf32>
    %571 = arith.addf %568, %556 : vector<8x64xf32>
    %572 = arith.mulf %556, %78 : vector<8x64xf32>
    %573 = arith.addf %570, %572 : vector<8x64xf32>
    %574 = arith.addf %571, %558 : vector<8x64xf32>
    %575 = arith.mulf %558, %81 : vector<8x64xf32>
    %576 = arith.addf %573, %575 : vector<8x64xf32>
    %577 = arith.addf %574, %560 : vector<8x64xf32>
    %578 = arith.mulf %560, %84 : vector<8x64xf32>
    %579 = arith.addf %576, %578 : vector<8x64xf32>
    %580 = tpu.reciprocal %577 {approx = true} : vector<8x64xf32> -> vector<8x64xf32>
    %581 = arith.mulf %579, %580 : vector<8x64xf32>
    %582 = arith.addf %512, %581 : vector<8x64xf32>
    %cst_100 = arith.constant 0.142857149 : f32
    %583 = vector.broadcast %cst_100 : f32 to vector<8x64xf32>
    %584 = arith.mulf %582, %583 : vector<8x64xf32>
    %c0_101 = arith.constant 0 : index
    %c0_102 = arith.constant 0 : index
    %585 = vector.load %arg5[%c0_101, %c0_102] : memref<8x6xf32, #tpu.memory_space<vmem>>, vector<8x6xf32>
    %c0_103 = arith.constant 0 : index
    %c0_104 = arith.constant 0 : index
    %586 = vector.load %arg12[%c0_103, %c0_104] : memref<5x64xf32, #tpu.memory_space<vmem>>, vector<5x64xf32>
    %c0_105 = arith.constant 0 : index
    %c0_106 = arith.constant 0 : index
    %587 = vector.load %arg13[%c0_105, %c0_106] : memref<1x64xf32, #tpu.memory_space<vmem>>, vector<1x64xf32>
    %c0_107 = arith.constant 0 : index
    %c0_108 = arith.constant 0 : index
    %588 = vector.load %arg14[%c0_107, %c0_108] : memref<5x64xf32, #tpu.memory_space<vmem>>, vector<5x64xf32>
    %c0_109 = arith.constant 0 : index
    %c0_110 = arith.constant 0 : index
    %589 = vector.load %arg15[%c0_109, %c0_110] : memref<1x64xf32, #tpu.memory_space<vmem>>, vector<1x64xf32>
    %c0_111 = arith.constant 0 : index
    %c0_112 = arith.constant 0 : index
    %590 = vector.load %arg16[%c0_111, %c0_112] : memref<5x64xf32, #tpu.memory_space<vmem>>, vector<5x64xf32>
    %c0_113 = arith.constant 0 : index
    %c0_114 = arith.constant 0 : index
    %591 = vector.load %arg17[%c0_113, %c0_114] : memref<1x64xf32, #tpu.memory_space<vmem>>, vector<1x64xf32>
    %c0_115 = arith.constant 0 : index
    %c0_116 = arith.constant 0 : index
    %c0_117 = arith.constant 0 : index
    %592 = vector.load %arg4[%c0_115, %c0_116, %c0_117] : memref<6x8x5xf32, #tpu.memory_space<vmem>>, vector<1x8x5xf32>
    %593 = vector.shape_cast %592 : vector<1x8x5xf32> to vector<8x5xf32>
    %c1_118 = arith.constant 1 : index
    %c0_119 = arith.constant 0 : index
    %c0_120 = arith.constant 0 : index
    %594 = vector.load %arg4[%c1_118, %c0_119, %c0_120] : memref<6x8x5xf32, #tpu.memory_space<vmem>>, vector<1x8x5xf32>
    %595 = vector.shape_cast %594 : vector<1x8x5xf32> to vector<8x5xf32>
    %c2_121 = arith.constant 2 : index
    %c0_122 = arith.constant 0 : index
    %c0_123 = arith.constant 0 : index
    %596 = vector.load %arg4[%c2_121, %c0_122, %c0_123] : memref<6x8x5xf32, #tpu.memory_space<vmem>>, vector<1x8x5xf32>
    %597 = vector.shape_cast %596 : vector<1x8x5xf32> to vector<8x5xf32>
    %c3_124 = arith.constant 3 : index
    %c0_125 = arith.constant 0 : index
    %c0_126 = arith.constant 0 : index
    %598 = vector.load %arg4[%c3_124, %c0_125, %c0_126] : memref<6x8x5xf32, #tpu.memory_space<vmem>>, vector<1x8x5xf32>
    %599 = vector.shape_cast %598 : vector<1x8x5xf32> to vector<8x5xf32>
    %c4_127 = arith.constant 4 : index
    %c0_128 = arith.constant 0 : index
    %c0_129 = arith.constant 0 : index
    %600 = vector.load %arg4[%c4_127, %c0_128, %c0_129] : memref<6x8x5xf32, #tpu.memory_space<vmem>>, vector<1x8x5xf32>
    %601 = vector.shape_cast %600 : vector<1x8x5xf32> to vector<8x5xf32>
    %c5_130 = arith.constant 5 : index
    %c0_131 = arith.constant 0 : index
    %c0_132 = arith.constant 0 : index
    %602 = vector.load %arg4[%c5_130, %c0_131, %c0_132] : memref<6x8x5xf32, #tpu.memory_space<vmem>>, vector<1x8x5xf32>
    %603 = vector.shape_cast %602 : vector<1x8x5xf32> to vector<8x5xf32>
    %cst_133 = arith.constant dense<0.000000e+00> : vector<8x64xf32>
    %604 = tpu.matmul %593, %586, %cst_133 {dimension_numbers = #tpu.dot_dimension_numbers<[1], [0], [0], [1], [0, 0, 1, 1], [], []>} : vector<8x5xf32>, vector<5x64xf32>, vector<8x64xf32> -> vector<8x64xf32>
    %605 = vector.broadcast %587 : vector<1x64xf32> to vector<8x64xf32>
    %606 = arith.addf %604, %605 : vector<8x64xf32>
    %cst_134 = arith.constant dense<0.000000e+00> : vector<8x64xf32>
    %607 = tpu.matmul %595, %586, %cst_134 {dimension_numbers = #tpu.dot_dimension_numbers<[1], [0], [0], [1], [0, 0, 1, 1], [], []>} : vector<8x5xf32>, vector<5x64xf32>, vector<8x64xf32> -> vector<8x64xf32>
    %608 = vector.broadcast %587 : vector<1x64xf32> to vector<8x64xf32>
    %609 = arith.addf %607, %608 : vector<8x64xf32>
    %cst_135 = arith.constant dense<0.000000e+00> : vector<8x64xf32>
    %610 = tpu.matmul %597, %586, %cst_135 {dimension_numbers = #tpu.dot_dimension_numbers<[1], [0], [0], [1], [0, 0, 1, 1], [], []>} : vector<8x5xf32>, vector<5x64xf32>, vector<8x64xf32> -> vector<8x64xf32>
    %611 = vector.broadcast %587 : vector<1x64xf32> to vector<8x64xf32>
    %612 = arith.addf %610, %611 : vector<8x64xf32>
    %cst_136 = arith.constant dense<0.000000e+00> : vector<8x64xf32>
    %613 = tpu.matmul %599, %586, %cst_136 {dimension_numbers = #tpu.dot_dimension_numbers<[1], [0], [0], [1], [0, 0, 1, 1], [], []>} : vector<8x5xf32>, vector<5x64xf32>, vector<8x64xf32> -> vector<8x64xf32>
    %614 = vector.broadcast %587 : vector<1x64xf32> to vector<8x64xf32>
    %615 = arith.addf %613, %614 : vector<8x64xf32>
    %cst_137 = arith.constant dense<0.000000e+00> : vector<8x64xf32>
    %616 = tpu.matmul %601, %586, %cst_137 {dimension_numbers = #tpu.dot_dimension_numbers<[1], [0], [0], [1], [0, 0, 1, 1], [], []>} : vector<8x5xf32>, vector<5x64xf32>, vector<8x64xf32> -> vector<8x64xf32>
    %617 = vector.broadcast %587 : vector<1x64xf32> to vector<8x64xf32>
    %618 = arith.addf %616, %617 : vector<8x64xf32>
    %cst_138 = arith.constant dense<0.000000e+00> : vector<8x64xf32>
    %619 = tpu.matmul %603, %586, %cst_138 {dimension_numbers = #tpu.dot_dimension_numbers<[1], [0], [0], [1], [0, 0, 1, 1], [], []>} : vector<8x5xf32>, vector<5x64xf32>, vector<8x64xf32> -> vector<8x64xf32>
    %620 = vector.broadcast %587 : vector<1x64xf32> to vector<8x64xf32>
    %621 = arith.addf %619, %620 : vector<8x64xf32>
    %cst_139 = arith.constant dense<0.000000e+00> : vector<8x64xf32>
    %622 = tpu.matmul %593, %588, %cst_139 {dimension_numbers = #tpu.dot_dimension_numbers<[1], [0], [0], [1], [0, 0, 1, 1], [], []>} : vector<8x5xf32>, vector<5x64xf32>, vector<8x64xf32> -> vector<8x64xf32>
    %623 = vector.broadcast %589 : vector<1x64xf32> to vector<8x64xf32>
    %624 = arith.addf %622, %623 : vector<8x64xf32>
    %cst_140 = arith.constant dense<0.000000e+00> : vector<8x64xf32>
    %625 = tpu.matmul %595, %588, %cst_140 {dimension_numbers = #tpu.dot_dimension_numbers<[1], [0], [0], [1], [0, 0, 1, 1], [], []>} : vector<8x5xf32>, vector<5x64xf32>, vector<8x64xf32> -> vector<8x64xf32>
    %626 = vector.broadcast %589 : vector<1x64xf32> to vector<8x64xf32>
    %627 = arith.addf %625, %626 : vector<8x64xf32>
    %cst_141 = arith.constant dense<0.000000e+00> : vector<8x64xf32>
    %628 = tpu.matmul %597, %588, %cst_141 {dimension_numbers = #tpu.dot_dimension_numbers<[1], [0], [0], [1], [0, 0, 1, 1], [], []>} : vector<8x5xf32>, vector<5x64xf32>, vector<8x64xf32> -> vector<8x64xf32>
    %629 = vector.broadcast %589 : vector<1x64xf32> to vector<8x64xf32>
    %630 = arith.addf %628, %629 : vector<8x64xf32>
    %cst_142 = arith.constant dense<0.000000e+00> : vector<8x64xf32>
    %631 = tpu.matmul %599, %588, %cst_142 {dimension_numbers = #tpu.dot_dimension_numbers<[1], [0], [0], [1], [0, 0, 1, 1], [], []>} : vector<8x5xf32>, vector<5x64xf32>, vector<8x64xf32> -> vector<8x64xf32>
    %632 = vector.broadcast %589 : vector<1x64xf32> to vector<8x64xf32>
    %633 = arith.addf %631, %632 : vector<8x64xf32>
    %cst_143 = arith.constant dense<0.000000e+00> : vector<8x64xf32>
    %634 = tpu.matmul %601, %588, %cst_143 {dimension_numbers = #tpu.dot_dimension_numbers<[1], [0], [0], [1], [0, 0, 1, 1], [], []>} : vector<8x5xf32>, vector<5x64xf32>, vector<8x64xf32> -> vector<8x64xf32>
    %635 = vector.broadcast %589 : vector<1x64xf32> to vector<8x64xf32>
    %636 = arith.addf %634, %635 : vector<8x64xf32>
    %cst_144 = arith.constant dense<0.000000e+00> : vector<8x64xf32>
    %637 = tpu.matmul %603, %588, %cst_144 {dimension_numbers = #tpu.dot_dimension_numbers<[1], [0], [0], [1], [0, 0, 1, 1], [], []>} : vector<8x5xf32>, vector<5x64xf32>, vector<8x64xf32> -> vector<8x64xf32>
    %638 = vector.broadcast %589 : vector<1x64xf32> to vector<8x64xf32>
    %639 = arith.addf %637, %638 : vector<8x64xf32>
    %cst_145 = arith.constant dense<0.000000e+00> : vector<8x64xf32>
    %640 = tpu.matmul %593, %590, %cst_145 {dimension_numbers = #tpu.dot_dimension_numbers<[1], [0], [0], [1], [0, 0, 1, 1], [], []>} : vector<8x5xf32>, vector<5x64xf32>, vector<8x64xf32> -> vector<8x64xf32>
    %641 = vector.broadcast %591 : vector<1x64xf32> to vector<8x64xf32>
    %642 = arith.addf %640, %641 : vector<8x64xf32>
    %cst_146 = arith.constant dense<0.000000e+00> : vector<8x64xf32>
    %643 = tpu.matmul %595, %590, %cst_146 {dimension_numbers = #tpu.dot_dimension_numbers<[1], [0], [0], [1], [0, 0, 1, 1], [], []>} : vector<8x5xf32>, vector<5x64xf32>, vector<8x64xf32> -> vector<8x64xf32>
    %644 = vector.broadcast %591 : vector<1x64xf32> to vector<8x64xf32>
    %645 = arith.addf %643, %644 : vector<8x64xf32>
    %cst_147 = arith.constant dense<0.000000e+00> : vector<8x64xf32>
    %646 = tpu.matmul %597, %590, %cst_147 {dimension_numbers = #tpu.dot_dimension_numbers<[1], [0], [0], [1], [0, 0, 1, 1], [], []>} : vector<8x5xf32>, vector<5x64xf32>, vector<8x64xf32> -> vector<8x64xf32>
    %647 = vector.broadcast %591 : vector<1x64xf32> to vector<8x64xf32>
    %648 = arith.addf %646, %647 : vector<8x64xf32>
    %cst_148 = arith.constant dense<0.000000e+00> : vector<8x64xf32>
    %649 = tpu.matmul %599, %590, %cst_148 {dimension_numbers = #tpu.dot_dimension_numbers<[1], [0], [0], [1], [0, 0, 1, 1], [], []>} : vector<8x5xf32>, vector<5x64xf32>, vector<8x64xf32> -> vector<8x64xf32>
    %650 = vector.broadcast %591 : vector<1x64xf32> to vector<8x64xf32>
    %651 = arith.addf %649, %650 : vector<8x64xf32>
    %cst_149 = arith.constant dense<0.000000e+00> : vector<8x64xf32>
    %652 = tpu.matmul %601, %590, %cst_149 {dimension_numbers = #tpu.dot_dimension_numbers<[1], [0], [0], [1], [0, 0, 1, 1], [], []>} : vector<8x5xf32>, vector<5x64xf32>, vector<8x64xf32> -> vector<8x64xf32>
    %653 = vector.broadcast %591 : vector<1x64xf32> to vector<8x64xf32>
    %654 = arith.addf %652, %653 : vector<8x64xf32>
    %cst_150 = arith.constant dense<0.000000e+00> : vector<8x64xf32>
    %655 = tpu.matmul %603, %590, %cst_150 {dimension_numbers = #tpu.dot_dimension_numbers<[1], [0], [0], [1], [0, 0, 1, 1], [], []>} : vector<8x5xf32>, vector<5x64xf32>, vector<8x64xf32> -> vector<8x64xf32>
    %656 = vector.broadcast %591 : vector<1x64xf32> to vector<8x64xf32>
    %657 = arith.addf %655, %656 : vector<8x64xf32>
    %658 = vector.extract_strided_slice %585 {offsets = [0, 0], sizes = [8, 1], strides = [1, 1]} : vector<8x6xf32> to vector<8x1xf32>
    %659 = vector.extract_strided_slice %585 {offsets = [0, 1], sizes = [8, 1], strides = [1, 1]} : vector<8x6xf32> to vector<8x1xf32>
    %660 = vector.extract_strided_slice %585 {offsets = [0, 2], sizes = [8, 1], strides = [1, 1]} : vector<8x6xf32> to vector<8x1xf32>
    %661 = vector.extract_strided_slice %585 {offsets = [0, 3], sizes = [8, 1], strides = [1, 1]} : vector<8x6xf32> to vector<8x1xf32>
    %662 = vector.extract_strided_slice %585 {offsets = [0, 4], sizes = [8, 1], strides = [1, 1]} : vector<8x6xf32> to vector<8x1xf32>
    %663 = vector.extract_strided_slice %585 {offsets = [0, 5], sizes = [8, 1], strides = [1, 1]} : vector<8x6xf32> to vector<8x1xf32>
    %cst_151 = arith.constant 0.000000e+00 : f32
    %664 = vector.broadcast %cst_151 : f32 to vector<8x64xf32>
    %665 = arith.mulf %606, %624 : vector<8x64xf32>
    %cst_152 = arith.constant dense<0.000000e+00> : vector<8x64xf32>
    %666 = tpu.matmul %665, %0, %cst_152 {dimension_numbers = #tpu.dot_dimension_numbers<[1], [0], [0], [1], [0, 0, 1, 1], [], []>} : vector<8x64xf32>, vector<64x64xf32>, vector<8x64xf32> -> vector<8x64xf32>
    %667 = vector.broadcast %658 : vector<8x1xf32> to vector<8x64xf32>
    %668 = arith.addf %666, %667 : vector<8x64xf32>
    %669 = arith.mulf %606, %627 : vector<8x64xf32>
    %cst_153 = arith.constant dense<0.000000e+00> : vector<8x64xf32>
    %670 = tpu.matmul %669, %0, %cst_153 {dimension_numbers = #tpu.dot_dimension_numbers<[1], [0], [0], [1], [0, 0, 1, 1], [], []>} : vector<8x64xf32>, vector<64x64xf32>, vector<8x64xf32> -> vector<8x64xf32>
    %671 = vector.broadcast %659 : vector<8x1xf32> to vector<8x64xf32>
    %672 = arith.addf %670, %671 : vector<8x64xf32>
    %673 = arith.mulf %606, %630 : vector<8x64xf32>
    %cst_154 = arith.constant dense<0.000000e+00> : vector<8x64xf32>
    %674 = tpu.matmul %673, %0, %cst_154 {dimension_numbers = #tpu.dot_dimension_numbers<[1], [0], [0], [1], [0, 0, 1, 1], [], []>} : vector<8x64xf32>, vector<64x64xf32>, vector<8x64xf32> -> vector<8x64xf32>
    %675 = vector.broadcast %660 : vector<8x1xf32> to vector<8x64xf32>
    %676 = arith.addf %674, %675 : vector<8x64xf32>
    %677 = arith.mulf %606, %633 : vector<8x64xf32>
    %cst_155 = arith.constant dense<0.000000e+00> : vector<8x64xf32>
    %678 = tpu.matmul %677, %0, %cst_155 {dimension_numbers = #tpu.dot_dimension_numbers<[1], [0], [0], [1], [0, 0, 1, 1], [], []>} : vector<8x64xf32>, vector<64x64xf32>, vector<8x64xf32> -> vector<8x64xf32>
    %679 = vector.broadcast %661 : vector<8x1xf32> to vector<8x64xf32>
    %680 = arith.addf %678, %679 : vector<8x64xf32>
    %681 = arith.mulf %606, %636 : vector<8x64xf32>
    %cst_156 = arith.constant dense<0.000000e+00> : vector<8x64xf32>
    %682 = tpu.matmul %681, %0, %cst_156 {dimension_numbers = #tpu.dot_dimension_numbers<[1], [0], [0], [1], [0, 0, 1, 1], [], []>} : vector<8x64xf32>, vector<64x64xf32>, vector<8x64xf32> -> vector<8x64xf32>
    %683 = vector.broadcast %662 : vector<8x1xf32> to vector<8x64xf32>
    %684 = arith.addf %682, %683 : vector<8x64xf32>
    %685 = arith.mulf %606, %639 : vector<8x64xf32>
    %cst_157 = arith.constant dense<0.000000e+00> : vector<8x64xf32>
    %686 = tpu.matmul %685, %0, %cst_157 {dimension_numbers = #tpu.dot_dimension_numbers<[1], [0], [0], [1], [0, 0, 1, 1], [], []>} : vector<8x64xf32>, vector<64x64xf32>, vector<8x64xf32> -> vector<8x64xf32>
    %687 = vector.broadcast %663 : vector<8x1xf32> to vector<8x64xf32>
    %688 = arith.addf %686, %687 : vector<8x64xf32>
    %689 = arith.maximumf %668, %672 : vector<8x64xf32>
    %690 = arith.maximumf %689, %676 : vector<8x64xf32>
    %691 = arith.maximumf %690, %680 : vector<8x64xf32>
    %692 = arith.maximumf %691, %684 : vector<8x64xf32>
    %693 = arith.maximumf %692, %688 : vector<8x64xf32>
    %694 = arith.subf %668, %693 : vector<8x64xf32>
    %695 = math.exp %694 : vector<8x64xf32>
    %696 = arith.subf %672, %693 : vector<8x64xf32>
    %697 = math.exp %696 : vector<8x64xf32>
    %698 = arith.subf %676, %693 : vector<8x64xf32>
    %699 = math.exp %698 : vector<8x64xf32>
    %700 = arith.subf %680, %693 : vector<8x64xf32>
    %701 = math.exp %700 : vector<8x64xf32>
    %702 = arith.subf %684, %693 : vector<8x64xf32>
    %703 = math.exp %702 : vector<8x64xf32>
    %704 = arith.subf %688, %693 : vector<8x64xf32>
    %705 = math.exp %704 : vector<8x64xf32>
    %706 = arith.mulf %695, %642 : vector<8x64xf32>
    %707 = arith.addf %695, %697 : vector<8x64xf32>
    %708 = arith.mulf %697, %645 : vector<8x64xf32>
    %709 = arith.addf %706, %708 : vector<8x64xf32>
    %710 = arith.addf %707, %699 : vector<8x64xf32>
    %711 = arith.mulf %699, %648 : vector<8x64xf32>
    %712 = arith.addf %709, %711 : vector<8x64xf32>
    %713 = arith.addf %710, %701 : vector<8x64xf32>
    %714 = arith.mulf %701, %651 : vector<8x64xf32>
    %715 = arith.addf %712, %714 : vector<8x64xf32>
    %716 = arith.addf %713, %703 : vector<8x64xf32>
    %717 = arith.mulf %703, %654 : vector<8x64xf32>
    %718 = arith.addf %715, %717 : vector<8x64xf32>
    %719 = arith.addf %716, %705 : vector<8x64xf32>
    %720 = arith.mulf %705, %657 : vector<8x64xf32>
    %721 = arith.addf %718, %720 : vector<8x64xf32>
    %722 = tpu.reciprocal %719 {approx = true} : vector<8x64xf32> -> vector<8x64xf32>
    %723 = arith.mulf %721, %722 : vector<8x64xf32>
    %724 = arith.addf %664, %723 : vector<8x64xf32>
    %725 = arith.mulf %609, %624 : vector<8x64xf32>
    %cst_158 = arith.constant dense<0.000000e+00> : vector<8x64xf32>
    %726 = tpu.matmul %725, %0, %cst_158 {dimension_numbers = #tpu.dot_dimension_numbers<[1], [0], [0], [1], [0, 0, 1, 1], [], []>} : vector<8x64xf32>, vector<64x64xf32>, vector<8x64xf32> -> vector<8x64xf32>
    %727 = vector.broadcast %658 : vector<8x1xf32> to vector<8x64xf32>
    %728 = arith.addf %726, %727 : vector<8x64xf32>
    %729 = arith.mulf %609, %627 : vector<8x64xf32>
    %cst_159 = arith.constant dense<0.000000e+00> : vector<8x64xf32>
    %730 = tpu.matmul %729, %0, %cst_159 {dimension_numbers = #tpu.dot_dimension_numbers<[1], [0], [0], [1], [0, 0, 1, 1], [], []>} : vector<8x64xf32>, vector<64x64xf32>, vector<8x64xf32> -> vector<8x64xf32>
    %731 = vector.broadcast %659 : vector<8x1xf32> to vector<8x64xf32>
    %732 = arith.addf %730, %731 : vector<8x64xf32>
    %733 = arith.mulf %609, %630 : vector<8x64xf32>
    %cst_160 = arith.constant dense<0.000000e+00> : vector<8x64xf32>
    %734 = tpu.matmul %733, %0, %cst_160 {dimension_numbers = #tpu.dot_dimension_numbers<[1], [0], [0], [1], [0, 0, 1, 1], [], []>} : vector<8x64xf32>, vector<64x64xf32>, vector<8x64xf32> -> vector<8x64xf32>
    %735 = vector.broadcast %660 : vector<8x1xf32> to vector<8x64xf32>
    %736 = arith.addf %734, %735 : vector<8x64xf32>
    %737 = arith.mulf %609, %633 : vector<8x64xf32>
    %cst_161 = arith.constant dense<0.000000e+00> : vector<8x64xf32>
    %738 = tpu.matmul %737, %0, %cst_161 {dimension_numbers = #tpu.dot_dimension_numbers<[1], [0], [0], [1], [0, 0, 1, 1], [], []>} : vector<8x64xf32>, vector<64x64xf32>, vector<8x64xf32> -> vector<8x64xf32>
    %739 = vector.broadcast %661 : vector<8x1xf32> to vector<8x64xf32>
    %740 = arith.addf %738, %739 : vector<8x64xf32>
    %741 = arith.mulf %609, %636 : vector<8x64xf32>
    %cst_162 = arith.constant dense<0.000000e+00> : vector<8x64xf32>
    %742 = tpu.matmul %741, %0, %cst_162 {dimension_numbers = #tpu.dot_dimension_numbers<[1], [0], [0], [1], [0, 0, 1, 1], [], []>} : vector<8x64xf32>, vector<64x64xf32>, vector<8x64xf32> -> vector<8x64xf32>
    %743 = vector.broadcast %662 : vector<8x1xf32> to vector<8x64xf32>
    %744 = arith.addf %742, %743 : vector<8x64xf32>
    %745 = arith.mulf %609, %639 : vector<8x64xf32>
    %cst_163 = arith.constant dense<0.000000e+00> : vector<8x64xf32>
    %746 = tpu.matmul %745, %0, %cst_163 {dimension_numbers = #tpu.dot_dimension_numbers<[1], [0], [0], [1], [0, 0, 1, 1], [], []>} : vector<8x64xf32>, vector<64x64xf32>, vector<8x64xf32> -> vector<8x64xf32>
    %747 = vector.broadcast %663 : vector<8x1xf32> to vector<8x64xf32>
    %748 = arith.addf %746, %747 : vector<8x64xf32>
    %749 = arith.maximumf %728, %732 : vector<8x64xf32>
    %750 = arith.maximumf %749, %736 : vector<8x64xf32>
    %751 = arith.maximumf %750, %740 : vector<8x64xf32>
    %752 = arith.maximumf %751, %744 : vector<8x64xf32>
    %753 = arith.maximumf %752, %748 : vector<8x64xf32>
    %754 = arith.subf %728, %753 : vector<8x64xf32>
    %755 = math.exp %754 : vector<8x64xf32>
    %756 = arith.subf %732, %753 : vector<8x64xf32>
    %757 = math.exp %756 : vector<8x64xf32>
    %758 = arith.subf %736, %753 : vector<8x64xf32>
    %759 = math.exp %758 : vector<8x64xf32>
    %760 = arith.subf %740, %753 : vector<8x64xf32>
    %761 = math.exp %760 : vector<8x64xf32>
    %762 = arith.subf %744, %753 : vector<8x64xf32>
    %763 = math.exp %762 : vector<8x64xf32>
    %764 = arith.subf %748, %753 : vector<8x64xf32>
    %765 = math.exp %764 : vector<8x64xf32>
    %766 = arith.mulf %755, %642 : vector<8x64xf32>
    %767 = arith.addf %755, %757 : vector<8x64xf32>
    %768 = arith.mulf %757, %645 : vector<8x64xf32>
    %769 = arith.addf %766, %768 : vector<8x64xf32>
    %770 = arith.addf %767, %759 : vector<8x64xf32>
    %771 = arith.mulf %759, %648 : vector<8x64xf32>
    %772 = arith.addf %769, %771 : vector<8x64xf32>
    %773 = arith.addf %770, %761 : vector<8x64xf32>
    %774 = arith.mulf %761, %651 : vector<8x64xf32>
    %775 = arith.addf %772, %774 : vector<8x64xf32>
    %776 = arith.addf %773, %763 : vector<8x64xf32>
    %777 = arith.mulf %763, %654 : vector<8x64xf32>
    %778 = arith.addf %775, %777 : vector<8x64xf32>
    %779 = arith.addf %776, %765 : vector<8x64xf32>
    %780 = arith.mulf %765, %657 : vector<8x64xf32>
    %781 = arith.addf %778, %780 : vector<8x64xf32>
    %782 = tpu.reciprocal %779 {approx = true} : vector<8x64xf32> -> vector<8x64xf32>
    %783 = arith.mulf %781, %782 : vector<8x64xf32>
    %784 = arith.addf %724, %783 : vector<8x64xf32>
    %785 = arith.mulf %612, %624 : vector<8x64xf32>
    %cst_164 = arith.constant dense<0.000000e+00> : vector<8x64xf32>
    %786 = tpu.matmul %785, %0, %cst_164 {dimension_numbers = #tpu.dot_dimension_numbers<[1], [0], [0], [1], [0, 0, 1, 1], [], []>} : vector<8x64xf32>, vector<64x64xf32>, vector<8x64xf32> -> vector<8x64xf32>
    %787 = vector.broadcast %658 : vector<8x1xf32> to vector<8x64xf32>
    %788 = arith.addf %786, %787 : vector<8x64xf32>
    %789 = arith.mulf %612, %627 : vector<8x64xf32>
    %cst_165 = arith.constant dense<0.000000e+00> : vector<8x64xf32>
    %790 = tpu.matmul %789, %0, %cst_165 {dimension_numbers = #tpu.dot_dimension_numbers<[1], [0], [0], [1], [0, 0, 1, 1], [], []>} : vector<8x64xf32>, vector<64x64xf32>, vector<8x64xf32> -> vector<8x64xf32>
    %791 = vector.broadcast %659 : vector<8x1xf32> to vector<8x64xf32>
    %792 = arith.addf %790, %791 : vector<8x64xf32>
    %793 = arith.mulf %612, %630 : vector<8x64xf32>
    %cst_166 = arith.constant dense<0.000000e+00> : vector<8x64xf32>
    %794 = tpu.matmul %793, %0, %cst_166 {dimension_numbers = #tpu.dot_dimension_numbers<[1], [0], [0], [1], [0, 0, 1, 1], [], []>} : vector<8x64xf32>, vector<64x64xf32>, vector<8x64xf32> -> vector<8x64xf32>
    %795 = vector.broadcast %660 : vector<8x1xf32> to vector<8x64xf32>
    %796 = arith.addf %794, %795 : vector<8x64xf32>
    %797 = arith.mulf %612, %633 : vector<8x64xf32>
    %cst_167 = arith.constant dense<0.000000e+00> : vector<8x64xf32>
    %798 = tpu.matmul %797, %0, %cst_167 {dimension_numbers = #tpu.dot_dimension_numbers<[1], [0], [0], [1], [0, 0, 1, 1], [], []>} : vector<8x64xf32>, vector<64x64xf32>, vector<8x64xf32> -> vector<8x64xf32>
    %799 = vector.broadcast %661 : vector<8x1xf32> to vector<8x64xf32>
    %800 = arith.addf %798, %799 : vector<8x64xf32>
    %801 = arith.mulf %612, %636 : vector<8x64xf32>
    %cst_168 = arith.constant dense<0.000000e+00> : vector<8x64xf32>
    %802 = tpu.matmul %801, %0, %cst_168 {dimension_numbers = #tpu.dot_dimension_numbers<[1], [0], [0], [1], [0, 0, 1, 1], [], []>} : vector<8x64xf32>, vector<64x64xf32>, vector<8x64xf32> -> vector<8x64xf32>
    %803 = vector.broadcast %662 : vector<8x1xf32> to vector<8x64xf32>
    %804 = arith.addf %802, %803 : vector<8x64xf32>
    %805 = arith.mulf %612, %639 : vector<8x64xf32>
    %cst_169 = arith.constant dense<0.000000e+00> : vector<8x64xf32>
    %806 = tpu.matmul %805, %0, %cst_169 {dimension_numbers = #tpu.dot_dimension_numbers<[1], [0], [0], [1], [0, 0, 1, 1], [], []>} : vector<8x64xf32>, vector<64x64xf32>, vector<8x64xf32> -> vector<8x64xf32>
    %807 = vector.broadcast %663 : vector<8x1xf32> to vector<8x64xf32>
    %808 = arith.addf %806, %807 : vector<8x64xf32>
    %809 = arith.maximumf %788, %792 : vector<8x64xf32>
    %810 = arith.maximumf %809, %796 : vector<8x64xf32>
    %811 = arith.maximumf %810, %800 : vector<8x64xf32>
    %812 = arith.maximumf %811, %804 : vector<8x64xf32>
    %813 = arith.maximumf %812, %808 : vector<8x64xf32>
    %814 = arith.subf %788, %813 : vector<8x64xf32>
    %815 = math.exp %814 : vector<8x64xf32>
    %816 = arith.subf %792, %813 : vector<8x64xf32>
    %817 = math.exp %816 : vector<8x64xf32>
    %818 = arith.subf %796, %813 : vector<8x64xf32>
    %819 = math.exp %818 : vector<8x64xf32>
    %820 = arith.subf %800, %813 : vector<8x64xf32>
    %821 = math.exp %820 : vector<8x64xf32>
    %822 = arith.subf %804, %813 : vector<8x64xf32>
    %823 = math.exp %822 : vector<8x64xf32>
    %824 = arith.subf %808, %813 : vector<8x64xf32>
    %825 = math.exp %824 : vector<8x64xf32>
    %826 = arith.mulf %815, %642 : vector<8x64xf32>
    %827 = arith.addf %815, %817 : vector<8x64xf32>
    %828 = arith.mulf %817, %645 : vector<8x64xf32>
    %829 = arith.addf %826, %828 : vector<8x64xf32>
    %830 = arith.addf %827, %819 : vector<8x64xf32>
    %831 = arith.mulf %819, %648 : vector<8x64xf32>
    %832 = arith.addf %829, %831 : vector<8x64xf32>
    %833 = arith.addf %830, %821 : vector<8x64xf32>
    %834 = arith.mulf %821, %651 : vector<8x64xf32>
    %835 = arith.addf %832, %834 : vector<8x64xf32>
    %836 = arith.addf %833, %823 : vector<8x64xf32>
    %837 = arith.mulf %823, %654 : vector<8x64xf32>
    %838 = arith.addf %835, %837 : vector<8x64xf32>
    %839 = arith.addf %836, %825 : vector<8x64xf32>
    %840 = arith.mulf %825, %657 : vector<8x64xf32>
    %841 = arith.addf %838, %840 : vector<8x64xf32>
    %842 = tpu.reciprocal %839 {approx = true} : vector<8x64xf32> -> vector<8x64xf32>
    %843 = arith.mulf %841, %842 : vector<8x64xf32>
    %844 = arith.addf %784, %843 : vector<8x64xf32>
    %845 = arith.mulf %615, %624 : vector<8x64xf32>
    %cst_170 = arith.constant dense<0.000000e+00> : vector<8x64xf32>
    %846 = tpu.matmul %845, %0, %cst_170 {dimension_numbers = #tpu.dot_dimension_numbers<[1], [0], [0], [1], [0, 0, 1, 1], [], []>} : vector<8x64xf32>, vector<64x64xf32>, vector<8x64xf32> -> vector<8x64xf32>
    %847 = vector.broadcast %658 : vector<8x1xf32> to vector<8x64xf32>
    %848 = arith.addf %846, %847 : vector<8x64xf32>
    %849 = arith.mulf %615, %627 : vector<8x64xf32>
    %cst_171 = arith.constant dense<0.000000e+00> : vector<8x64xf32>
    %850 = tpu.matmul %849, %0, %cst_171 {dimension_numbers = #tpu.dot_dimension_numbers<[1], [0], [0], [1], [0, 0, 1, 1], [], []>} : vector<8x64xf32>, vector<64x64xf32>, vector<8x64xf32> -> vector<8x64xf32>
    %851 = vector.broadcast %659 : vector<8x1xf32> to vector<8x64xf32>
    %852 = arith.addf %850, %851 : vector<8x64xf32>
    %853 = arith.mulf %615, %630 : vector<8x64xf32>
    %cst_172 = arith.constant dense<0.000000e+00> : vector<8x64xf32>
    %854 = tpu.matmul %853, %0, %cst_172 {dimension_numbers = #tpu.dot_dimension_numbers<[1], [0], [0], [1], [0, 0, 1, 1], [], []>} : vector<8x64xf32>, vector<64x64xf32>, vector<8x64xf32> -> vector<8x64xf32>
    %855 = vector.broadcast %660 : vector<8x1xf32> to vector<8x64xf32>
    %856 = arith.addf %854, %855 : vector<8x64xf32>
    %857 = arith.mulf %615, %633 : vector<8x64xf32>
    %cst_173 = arith.constant dense<0.000000e+00> : vector<8x64xf32>
    %858 = tpu.matmul %857, %0, %cst_173 {dimension_numbers = #tpu.dot_dimension_numbers<[1], [0], [0], [1], [0, 0, 1, 1], [], []>} : vector<8x64xf32>, vector<64x64xf32>, vector<8x64xf32> -> vector<8x64xf32>
    %859 = vector.broadcast %661 : vector<8x1xf32> to vector<8x64xf32>
    %860 = arith.addf %858, %859 : vector<8x64xf32>
    %861 = arith.mulf %615, %636 : vector<8x64xf32>
    %cst_174 = arith.constant dense<0.000000e+00> : vector<8x64xf32>
    %862 = tpu.matmul %861, %0, %cst_174 {dimension_numbers = #tpu.dot_dimension_numbers<[1], [0], [0], [1], [0, 0, 1, 1], [], []>} : vector<8x64xf32>, vector<64x64xf32>, vector<8x64xf32> -> vector<8x64xf32>
    %863 = vector.broadcast %662 : vector<8x1xf32> to vector<8x64xf32>
    %864 = arith.addf %862, %863 : vector<8x64xf32>
    %865 = arith.mulf %615, %639 : vector<8x64xf32>
    %cst_175 = arith.constant dense<0.000000e+00> : vector<8x64xf32>
    %866 = tpu.matmul %865, %0, %cst_175 {dimension_numbers = #tpu.dot_dimension_numbers<[1], [0], [0], [1], [0, 0, 1, 1], [], []>} : vector<8x64xf32>, vector<64x64xf32>, vector<8x64xf32> -> vector<8x64xf32>
    %867 = vector.broadcast %663 : vector<8x1xf32> to vector<8x64xf32>
    %868 = arith.addf %866, %867 : vector<8x64xf32>
    %869 = arith.maximumf %848, %852 : vector<8x64xf32>
    %870 = arith.maximumf %869, %856 : vector<8x64xf32>
    %871 = arith.maximumf %870, %860 : vector<8x64xf32>
    %872 = arith.maximumf %871, %864 : vector<8x64xf32>
    %873 = arith.maximumf %872, %868 : vector<8x64xf32>
    %874 = arith.subf %848, %873 : vector<8x64xf32>
    %875 = math.exp %874 : vector<8x64xf32>
    %876 = arith.subf %852, %873 : vector<8x64xf32>
    %877 = math.exp %876 : vector<8x64xf32>
    %878 = arith.subf %856, %873 : vector<8x64xf32>
    %879 = math.exp %878 : vector<8x64xf32>
    %880 = arith.subf %860, %873 : vector<8x64xf32>
    %881 = math.exp %880 : vector<8x64xf32>
    %882 = arith.subf %864, %873 : vector<8x64xf32>
    %883 = math.exp %882 : vector<8x64xf32>
    %884 = arith.subf %868, %873 : vector<8x64xf32>
    %885 = math.exp %884 : vector<8x64xf32>
    %886 = arith.mulf %875, %642 : vector<8x64xf32>
    %887 = arith.addf %875, %877 : vector<8x64xf32>
    %888 = arith.mulf %877, %645 : vector<8x64xf32>
    %889 = arith.addf %886, %888 : vector<8x64xf32>
    %890 = arith.addf %887, %879 : vector<8x64xf32>
    %891 = arith.mulf %879, %648 : vector<8x64xf32>
    %892 = arith.addf %889, %891 : vector<8x64xf32>
    %893 = arith.addf %890, %881 : vector<8x64xf32>
    %894 = arith.mulf %881, %651 : vector<8x64xf32>
    %895 = arith.addf %892, %894 : vector<8x64xf32>
    %896 = arith.addf %893, %883 : vector<8x64xf32>
    %897 = arith.mulf %883, %654 : vector<8x64xf32>
    %898 = arith.addf %895, %897 : vector<8x64xf32>
    %899 = arith.addf %896, %885 : vector<8x64xf32>
    %900 = arith.mulf %885, %657 : vector<8x64xf32>
    %901 = arith.addf %898, %900 : vector<8x64xf32>
    %902 = tpu.reciprocal %899 {approx = true} : vector<8x64xf32> -> vector<8x64xf32>
    %903 = arith.mulf %901, %902 : vector<8x64xf32>
    %904 = arith.addf %844, %903 : vector<8x64xf32>
    %905 = arith.mulf %618, %624 : vector<8x64xf32>
    %cst_176 = arith.constant dense<0.000000e+00> : vector<8x64xf32>
    %906 = tpu.matmul %905, %0, %cst_176 {dimension_numbers = #tpu.dot_dimension_numbers<[1], [0], [0], [1], [0, 0, 1, 1], [], []>} : vector<8x64xf32>, vector<64x64xf32>, vector<8x64xf32> -> vector<8x64xf32>
    %907 = vector.broadcast %658 : vector<8x1xf32> to vector<8x64xf32>
    %908 = arith.addf %906, %907 : vector<8x64xf32>
    %909 = arith.mulf %618, %627 : vector<8x64xf32>
    %cst_177 = arith.constant dense<0.000000e+00> : vector<8x64xf32>
    %910 = tpu.matmul %909, %0, %cst_177 {dimension_numbers = #tpu.dot_dimension_numbers<[1], [0], [0], [1], [0, 0, 1, 1], [], []>} : vector<8x64xf32>, vector<64x64xf32>, vector<8x64xf32> -> vector<8x64xf32>
    %911 = vector.broadcast %659 : vector<8x1xf32> to vector<8x64xf32>
    %912 = arith.addf %910, %911 : vector<8x64xf32>
    %913 = arith.mulf %618, %630 : vector<8x64xf32>
    %cst_178 = arith.constant dense<0.000000e+00> : vector<8x64xf32>
    %914 = tpu.matmul %913, %0, %cst_178 {dimension_numbers = #tpu.dot_dimension_numbers<[1], [0], [0], [1], [0, 0, 1, 1], [], []>} : vector<8x64xf32>, vector<64x64xf32>, vector<8x64xf32> -> vector<8x64xf32>
    %915 = vector.broadcast %660 : vector<8x1xf32> to vector<8x64xf32>
    %916 = arith.addf %914, %915 : vector<8x64xf32>
    %917 = arith.mulf %618, %633 : vector<8x64xf32>
    %cst_179 = arith.constant dense<0.000000e+00> : vector<8x64xf32>
    %918 = tpu.matmul %917, %0, %cst_179 {dimension_numbers = #tpu.dot_dimension_numbers<[1], [0], [0], [1], [0, 0, 1, 1], [], []>} : vector<8x64xf32>, vector<64x64xf32>, vector<8x64xf32> -> vector<8x64xf32>
    %919 = vector.broadcast %661 : vector<8x1xf32> to vector<8x64xf32>
    %920 = arith.addf %918, %919 : vector<8x64xf32>
    %921 = arith.mulf %618, %636 : vector<8x64xf32>
    %cst_180 = arith.constant dense<0.000000e+00> : vector<8x64xf32>
    %922 = tpu.matmul %921, %0, %cst_180 {dimension_numbers = #tpu.dot_dimension_numbers<[1], [0], [0], [1], [0, 0, 1, 1], [], []>} : vector<8x64xf32>, vector<64x64xf32>, vector<8x64xf32> -> vector<8x64xf32>
    %923 = vector.broadcast %662 : vector<8x1xf32> to vector<8x64xf32>
    %924 = arith.addf %922, %923 : vector<8x64xf32>
    %925 = arith.mulf %618, %639 : vector<8x64xf32>
    %cst_181 = arith.constant dense<0.000000e+00> : vector<8x64xf32>
    %926 = tpu.matmul %925, %0, %cst_181 {dimension_numbers = #tpu.dot_dimension_numbers<[1], [0], [0], [1], [0, 0, 1, 1], [], []>} : vector<8x64xf32>, vector<64x64xf32>, vector<8x64xf32> -> vector<8x64xf32>
    %927 = vector.broadcast %663 : vector<8x1xf32> to vector<8x64xf32>
    %928 = arith.addf %926, %927 : vector<8x64xf32>
    %929 = arith.maximumf %908, %912 : vector<8x64xf32>
    %930 = arith.maximumf %929, %916 : vector<8x64xf32>
    %931 = arith.maximumf %930, %920 : vector<8x64xf32>
    %932 = arith.maximumf %931, %924 : vector<8x64xf32>
    %933 = arith.maximumf %932, %928 : vector<8x64xf32>
    %934 = arith.subf %908, %933 : vector<8x64xf32>
    %935 = math.exp %934 : vector<8x64xf32>
    %936 = arith.subf %912, %933 : vector<8x64xf32>
    %937 = math.exp %936 : vector<8x64xf32>
    %938 = arith.subf %916, %933 : vector<8x64xf32>
    %939 = math.exp %938 : vector<8x64xf32>
    %940 = arith.subf %920, %933 : vector<8x64xf32>
    %941 = math.exp %940 : vector<8x64xf32>
    %942 = arith.subf %924, %933 : vector<8x64xf32>
    %943 = math.exp %942 : vector<8x64xf32>
    %944 = arith.subf %928, %933 : vector<8x64xf32>
    %945 = math.exp %944 : vector<8x64xf32>
    %946 = arith.mulf %935, %642 : vector<8x64xf32>
    %947 = arith.addf %935, %937 : vector<8x64xf32>
    %948 = arith.mulf %937, %645 : vector<8x64xf32>
    %949 = arith.addf %946, %948 : vector<8x64xf32>
    %950 = arith.addf %947, %939 : vector<8x64xf32>
    %951 = arith.mulf %939, %648 : vector<8x64xf32>
    %952 = arith.addf %949, %951 : vector<8x64xf32>
    %953 = arith.addf %950, %941 : vector<8x64xf32>
    %954 = arith.mulf %941, %651 : vector<8x64xf32>
    %955 = arith.addf %952, %954 : vector<8x64xf32>
    %956 = arith.addf %953, %943 : vector<8x64xf32>
    %957 = arith.mulf %943, %654 : vector<8x64xf32>
    %958 = arith.addf %955, %957 : vector<8x64xf32>
    %959 = arith.addf %956, %945 : vector<8x64xf32>
    %960 = arith.mulf %945, %657 : vector<8x64xf32>
    %961 = arith.addf %958, %960 : vector<8x64xf32>
    %962 = tpu.reciprocal %959 {approx = true} : vector<8x64xf32> -> vector<8x64xf32>
    %963 = arith.mulf %961, %962 : vector<8x64xf32>
    %964 = arith.addf %904, %963 : vector<8x64xf32>
    %965 = arith.mulf %621, %624 : vector<8x64xf32>
    %cst_182 = arith.constant dense<0.000000e+00> : vector<8x64xf32>
    %966 = tpu.matmul %965, %0, %cst_182 {dimension_numbers = #tpu.dot_dimension_numbers<[1], [0], [0], [1], [0, 0, 1, 1], [], []>} : vector<8x64xf32>, vector<64x64xf32>, vector<8x64xf32> -> vector<8x64xf32>
    %967 = vector.broadcast %658 : vector<8x1xf32> to vector<8x64xf32>
    %968 = arith.addf %966, %967 : vector<8x64xf32>
    %969 = arith.mulf %621, %627 : vector<8x64xf32>
    %cst_183 = arith.constant dense<0.000000e+00> : vector<8x64xf32>
    %970 = tpu.matmul %969, %0, %cst_183 {dimension_numbers = #tpu.dot_dimension_numbers<[1], [0], [0], [1], [0, 0, 1, 1], [], []>} : vector<8x64xf32>, vector<64x64xf32>, vector<8x64xf32> -> vector<8x64xf32>
    %971 = vector.broadcast %659 : vector<8x1xf32> to vector<8x64xf32>
    %972 = arith.addf %970, %971 : vector<8x64xf32>
    %973 = arith.mulf %621, %630 : vector<8x64xf32>
    %cst_184 = arith.constant dense<0.000000e+00> : vector<8x64xf32>
    %974 = tpu.matmul %973, %0, %cst_184 {dimension_numbers = #tpu.dot_dimension_numbers<[1], [0], [0], [1], [0, 0, 1, 1], [], []>} : vector<8x64xf32>, vector<64x64xf32>, vector<8x64xf32> -> vector<8x64xf32>
    %975 = vector.broadcast %660 : vector<8x1xf32> to vector<8x64xf32>
    %976 = arith.addf %974, %975 : vector<8x64xf32>
    %977 = arith.mulf %621, %633 : vector<8x64xf32>
    %cst_185 = arith.constant dense<0.000000e+00> : vector<8x64xf32>
    %978 = tpu.matmul %977, %0, %cst_185 {dimension_numbers = #tpu.dot_dimension_numbers<[1], [0], [0], [1], [0, 0, 1, 1], [], []>} : vector<8x64xf32>, vector<64x64xf32>, vector<8x64xf32> -> vector<8x64xf32>
    %979 = vector.broadcast %661 : vector<8x1xf32> to vector<8x64xf32>
    %980 = arith.addf %978, %979 : vector<8x64xf32>
    %981 = arith.mulf %621, %636 : vector<8x64xf32>
    %cst_186 = arith.constant dense<0.000000e+00> : vector<8x64xf32>
    %982 = tpu.matmul %981, %0, %cst_186 {dimension_numbers = #tpu.dot_dimension_numbers<[1], [0], [0], [1], [0, 0, 1, 1], [], []>} : vector<8x64xf32>, vector<64x64xf32>, vector<8x64xf32> -> vector<8x64xf32>
    %983 = vector.broadcast %662 : vector<8x1xf32> to vector<8x64xf32>
    %984 = arith.addf %982, %983 : vector<8x64xf32>
    %985 = arith.mulf %621, %639 : vector<8x64xf32>
    %cst_187 = arith.constant dense<0.000000e+00> : vector<8x64xf32>
    %986 = tpu.matmul %985, %0, %cst_187 {dimension_numbers = #tpu.dot_dimension_numbers<[1], [0], [0], [1], [0, 0, 1, 1], [], []>} : vector<8x64xf32>, vector<64x64xf32>, vector<8x64xf32> -> vector<8x64xf32>
    %987 = vector.broadcast %663 : vector<8x1xf32> to vector<8x64xf32>
    %988 = arith.addf %986, %987 : vector<8x64xf32>
    %989 = arith.maximumf %968, %972 : vector<8x64xf32>
    %990 = arith.maximumf %989, %976 : vector<8x64xf32>
    %991 = arith.maximumf %990, %980 : vector<8x64xf32>
    %992 = arith.maximumf %991, %984 : vector<8x64xf32>
    %993 = arith.maximumf %992, %988 : vector<8x64xf32>
    %994 = arith.subf %968, %993 : vector<8x64xf32>
    %995 = math.exp %994 : vector<8x64xf32>
    %996 = arith.subf %972, %993 : vector<8x64xf32>
    %997 = math.exp %996 : vector<8x64xf32>
    %998 = arith.subf %976, %993 : vector<8x64xf32>
    %999 = math.exp %998 : vector<8x64xf32>
    %1000 = arith.subf %980, %993 : vector<8x64xf32>
    %1001 = math.exp %1000 : vector<8x64xf32>
    %1002 = arith.subf %984, %993 : vector<8x64xf32>
    %1003 = math.exp %1002 : vector<8x64xf32>
    %1004 = arith.subf %988, %993 : vector<8x64xf32>
    %1005 = math.exp %1004 : vector<8x64xf32>
    %1006 = arith.mulf %995, %642 : vector<8x64xf32>
    %1007 = arith.addf %995, %997 : vector<8x64xf32>
    %1008 = arith.mulf %997, %645 : vector<8x64xf32>
    %1009 = arith.addf %1006, %1008 : vector<8x64xf32>
    %1010 = arith.addf %1007, %999 : vector<8x64xf32>
    %1011 = arith.mulf %999, %648 : vector<8x64xf32>
    %1012 = arith.addf %1009, %1011 : vector<8x64xf32>
    %1013 = arith.addf %1010, %1001 : vector<8x64xf32>
    %1014 = arith.mulf %1001, %651 : vector<8x64xf32>
    %1015 = arith.addf %1012, %1014 : vector<8x64xf32>
    %1016 = arith.addf %1013, %1003 : vector<8x64xf32>
    %1017 = arith.mulf %1003, %654 : vector<8x64xf32>
    %1018 = arith.addf %1015, %1017 : vector<8x64xf32>
    %1019 = arith.addf %1016, %1005 : vector<8x64xf32>
    %1020 = arith.mulf %1005, %657 : vector<8x64xf32>
    %1021 = arith.addf %1018, %1020 : vector<8x64xf32>
    %1022 = tpu.reciprocal %1019 {approx = true} : vector<8x64xf32> -> vector<8x64xf32>
    %1023 = arith.mulf %1021, %1022 : vector<8x64xf32>
    %1024 = arith.addf %964, %1023 : vector<8x64xf32>
    %cst_188 = arith.constant 0.166666672 : f32
    %1025 = vector.broadcast %cst_188 : f32 to vector<8x64xf32>
    %1026 = arith.mulf %1024, %1025 : vector<8x64xf32>
    %c0_189 = arith.constant 0 : index
    %c0_190 = arith.constant 0 : index
    %1027 = vector.load %arg1[%c0_189, %c0_190] : memref<8x7xf32, #tpu.memory_space<vmem>>, vector<8x7xf32>
    %c0_191 = arith.constant 0 : index
    %c0_192 = arith.constant 0 : index
    %1028 = vector.load %arg19[%c0_191, %c0_192] : memref<7x128xf32, #tpu.memory_space<vmem>>, vector<7x128xf32>
    %cst_193 = arith.constant dense<0.000000e+00> : vector<8x128xf32>
    %1029 = tpu.matmul %1027, %1028, %cst_193 {dimension_numbers = #tpu.dot_dimension_numbers<[1], [0], [0], [1], [0, 0, 1, 1], [], []>} : vector<8x7xf32>, vector<7x128xf32>, vector<8x128xf32> -> vector<8x128xf32>
    %c0_194 = arith.constant 0 : index
    %c0_195 = arith.constant 0 : index
    %1030 = vector.load %arg20[%c0_194, %c0_195] : memref<64x128xf32, #tpu.memory_space<vmem>>, vector<64x128xf32>
    %cst_196 = arith.constant dense<0.000000e+00> : vector<8x128xf32>
    %1031 = tpu.matmul %584, %1030, %cst_196 {dimension_numbers = #tpu.dot_dimension_numbers<[1], [0], [0], [1], [0, 0, 1, 1], [], []>} : vector<8x64xf32>, vector<64x128xf32>, vector<8x128xf32> -> vector<8x128xf32>
    %1032 = arith.addf %1029, %1031 : vector<8x128xf32>
    %c0_197 = arith.constant 0 : index
    %c0_198 = arith.constant 0 : index
    %1033 = vector.load %arg21[%c0_197, %c0_198] : memref<64x128xf32, #tpu.memory_space<vmem>>, vector<64x128xf32>
    %cst_199 = arith.constant dense<0.000000e+00> : vector<8x128xf32>
    %1034 = tpu.matmul %1026, %1033, %cst_199 {dimension_numbers = #tpu.dot_dimension_numbers<[1], [0], [0], [1], [0, 0, 1, 1], [], []>} : vector<8x64xf32>, vector<64x128xf32>, vector<8x128xf32> -> vector<8x128xf32>
    %1035 = arith.addf %1032, %1034 : vector<8x128xf32>
    %c0_200 = arith.constant 0 : index
    %c0_201 = arith.constant 0 : index
    %1036 = vector.load %arg22[%c0_200, %c0_201] : memref<1x128xf32, #tpu.memory_space<vmem>>, vector<1x128xf32>
    %1037 = vector.broadcast %1036 : vector<1x128xf32> to vector<8x128xf32>
    %1038 = arith.addf %1035, %1037 : vector<8x128xf32>
    %cst_202 = arith.constant 0.000000e+00 : f32
    %1039 = vector.broadcast %cst_202 : f32 to vector<8x128xf32>
    %1040 = arith.maximumf %1038, %1039 : vector<8x128xf32>
    %c0_203 = arith.constant 0 : index
    %c0_204 = arith.constant 0 : index
    %1041 = vector.load %arg23[%c0_203, %c0_204] : memref<128x128xf32, #tpu.memory_space<vmem>>, vector<128x128xf32>
    %cst_205 = arith.constant dense<0.000000e+00> : vector<8x128xf32>
    %1042 = tpu.matmul %1040, %1041, %cst_205 {dimension_numbers = #tpu.dot_dimension_numbers<[1], [0], [0], [1], [0, 0, 1, 1], [], []>} : vector<8x128xf32>, vector<128x128xf32>, vector<8x128xf32> -> vector<8x128xf32>
    %c0_206 = arith.constant 0 : index
    %c0_207 = arith.constant 0 : index
    %1043 = vector.load %arg24[%c0_206, %c0_207] : memref<1x128xf32, #tpu.memory_space<vmem>>, vector<1x128xf32>
    %1044 = vector.broadcast %1043 : vector<1x128xf32> to vector<8x128xf32>
    %1045 = arith.addf %1042, %1044 : vector<8x128xf32>
    %cst_208 = arith.constant 0.000000e+00 : f32
    %1046 = vector.broadcast %cst_208 : f32 to vector<8x128xf32>
    %1047 = arith.maximumf %1045, %1046 : vector<8x128xf32>
    %c0_209 = arith.constant 0 : index
    %c0_210 = arith.constant 0 : index
    %1048 = vector.load %arg25[%c0_209, %c0_210] : memref<128x4xf32, #tpu.memory_space<vmem>>, vector<128x4xf32>
    %cst_211 = arith.constant dense<0.000000e+00> : vector<8x4xf32>
    %1049 = tpu.matmul %1047, %1048, %cst_211 {dimension_numbers = #tpu.dot_dimension_numbers<[1], [0], [0], [1], [0, 0, 1, 1], [], []>} : vector<8x128xf32>, vector<128x4xf32>, vector<8x4xf32> -> vector<8x4xf32>
    %c0_212 = arith.constant 0 : index
    %c0_213 = arith.constant 0 : index
    %1050 = vector.load %arg26[%c0_212, %c0_213] : memref<1x4xf32, #tpu.memory_space<vmem>>, vector<1x4xf32>
    %1051 = vector.broadcast %1050 : vector<1x4xf32> to vector<8x4xf32>
    %1052 = arith.addf %1049, %1051 : vector<8x4xf32>
    %c0_214 = arith.constant 0 : index
    %c0_215 = arith.constant 0 : index
    %1053 = vector.load %arg27[%c0_214, %c0_215] : memref<128x4xf32, #tpu.memory_space<vmem>>, vector<128x4xf32>
    %cst_216 = arith.constant dense<0.000000e+00> : vector<8x4xf32>
    %1054 = tpu.matmul %1047, %1053, %cst_216 {dimension_numbers = #tpu.dot_dimension_numbers<[1], [0], [0], [1], [0, 0, 1, 1], [], []>} : vector<8x128xf32>, vector<128x4xf32>, vector<8x4xf32> -> vector<8x4xf32>
    %c0_217 = arith.constant 0 : index
    %c0_218 = arith.constant 0 : index
    %1055 = vector.load %arg28[%c0_217, %c0_218] : memref<1x4xf32, #tpu.memory_space<vmem>>, vector<1x4xf32>
    %1056 = vector.broadcast %1055 : vector<1x4xf32> to vector<8x4xf32>
    %1057 = arith.addf %1054, %1056 : vector<8x4xf32>
    %cst_219 = arith.constant dense<0xFF800000> : vector<8xf32>
    %1058 = vector.multi_reduction <maximumf>, %1052, %cst_219 [1] : vector<8x4xf32> to vector<8xf32>
    %1059 = vector.shape_cast %1058 : vector<8xf32> to vector<8x1xf32>
    %1060 = vector.broadcast %1059 : vector<8x1xf32> to vector<8x4xf32>
    %1061 = arith.subf %1052, %1060 : vector<8x4xf32>
    %1062 = math.exp %1061 : vector<8x4xf32>
    %cst_220 = arith.constant dense<0.000000e+00> : vector<8xf32>
    %1063 = vector.multi_reduction <add>, %1062, %cst_220 [1] : vector<8x4xf32> to vector<8xf32>
    %1064 = vector.shape_cast %1063 : vector<8xf32> to vector<8x1xf32>
    %1065 = vector.broadcast %1064 : vector<8x1xf32> to vector<8x4xf32>
    %1066 = arith.divf %1062, %1065 : vector<8x4xf32>
    %c0_221 = arith.constant 0 : index
    %c0_222 = arith.constant 0 : index
    %1067 = vector.load %arg29[%c0_221, %c0_222] : memref<8x8xf32, #tpu.memory_space<vmem>>, vector<8x4xf32>
    tpu.vector_store %arg29[%c0_221, %c0_222], %1066 {strides = array<i32>} : memref<8x8xf32, #tpu.memory_space<vmem>>, vector<8x4xf32>,
    %c0_223 = arith.constant 0 : index
    %c4_224 = arith.constant 4 : index
    %1068 = vector.load %arg29[%c0_223, %c4_224] : memref<8x8xf32, #tpu.memory_space<vmem>>, vector<8x4xf32>
    tpu.vector_store %arg29[%c0_223, %c4_224], %1057 {strides = array<i32>} : memref<8x8xf32, #tpu.memory_space<vmem>>, vector<8x4xf32>,
    return
  }
  func.func @transform_0(%arg0: i32) -> (i32, i32) {
    %c0_i32 = arith.constant 0 : i32
    %c0_i32_0 = arith.constant 0 : i32
    return %arg0, %c0_i32 : i32, i32
  }
  func.func @transform_1(%arg0: i32) -> (i32, i32, i32) {
    %c0_i32 = arith.constant 0 : i32
    %c0_i32_0 = arith.constant 0 : i32
    %c0_i32_1 = arith.constant 0 : i32
    return %c0_i32, %arg0, %c0_i32_0 : i32, i32, i32
  }
  func.func @transform_2(%arg0: i32) -> (i32, i32) {
    %c0_i32 = arith.constant 0 : i32
    %c0_i32_0 = arith.constant 0 : i32
    return %arg0, %c0_i32 : i32, i32
  }
  func.func @transform_3(%arg0: i32) -> (i32, i32, i32) {
    %c0_i32 = arith.constant 0 : i32
    %c0_i32_0 = arith.constant 0 : i32
    %c0_i32_1 = arith.constant 0 : i32
    return %c0_i32, %arg0, %c0_i32_0 : i32, i32, i32
  }
  func.func @transform_4(%arg0: i32) -> (i32, i32) {
    %c0_i32 = arith.constant 0 : i32
    %c0_i32_0 = arith.constant 0 : i32
    return %arg0, %c0_i32 : i32, i32
  }
  func.func @transform_5(%arg0: i32) -> (i32, i32) {
    %c0_i32 = arith.constant 0 : i32
    %c0_i32_0 = arith.constant 0 : i32
    %c0_i32_1 = arith.constant 0 : i32
    return %c0_i32, %c0_i32_0 : i32, i32
  }
  func.func @transform_6(%arg0: i32) -> (i32, i32) {
    %c0_i32 = arith.constant 0 : i32
    %c0_i32_0 = arith.constant 0 : i32
    %c0_i32_1 = arith.constant 0 : i32
    return %c0_i32, %c0_i32_0 : i32, i32
  }
  func.func @transform_7(%arg0: i32) -> (i32, i32) {
    %c0_i32 = arith.constant 0 : i32
    %c0_i32_0 = arith.constant 0 : i32
    %c0_i32_1 = arith.constant 0 : i32
    return %c0_i32, %c0_i32_0 : i32, i32
  }
  func.func @transform_8(%arg0: i32) -> (i32, i32) {
    %c0_i32 = arith.constant 0 : i32
    %c0_i32_0 = arith.constant 0 : i32
    %c0_i32_1 = arith.constant 0 : i32
    return %c0_i32, %c0_i32_0 : i32, i32
  }
  func.func @transform_9(%arg0: i32) -> (i32, i32) {
    %c0_i32 = arith.constant 0 : i32
    %c0_i32_0 = arith.constant 0 : i32
    %c0_i32_1 = arith.constant 0 : i32
    return %c0_i32, %c0_i32_0 : i32, i32
  }
  func.func @transform_10(%arg0: i32) -> (i32, i32) {
    %c0_i32 = arith.constant 0 : i32
    %c0_i32_0 = arith.constant 0 : i32
    %c0_i32_1 = arith.constant 0 : i32
    return %c0_i32, %c0_i32_0 : i32, i32
  }
  func.func @transform_11(%arg0: i32) -> (i32, i32) {
    %c0_i32 = arith.constant 0 : i32
    %c0_i32_0 = arith.constant 0 : i32
    %c0_i32_1 = arith.constant 0 : i32
    return %c0_i32, %c0_i32_0 : i32, i32
  }
  func.func @transform_12(%arg0: i32) -> (i32, i32) {
    %c0_i32 = arith.constant 0 : i32
    %c0_i32_0 = arith.constant 0 : i32
    %c0_i32_1 = arith.constant 0 : i32
    return %c0_i32, %c0_i32_0 : i32, i32
  }
  func.func @transform_13(%arg0: i32) -> (i32, i32) {
    %c0_i32 = arith.constant 0 : i32
    %c0_i32_0 = arith.constant 0 : i32
    %c0_i32_1 = arith.constant 0 : i32
    return %c0_i32, %c0_i32_0 : i32, i32
  }
  func.func @transform_14(%arg0: i32) -> (i32, i32) {
    %c0_i32 = arith.constant 0 : i32
    %c0_i32_0 = arith.constant 0 : i32
    %c0_i32_1 = arith.constant 0 : i32
    return %c0_i32, %c0_i32_0 : i32, i32
  }
  func.func @transform_15(%arg0: i32) -> (i32, i32) {
    %c0_i32 = arith.constant 0 : i32
    %c0_i32_0 = arith.constant 0 : i32
    %c0_i32_1 = arith.constant 0 : i32
    return %c0_i32, %c0_i32_0 : i32, i32
  }
  func.func @transform_16(%arg0: i32) -> (i32, i32) {
    %c0_i32 = arith.constant 0 : i32
    %c0_i32_0 = arith.constant 0 : i32
    %c0_i32_1 = arith.constant 0 : i32
    return %c0_i32, %c0_i32_0 : i32, i32
  }
  func.func @transform_17(%arg0: i32) -> (i32, i32) {
    %c0_i32 = arith.constant 0 : i32
    %c0_i32_0 = arith.constant 0 : i32
    %c0_i32_1 = arith.constant 0 : i32
    return %c0_i32, %c0_i32_0 : i32, i32
  }
  func.func @transform_18(%arg0: i32) -> (i32, i32) {
    %c0_i32 = arith.constant 0 : i32
    %c0_i32_0 = arith.constant 0 : i32
    %c0_i32_1 = arith.constant 0 : i32
    return %c0_i32, %c0_i32_0 : i32, i32
  }
  func.func @transform_19(%arg0: i32) -> (i32, i32) {
    %c0_i32 = arith.constant 0 : i32
    %c0_i32_0 = arith.constant 0 : i32
    %c0_i32_1 = arith.constant 0 : i32
    return %c0_i32, %c0_i32_0 : i32, i32
  }
  func.func @transform_20(%arg0: i32) -> (i32, i32) {
    %c0_i32 = arith.constant 0 : i32
    %c0_i32_0 = arith.constant 0 : i32
    %c0_i32_1 = arith.constant 0 : i32
    return %c0_i32, %c0_i32_0 : i32, i32
  }
  func.func @transform_21(%arg0: i32) -> (i32, i32) {
    %c0_i32 = arith.constant 0 : i32
    %c0_i32_0 = arith.constant 0 : i32
    %c0_i32_1 = arith.constant 0 : i32
    return %c0_i32, %c0_i32_0 : i32, i32
  }
  func.func @transform_22(%arg0: i32) -> (i32, i32) {
    %c0_i32 = arith.constant 0 : i32
    %c0_i32_0 = arith.constant 0 : i32
    %c0_i32_1 = arith.constant 0 : i32
    return %c0_i32, %c0_i32_0 : i32, i32
  }
  func.func @transform_23(%arg0: i32) -> (i32, i32) {
    %c0_i32 = arith.constant 0 : i32
    %c0_i32_0 = arith.constant 0 : i32
    %c0_i32_1 = arith.constant 0 : i32
    return %c0_i32, %c0_i32_0 : i32, i32
  }
  func.func @transform_24(%arg0: i32) -> (i32, i32) {
    %c0_i32 = arith.constant 0 : i32
    %c0_i32_0 = arith.constant 0 : i32
    %c0_i32_1 = arith.constant 0 : i32
    return %c0_i32, %c0_i32_0 : i32, i32
  }
  func.func @transform_25(%arg0: i32) -> (i32, i32) {
    %c0_i32 = arith.constant 0 : i32
    %c0_i32_0 = arith.constant 0 : i32
    %c0_i32_1 = arith.constant 0 : i32
    return %c0_i32, %c0_i32_0 : i32, i32
  }
  func.func @transform_26(%arg0: i32) -> (i32, i32) {
    %c0_i32 = arith.constant 0 : i32
    %c0_i32_0 = arith.constant 0 : i32
    %c0_i32_1 = arith.constant 0 : i32
    return %c0_i32, %c0_i32_0 : i32, i32
  }
  func.func @transform_27(%arg0: i32) -> (i32, i32) {
    %c0_i32 = arith.constant 0 : i32
    %c0_i32_0 = arith.constant 0 : i32
    %c0_i32_1 = arith.constant 0 : i32
    return %c0_i32, %c0_i32_0 : i32, i32
  }
  func.func @transform_28(%arg0: i32) -> (i32, i32) {
    %c0_i32 = arith.constant 0 : i32
    %c0_i32_0 = arith.constant 0 : i32
    return %arg0, %c0_i32 : i32, i32
  }
}

</mosaic_0001>

<bundles_post_ra>
// kernel: squeeze.3
= control target key start
LH: loop header
LB: loop body
LE: loop exit
PB: predicated region body
PF: predicated region fallthrough
CT: control target
= control target key end

     0   :  { %s80_s0 = inlined_call_operand.vmem [shape: f32[6], index: 0, kind: input, shape index: {}]   ;;  %s81_s1 = inlined_call_operand.hbm [shape: f32[2,3], index: 1, kind: output, shape index: {}]  }
   0x1   :  { %v5_v0 = vld [vmem:[%s80_s0] sm:$0x1] }
   0x2   :  { %2 = vsyncpa [#allocation1], 0  ;;  %6 = vst [vmem:[#allocation3] sm:$0x1] %v5_v0  ;;  %vm8_vm0 = vcmask 23552   ;;  %s62_s0 = smov 125  }
   0x3   :  { %s63_s8 = smov [#allocation0]   ;;  %s27_s1 = sshll.u32 %s81_s1, 4  ;;  %s28_s1 = int_to_ptr.hbm [resolvable:$true] %s27_s1 }
   0x4   :  { %s25_s9 = sshll.u32 %s63_s8, 4  ;;  %s26_s9 = int_to_ptr.vmem [resolvable:$true] %s25_s9 }
   0x9   :  { %v10_v1 = vld [vmem:[#allocation3] sm:$0x1]  }
   0xa   :  { %v7_v2 = vld [vmem:[#allocation3] sm:$0x1]   ;;  %11 = vrot.lane.b32.xlu0 %v10_v1, %s62_s0 }
   0xb   :  { %9 = vst.msk [vmem:[#allocation2] sm:$0x1] %vm8_vm0, %v7_v2  }
  0x7c   :  { %v12_v3 = vpop.permute.xlu0 %11  }
  0x7d   :  { %15 = vst.msk [vmem:[#allocation2 + $0x1] sm:$0x1] %vm8_vm0, %v12_v3  }
  0x84   :  { %v18_v4 = vld [vmem:[#allocation2] sm:$0x3] }
  0x85   :  { %21 = vst [vmem:[#allocation0] sm:$0x3] %v18_v4 }
  0x86   :  { %30 = dma.vmem_to_hbm [thread:$0]  %s26_s9, 32, %s28_s1, [#allocation1]  }
  0x87   :  { %60 = dma.done.wait [#allocation1], 32  }
  0x88   :  { %61 = vsyncadd [#allocation1], 4294967264 }
  0x89   :  { %33 = vsyncpa [#allocation1], 1 }

// kernel: agent_network_forward.1
= control target key start
LH: loop header
LB: loop body
LE: loop exit
PB: predicated region body
PF: predicated region fallthrough
CT: control target
= control target key end

     0   :  { %vm124_vm0 = vcmask 1046528   ;;  %vm120_vm1 = vcmask 56320   ;;  %v4366_v18 = vmov 2   ;;  %v4367_v21 = vmov 0   ;;  %s6702_s5 = inlined_call_operand.vmem [shape: f32[7,64], index: 5, kind: input, shape index: {}]   ;;  %s6703_s1 = inlined_call_operand.vmem [shape: f32[7,8,7], index: 1, kind: input, shape index: {}]   ;;  %s6704_s7 = inlined_call_operand.vmem [shape: f32[7,64], index: 7, kind: input, shape index: {}]   ;;  %s6705_s6 = inlined_call_operand.vmem [shape: f32[1,64], index: 6, kind: input, shape index: {}]   ;;  %s6706_s9 = inlined_call_operand.vmem [shape: f32[7,64], index: 9, kind: input, shape index: {}]   ;;  %s6707_s8 = inlined_call_operand.vmem [shape: f32[1,64], index: 8, kind: input, shape index: {}]   ;;  %s6708_s17 = inlined_call_operand.vmem [shape: f32[64,64], index: 17, kind: input, shape index: {}]   ;;  %s6709_s2 = inlined_call_operand.vmem [shape: f32[8,7], index: 2, kind: input, shape index: {}]   ;;  %s6710_s4 = inlined_call_operand.vmem [shape: f32[8,6], index: 4, kind: input, shape index: {}]   ;;  %s6711_s10 = inlined_call_operand.vmem [shape: f32[1,64], index: 10, kind: input, shape index: {}]   ;;  %s6712_s11 = inlined_call_operand.vmem [shape: f32[5,64], index: 11, kind: input, shape index: {}]   ;;  %s6713_s3 = inlined_call_operand.vmem [shape: f32[6,8,5], index: 3, kind: input, shape index: {}]   ;;  %s6714_s13 = inlined_call_operand.vmem [shape: f32[5,64], index: 13, kind: input, shape index: {}]   ;;  %s6715_s12 = inlined_call_operand.vmem [shape: f32[1,64], index: 12, kind: input, shape index: {}]   ;;  %s6716_s14 = inlined_call_operand.vmem [shape: f32[1,64], index: 14, kind: input, shape index: {}]   ;;  %s6717_s15 = inlined_call_operand.vmem [shape: f32[5,64], index: 15, kind: input, shape index: {}]   ;;  %s6718_s16 = inlined_call_operand.vmem [shape: f32[1,64], index: 16, kind: input, shape index: {}]   ;;  %s6719_s19 = inlined_call_operand.vmem [shape: f32[64,128], index: 19, kind: input, shape index: {}]   ;;  %s6720_s18 = inlined_call_operand.vmem [shape: f32[7,128], index: 18, kind: input, shape index: {}]   ;;  %s6721_s0 = inlined_call_operand.vmem [shape: f32[8,7], index: 0, kind: input, shape index: {}]   ;;  %s6722_s21 = inlined_call_operand.vmem [shape: f32[1,128], index: 21, kind: input, shape index: {}]   ;;  %s6723_s20 = inlined_call_operand.vmem [shape: f32[64,128], index: 20, kind: input, shape index: {}]   ;;  %s6724_s22 = inlined_call_operand.vmem [shape: f32[128,128], index: 22, kind: input, shape index: {}]   ;;  %s6725_s23 = inlined_call_operand.vmem [shape: f32[1,128], index: 23, kind: input, shape index: {}]   ;;  %s6726_s24 = inlined_call_operand.vmem [shape: f32[128,4], index: 24, kind: input, shape index: {}]   ;;  %s6727_s26 = inlined_call_operand.vmem [shape: f32[128,4], index: 26, kind: input, shape index: {}]   ;;  %s6728_s27 = inlined_call_operand.vmem [shape: f32[1,4], index: 27, kind: input, shape index: {}]   ;;  %s6729_s25 = inlined_call_operand.vmem [shape: f32[1,4], index: 25, kind: input, shape index: {}]   ;;  %s6730_s28 = inlined_call_operand.vmem [shape: f32[8,8], index: 28, kind: output, shape index: {}]  }
   0x1   :  { %6738 = sst [smem:[#allocation5_spill]] %s6702_s5  ;;  %4128 = vset.pattern.permute.xlu1 %v4366_v18  ;;  %4126 = vset.pattern.permute.xlu0 %v4367_v21  ;;  %v4368_v28 = vmov 1   ;;  %v4369_v38 = vmov 5   ;;  %vm584_vm2 = vcmask 523264   ;;  %vm2153_vm3 = vcmask 1044480  }
   0x2   :  { %6739 = sst [smem:[#allocation6_spill]] %s6703_s1  ;;  %4130 = vset.pattern.permute.xlu2 %v4368_v28  ;;  %vm2149_vm4 = vcmask 39936   ;;  %vm3904_vm5 = vcmask 31744   ;;  %vm3934_vm10 = vcmask 64544  }
   0x3   :  { %6740 = sst [smem:[#allocation7_spill]] %s6704_s7 }
   0x4   :  { %6741 = sst [smem:[#allocation8_spill]] %s6705_s6 }
   0x5   :  { %6742 = sst [smem:[#allocation9_spill]] %s6706_s9 }
   0x6   :  { %6743 = sst [smem:[#allocation10_spill]] %s6707_s8 }
   0x7   :  { %6744 = sst [smem:[#allocation11_spill]] %s6708_s17 }
   0x8   :  { %6745 = sst [smem:[#allocation12_spill]] %s6709_s2 }
   0x9   :  { %6746 = sst [smem:[#allocation13_spill]] %s6710_s4 }
   0xa   :  { %6747 = sst [smem:[#allocation14_spill]] %s6711_s10 }
   0xb   :  { %6748 = sst [smem:[#allocation15_spill]] %s6712_s11 }
   0xc   :  { %6749 = sst [smem:[#allocation16_spill]] %s6713_s3 }
   0xd   :  { %6750 = sst [smem:[#allocation17_spill]] %s6714_s13 }
   0xe   :  { %s6751_s10 = sld [smem:[#allocation5_spill]] }
   0xf   :  { %s6752_s6 = sld [smem:[#allocation6_spill]] }
  0x10   :  { %s6753_s5 = sld [smem:[#allocation7_spill]] }
  0x11   :  { %s6754_s29 = sld [smem:[#allocation9_spill]] }
  0x12   :  { %s6755_s7 = sld [smem:[#allocation11_spill]] }
  0x13   :  { %s6758_s17 = sld [smem:[#allocation8_spill]] }
  0x14   :  { %v98_v0 = vld [vmem:[%s6751_s10] sm:$0x7f]  ;;  %s6757_s10 = sld [smem:[#allocation13_spill]] }
  0x15   :  { %v104_v1 = vld [vmem:[%s6752_s6] sm:$0xff]  ;;  %v3940_v2 = vld [vmem:[%s6752_s6 + $0x8] sm:$0xff]  ;;  %3946 = vmatpush.msk.msra.mxu0 %vm124_vm0, %v98_v0  ;;  %3948 = vmatpush.msk.msra.mxu1 %vm124_vm0, %v98_v0  ;;  %v3941_v3 = vld [vmem:[%s6752_s6 + $0x10] sm:$0xff]  ;;  %s6763_s9 = sld [smem:[#allocation15_spill]] }
  0x16   :  { %v4536_v4 = vld [vmem:[%s6752_s6 + $0x18] sm:$0xff]  ;;  %3950 = vmatpush.msk.msra.mxu2 %vm124_vm0, %v98_v0  ;;  %3952 = vmatpush.msk.msra.mxu3 %vm124_vm0, %v98_v0  ;;  %v100_v5 = vld [vmem:[%s6753_s5] sm:$0x7f]  ;;  %v3944_v7 = vld [vmem:[%s6752_s6 + $0x28] sm:$0xff]  ;;  %s6756_s5 = sld [smem:[#allocation12_spill]] }
  0x17   :  { %3947 = vmatmul.msk.f32.vlgmr.msra.gmra.mxu0 %vm120_vm1, %v104_v1  ;;  %3949 = vmatmul.msk.f32.vlgmr.msra.gmra.mxu1 %vm120_vm1, %v3940_v2  ;;  %v3943_v6 = vld [vmem:[%s6752_s6 + $0x20] sm:$0xff]  ;;  %v3945_v8 = vld [vmem:[%s6752_s6 + $0x30] sm:$0xff]  ;;  %s6764_s11 = sld [smem:[#allocation16_spill]] }
  0x18   :  { %3951 = vmatmul.msk.f32.vlgmr.msra.gmra.mxu2 %vm120_vm1, %v3941_v3  ;;  %3953 = vmatmul.msk.f32.vlgmr.msra.gmra.mxu3 %vm120_vm1, %v4536_v4  ;;  %v102_v9 = vld [vmem:[%s6754_s29] sm:$0x7f]  ;;  %v4588_v10 = vld [vmem:[%s6755_s7 + $0x38] sm:$0xff]  ;;  %v4597_v11 = vld [vmem:[%s6755_s7 + $0x30] sm:$0xff]  ;;  %s6759_s29 = sld [smem:[#allocation10_spill]] }
  0x19   :  { %3954 = vmatpush.msk.msrb.mxu0 %vm124_vm0, %v98_v0  ;;  %3956 = vmatpush.msk.msrb.mxu1 %vm124_vm0, %v98_v0  ;;  %v4604_v12 = vld [vmem:[%s6755_s7 + $0x28] sm:$0xff]  ;;  %v4613_v13 = vld [vmem:[%s6755_s7 + $0x20] sm:$0xff]  ;;  %v4621_v14 = vld [vmem:[%s6755_s7 + $0x18] sm:$0xff]  ;;  %s6765_s3 = sld [smem:[#allocation17_spill]] }
  0x1a   :  { %3958 = vmatpush.msk.msrb.mxu2 %vm124_vm0, %v98_v0  ;;  %3960 = vmatpush.msk.msrb.mxu3 %vm124_vm0, %v100_v5  ;;  %v4631_v15 = vld [vmem:[%s6755_s7 + $0x10] sm:$0xff]  ;;  %v4653_v16 = vld [vmem:[%s6755_s7 + $0x8] sm:$0xff]  ;;  %v4658_v17 = vld [vmem:[%s6755_s7] sm:$0xff]  ;;  %s6766_s6 = sld [smem:[#allocation14_spill]] }
  0x1b   :  { %3962 = vmatpush.msk.msra.mxu0 %vm124_vm0, %v100_v5  ;;  %3964 = vmatpush.msk.msra.mxu1 %vm124_vm0, %v100_v5  ;;  %v2128_v20 = vld [vmem:[%s6757_s10] sm:$0xff] }
  0x1c   :  { %3966 = vmatpush.msk.msra.mxu2 %vm124_vm0, %v100_v5  ;;  %3968 = vmatpush.msk.msra.mxu3 %vm124_vm0, %v100_v5  ;;  %v4691_v19 = vld [vmem:[%s6756_s5] sm:$0xff] }
  0x1d   :  { %638 = vperm.xlu1 %4128, %v4691_v19   ;;  %581 = vperm.xlu0 %4126, %v4691_v19   ;;  %v4139_v29 = vld [vmem:[%s6758_s17] ss:$0 sm:$0xff] }
  0x1e   :  { %v4140_v30 = vld [vmem:[%s6759_s29] ss:$0 sm:$0xff]  ;;  %2575 = vperm.xlu2 %4130, %v2128_v20  }
  0x1f   :  { %3955 = vmatmul.msk.f32.vlgmr.msrb.gmra.mxu0 %vm120_vm1, %v3943_v6  ;;  %3957 = vmatmul.msk.f32.vlgmr.msrb.gmra.mxu1 %vm120_vm1, %v3944_v7 }
  0x20   :  { %3959 = vmatmul.msk.f32.vlgmr.msrb.gmra.mxu2 %vm120_vm1, %v3945_v8  ;;  %3961 = vmatmul.msk.f32.vlgmr.msrb.gmra.mxu3 %vm120_vm1, %v104_v1 }
  0x21   :  { %3970 = vmatpush.msk.msrb.mxu0 %vm124_vm0, %v100_v5  ;;  %3972 = vmatpush.msk.msrb.mxu1 %vm124_vm0, %v100_v5 }
  0x22   :  { %3976 = vmatpush.msk.msrb.mxu3 %vm124_vm0, %v102_v9  ;;  %3974 = vmatpush.msk.msrb.mxu2 %vm124_vm0, %v102_v9 }
  0x25   :  { %4129 = vset.pattern.permute.xlu1 %v4367_v21  ;;  %4127 = vset.pattern.permute.xlu0 %v4368_v28 }
  0x26   :  { %2547 = vperm.xlu1 %4129, %v2128_v20   ;;  %610 = vperm.xlu0 %4127, %v4691_v19  }
  0x27   :  { %3963 = vmatmul.msk.f32.vlgmr.msra.gmra.mxu0 %vm120_vm1, %v3940_v2  ;;  %3965 = vmatmul.msk.f32.vlgmr.msra.gmra.mxu1 %vm120_vm1, %v3941_v3 }
  0x28   :  { %3967 = vmatmul.msk.f32.vlgmr.msra.gmra.mxu2 %vm120_vm1, %v4536_v4  ;;  %3969 = vmatmul.msk.f32.vlgmr.msra.gmra.mxu3 %vm120_vm1, %v3943_v6 }
  0x29   :  { %3984 = vmatpush.msk.msra.mxu3 %vm124_vm0, %v102_v9  ;;  %3982 = vmatpush.msk.msra.mxu2 %vm124_vm0, %v102_v9 }
  0x2a   :  { %3978 = vmatpush.msk.msra.mxu0 %vm124_vm0, %v102_v9  ;;  %3980 = vmatpush.msk.msra.mxu1 %vm124_vm0, %v102_v9 }
  0x2e   :  { %4132 = vset.pattern.permute.xlu1 %v4366_v18 }
  0x2f   :  { %3971 = vmatmul.msk.f32.vlgmr.msrb.gmra.mxu0 %vm120_vm1, %v3944_v7  ;;  %3973 = vmatmul.msk.f32.vlgmr.msrb.gmra.mxu1 %vm120_vm1, %v3945_v8 }
  0x30   :  { %3977 = vmatmul.msk.f32.vlgmr.msrb.gmra.mxu3 %vm120_vm1, %v3940_v2  ;;  %3975 = vmatmul.msk.f32.vlgmr.msrb.gmra.mxu2 %vm120_vm1, %v104_v1 }
  0x31   :  { %596 = vmatpush.msrb.mxu3 %v4588_v10  ;;  %624 = vmatpush.msrb.mxu2 %v4588_v10 }
  0x32   :  { %3986 = vmatpush.msk.msrb.mxu0 %vm124_vm0, %v102_v9  ;;  %708 = vmatpush.msrb.mxu1 %v4588_v10 }
  0x33   :  { %597 = vmatpush.msrb.mxu3 %v4597_v11  ;;  %625 = vmatpush.msrb.mxu2 %v4597_v11 }
  0x34   :  { %709 = vmatpush.msrb.mxu1 %v4597_v11  ;;  %2603 = vperm.xlu1 %4132, %v2128_v20  }
  0x35   :  { %598 = vmatpush.msrb.mxu3 %v4604_v12  ;;  %626 = vmatpush.msrb.mxu2 %v4604_v12 }
  0x36   :  { %710 = vmatpush.msrb.mxu1 %v4604_v12 }
  0x37   :  { %599 = vmatpush.msrb.mxu3 %v4613_v13  ;;  %3979 = vmatmul.msk.f32.vlgmr.msra.gmra.mxu0 %vm120_vm1, %v3941_v3 }
  0x38   :  { %627 = vmatpush.msrb.mxu2 %v4613_v13  ;;  %680 = vmatpush.msra.mxu0 %v4588_v10 }
  0x39   :  { %600 = vmatpush.msrb.mxu3 %v4621_v14  ;;  %711 = vmatpush.msrb.mxu1 %v4613_v13 }
  0x3a   :  { %628 = vmatpush.msrb.mxu2 %v4621_v14  ;;  %681 = vmatpush.msra.mxu0 %v4597_v11 }
  0x3b   :  { %601 = vmatpush.msrb.mxu3 %v4631_v15  ;;  %712 = vmatpush.msrb.mxu1 %v4621_v14 }
  0x3c   :  { %629 = vmatpush.msrb.mxu2 %v4631_v15  ;;  %682 = vmatpush.msra.mxu0 %v4604_v12 }
  0x3d   :  { %3985 = vmatmul.msk.f32.vlgmr.msra.gmra.mxu3 %vm120_vm1, %v3944_v7  ;;  %3983 = vmatmul.msk.f32.vlgmr.msra.gmra.mxu2 %vm120_vm1, %v3943_v6 }
  0x3e   :  { %683 = vmatpush.msra.mxu0 %v4613_v13  ;;  %713 = vmatpush.msrb.mxu1 %v4631_v15 }
  0x3f   :  { %3981 = vmatmul.msk.f32.vlgmr.msra.gmra.mxu1 %vm120_vm1, %v4536_v4  ;;  %3987 = vmatmul.msk.f32.vlgmr.msrb.gmra.mxu0 %vm120_vm1, %v3945_v8 }
  0x40   :  { %684 = vmatpush.msra.mxu0 %v4621_v14  ;;  %602 = vmatpush.msrb.mxu3 %v4653_v16 }
  0x41   :  { %630 = vmatpush.msrb.mxu2 %v4653_v16  ;;  %714 = vmatpush.msrb.mxu1 %v4653_v16 }
  0x42   :  { %685 = vmatpush.msra.mxu0 %v4631_v15  ;;  %603 = vmatpush.msrb.mxu3 %v4658_v17 }
  0x43   :  { %631 = vmatpush.msrb.mxu2 %v4658_v17  ;;  %715 = vmatpush.msrb.mxu1 %v4658_v17 }
  0x44   :  { %686 = vmatpush.msra.mxu0 %v4653_v16  ;;  %652 = vmatpush.msra.mxu3 %v4588_v10 }
  0x45   :  { %736 = vmatpush.msra.mxu2 %v4588_v10  ;;  %861 = vmatpush.msra.mxu1 %v4588_v10 }
  0x46   :  { %687 = vmatpush.msra.mxu0 %v4658_v17  ;;  %653 = vmatpush.msra.mxu3 %v4597_v11 }
  0x47   :  { %737 = vmatpush.msra.mxu2 %v4597_v11  ;;  %862 = vmatpush.msra.mxu1 %v4597_v11 }
  0x48   :  { %837 = vmatpush.msrb.mxu0 %v4588_v10  ;;  %654 = vmatpush.msra.mxu3 %v4604_v12 }
  0x49   :  { %738 = vmatpush.msra.mxu2 %v4604_v12  ;;  %863 = vmatpush.msra.mxu1 %v4604_v12 }
  0x4a   :  { %838 = vmatpush.msrb.mxu0 %v4597_v11  ;;  %655 = vmatpush.msra.mxu3 %v4613_v13 }
  0x4b   :  { %739 = vmatpush.msra.mxu2 %v4613_v13  ;;  %864 = vmatpush.msra.mxu1 %v4613_v13 }
  0x4c   :  { %839 = vmatpush.msrb.mxu0 %v4604_v12  ;;  %656 = vmatpush.msra.mxu3 %v4621_v14 }
  0x4d   :  { %740 = vmatpush.msra.mxu2 %v4621_v14  ;;  %865 = vmatpush.msra.mxu1 %v4621_v14 }
  0x4e   :  { %840 = vmatpush.msrb.mxu0 %v4613_v13  ;;  %657 = vmatpush.msra.mxu3 %v4631_v15 }
  0x4f   :  { %741 = vmatpush.msra.mxu2 %v4631_v15  ;;  %866 = vmatpush.msra.mxu1 %v4631_v15 }
  0x50   :  { %841 = vmatpush.msrb.mxu0 %v4621_v14  ;;  %658 = vmatpush.msra.mxu3 %v4653_v16 }
  0x51   :  { %742 = vmatpush.msra.mxu2 %v4653_v16  ;;  %867 = vmatpush.msra.mxu1 %v4653_v16 }
  0x52   :  { %659 = vmatpush.msra.mxu3 %v4658_v17  ;;  %842 = vmatpush.msrb.mxu0 %v4631_v15 }
  0x53   :  { %743 = vmatpush.msra.mxu2 %v4658_v17  ;;  %868 = vmatpush.msra.mxu1 %v4658_v17 }
  0x54   :  { %843 = vmatpush.msrb.mxu0 %v4653_v16  ;;  %4135 = vset.pattern.permute.xlu1 %v4369_v38 }
  0x55   :  { %722 = vperm.xlu1 %4135, %v4691_v19  }
  0x56   :  { %844 = vmatpush.msrb.mxu0 %v4658_v17 }
  0x94   :  { %v145_v22 = vpop.f32.mrf.mxu0  ;;  %v4710_v23 = vpop.f32.mrf.mxu1 }
  0x95   :  { %v4719_v33 = vadd.f32 %v4139_v29, %v145_v22  ;;  %v4796_v5 = vadd.f32 %v4139_v29, %v4710_v23 }
  0x9b   :  { %v191_v24 = vpop.f32.mrf.mxu2  ;;  %v214_v25 = vpop.f32.mrf.mxu3 }
  0x9c   :  { %v237_v26 = vpop.f32.mrf.mxu0  ;;  %v260_v27 = vpop.f32.mrf.mxu1  ;;  %v215_v34 = vadd.f32 %v4139_v29, %v214_v25  ;;  %v4788_v3 = vadd.f32 %v4139_v29, %v191_v24 }
  0x9d   :  { %v238_v39 = vadd.f32 %v4139_v29, %v237_v26  ;;  %v261_v42 = vadd.f32 %v4139_v29, %v260_v27 }
  0xa3   :  { %v283_v31 = vpop.f32.mrf.mxu2  ;;  %v309_v32 = vpop.f32.mrf.mxu3 }
  0xa4   :  { %v4721_v35 = vadd.f32 %v4140_v30, %v309_v32  ;;  %v329_v36 = vpop.f32.mrf.mxu0  ;;  %v349_v37 = vpop.f32.mrf.mxu1  ;;  %v4729_v43 = vadd.f32 %v4139_v29, %v283_v31 }
  0xa5   :  { %v4724_v40 = vadd.f32 %v4140_v30, %v329_v36  ;;  %v4726_v41 = vadd.f32 %v4140_v30, %v349_v37 }
  0xa6   :  { %v578_v44 = vmul.f32 %v4721_v35, %v4719_v33  ;;  %v4734_v45 = vmul.f32 %v4721_v35, %v215_v34  ;;  %v4748_v49 = vmul.f32 %v4721_v35, %v238_v39  ;;  %v4758_v52 = vmul.f32 %v4721_v35, %v261_v42 }
  0xa7   :  { %v608_v46 = vmul.f32 %v4724_v40, %v4719_v33  ;;  %v4740_v47 = vmul.f32 %v4726_v41, %v215_v34  ;;  %v4743_v48 = vmul.f32 %v4724_v40, %v215_v34  ;;  %v4751_v50 = vmul.f32 %v4724_v40, %v238_v39 }
  0xa8   :  { %3988 = vmatmul.msk.f32.vlgmr.msrb.gmra.mxu3 %vm584_vm2, %v578_v44  ;;  %v4754_v51 = vmul.f32 %v4726_v41, %v238_v39  ;;  %v4761_v53 = vmul.f32 %v4724_v40, %v261_v42  ;;  %v4764_v54 = vmul.f32 %v4726_v41, %v261_v42  ;;  %v4768_v55 = vmul.f32 %v4721_v35, %v4729_v43 }
  0xa9   :  { %764 = vmatpush.msrb.mxu3 %v4588_v10  ;;  %3989 = vmatmul.msk.f32.vlgmr.msrb.gmra.mxu2 %vm584_vm2, %v608_v46  ;;  %v636_v0 = vmul.f32 %v4726_v41, %v4719_v33  ;;  %v4850_v28 = vmul.f32 %v4724_v40, %v4729_v43  ;;  %v4856_v29 = vmul.f32 %v4726_v41, %v4729_v43 }
  0xaa   :  { %885 = vmatpush.msrb.mxu2 %v4588_v10  ;;  %v849_v32 = vmul.f32 %v4724_v40, %v4796_v5 }
  0xab   :  { %765 = vmatpush.msrb.mxu3 %v4597_v11  ;;  %v369_v56 = vpop.f32.mrf.mxu2  ;;  %v389_v57 = vpop.f32.mrf.mxu3 }
  0xac   :  { %v4771_v58 = vadd.f32 %v4140_v30, %v369_v56  ;;  %v4773_v59 = vadd.f32 %v4140_v30, %v389_v57  ;;  %886 = vmatpush.msrb.mxu2 %v4597_v11  ;;  %v409_v60 = vpop.f32.mrf.mxu0  ;;  %v429_v61 = vpop.f32.mrf.mxu1  ;;  %v4370_v56 = vmov 6   ;;  %v4371_v57 = vmov 3  }
  0xad   :  { %766 = vmatpush.msrb.mxu3 %v4604_v12  ;;  %v4777_v62 = vadd.f32 %v4140_v30, %v409_v60  ;;  %v4779_v63 = vadd.f32 %v4140_v30, %v429_v61  ;;  %v825_v30 = vmul.f32 %v4721_v35, %v4796_v5  ;;  %4136 = vset.pattern.permute.xlu1 %v4370_v56 }
  0xae   :  { %887 = vmatpush.msrb.mxu2 %v4604_v12  ;;  %v664_v1 = vmul.f32 %v4771_v58, %v4719_v33  ;;  %v692_v2 = vmul.f32 %v4773_v59, %v4719_v33  ;;  %v4802_v6 = vmul.f32 %v4773_v59, %v4788_v3  ;;  %v4805_v7 = vmul.f32 %v4771_v58, %v215_v34 }
  0xaf   :  { %767 = vmatpush.msrb.mxu3 %v4613_v13  ;;  %v720_v4 = vmul.f32 %v4777_v62, %v4719_v33  ;;  %v4810_v8 = vmul.f32 %v4773_v59, %v215_v34  ;;  %v4813_v9 = vmul.f32 %v4779_v63, %v215_v34  ;;  %v4816_v18 = vmul.f32 %v4777_v62, %v215_v34 }
  0xb0   :  { %3990 = vmatmul.msk.f32.vlgmr.msra.gmra.mxu3 %vm584_vm2, %v636_v0  ;;  %3991 = vmatmul.msk.f32.vlgmr.msra.gmra.mxu0 %vm584_vm2, %v664_v1  ;;  %v4821_v20 = vmul.f32 %v4771_v58, %v238_v39  ;;  %v4824_v21 = vmul.f32 %v4773_v59, %v238_v39  ;;  %v4827_v22 = vmul.f32 %v4777_v62, %v238_v39  ;;  %v5212_v1 = vpop.permute.xlu0 %581 }
  0xb1   :  { %3992 = vmatmul.msk.f32.vlgmr.msrb.gmra.mxu1 %vm584_vm2, %v692_v2  ;;  %768 = vmatpush.msrb.mxu3 %v4621_v14  ;;  %v4832_v23 = vmul.f32 %v4779_v63, %v238_v39  ;;  %v4835_v24 = vmul.f32 %v4773_v59, %v261_v42  ;;  %v4838_v25 = vmul.f32 %v4777_v62, %v261_v42 }
  0xb2   :  { %888 = vmatpush.msrb.mxu2 %v4613_v13  ;;  %933 = vmatpush.msra.mxu0 %v4588_v10  ;;  %v4843_v26 = vmul.f32 %v4771_v58, %v261_v42  ;;  %v4846_v27 = vmul.f32 %v4779_v63, %v261_v42  ;;  %v748_v31 = vmul.f32 %v4779_v63, %v4719_v33 }
  0xb3   :  { %957 = vmatpush.msrb.mxu1 %v4588_v10  ;;  %3993 = vmatmul.msk.f32.vlgmr.msra.gmra.mxu2 %vm584_vm2, %v720_v4  ;;  %v873_v33 = vmul.f32 %v4726_v41, %v4796_v5  ;;  %v4884_v34 = vmul.f32 %v4771_v58, %v4729_v43  ;;  %v4888_v36 = vmul.f32 %v4777_v62, %v4729_v43 }
  0xb4   :  { %769 = vmatpush.msrb.mxu3 %v4631_v15  ;;  %889 = vmatpush.msrb.mxu2 %v4621_v14  ;;  %v4892_v37 = vmul.f32 %v4779_v63, %v4729_v43  ;;  %v4898_v39 = vmul.f32 %v4773_v59, %v4729_v43  ;;  %v921_v42 = vmul.f32 %v4773_v59, %v4796_v5 }
  0xb5   :  { %934 = vmatpush.msra.mxu0 %v4597_v11  ;;  %958 = vmatpush.msrb.mxu1 %v4597_v11  ;;  %v945_v43 = vmul.f32 %v4777_v62, %v4796_v5  ;;  %v897_v44 = vmul.f32 %v4771_v58, %v4796_v5  ;;  %v969_v46 = vmul.f32 %v4779_v63, %v4796_v5 }
  0xb6   :  { %770 = vmatpush.msrb.mxu3 %v4653_v16  ;;  %890 = vmatpush.msrb.mxu2 %v4631_v15  ;;  %v1066_v59 = vmul.f32 %v4724_v40, %v4788_v3  ;;  %v1090_v60 = vmul.f32 %v4726_v41, %v4788_v3  ;;  %v4372_v40 = vmov 4   ;;  %v1042_v41 = vmul.f32 %v4721_v35, %v4788_v3 }
  0xb7   :  { %935 = vmatpush.msra.mxu0 %v4604_v12  ;;  %959 = vmatpush.msrb.mxu1 %v4604_v12  ;;  %v1114_v61 = vmul.f32 %v4771_v58, %v4788_v3  ;;  %v1186_v35 = vmul.f32 %v4779_v63, %v4788_v3 }
  0xb8   :  { %771 = vmatpush.msrb.mxu3 %v4658_v17  ;;  %891 = vmatpush.msrb.mxu2 %v4653_v16  ;;  %v5258_v5 = vpop.permute.xlu0 %610 }
  0xb9   :  { %936 = vmatpush.msra.mxu0 %v4613_v13  ;;  %960 = vmatpush.msrb.mxu1 %v4613_v13 }
  0xba   :  { %909 = vmatpush.msra.mxu3 %v4588_v10  ;;  %3995 = vmatmul.msk.f32.vlgmr.msrb.gmra.mxu0 %vm584_vm2, %v825_v30 }
  0xbb   :  { %3994 = vmatmul.msk.f32.vlgmr.msrb.gmra.mxu3 %vm584_vm2, %v748_v31  ;;  %3996 = vmatmul.msk.f32.vlgmr.msra.gmra.mxu1 %vm584_vm2, %v849_v32  ;;  %v5324_v31 = vld [vmem:[%s6755_s7 + $0x10] sm:$0xff] }
  0xbc   :  { %892 = vmatpush.msrb.mxu2 %v4658_v17  ;;  %937 = vmatpush.msra.mxu0 %v4621_v14 }
  0xbd   :  { %961 = vmatpush.msrb.mxu1 %v4621_v14  ;;  %910 = vmatpush.msra.mxu3 %v4597_v11 }
  0xbe   :  { %981 = vmatpush.msra.mxu2 %v4588_v10  ;;  %938 = vmatpush.msra.mxu0 %v4631_v15 }
  0xbf   :  { %3997 = vmatmul.msk.f32.vlgmr.msrb.gmra.mxu2 %vm584_vm2, %v873_v33  ;;  %962 = vmatpush.msrb.mxu1 %v4631_v15 }
  0xc0   :  { %911 = vmatpush.msra.mxu3 %v4604_v12  ;;  %982 = vmatpush.msra.mxu2 %v4597_v11 }
  0xc1   :  { %939 = vmatpush.msra.mxu0 %v4653_v16  ;;  %963 = vmatpush.msrb.mxu1 %v4653_v16 }
  0xc2   :  { %912 = vmatpush.msra.mxu3 %v4613_v13  ;;  %983 = vmatpush.msra.mxu2 %v4604_v12 }
  0xc3   :  { %940 = vmatpush.msra.mxu0 %v4658_v17  ;;  %964 = vmatpush.msrb.mxu1 %v4658_v17 }
  0xc4   :  { %913 = vmatpush.msra.mxu3 %v4621_v14  ;;  %984 = vmatpush.msra.mxu2 %v4613_v13 }
  0xc5   :  { %1078 = vmatpush.msrb.mxu0 %v4588_v10  ;;  %1102 = vmatpush.msra.mxu1 %v4588_v10 }
  0xc6   :  { %3999 = vmatmul.msk.f32.vlgmr.msra.gmra.mxu0 %vm584_vm2, %v921_v42  ;;  %4000 = vmatmul.msk.f32.vlgmr.msrb.gmra.mxu1 %vm584_vm2, %v945_v43  ;;  %v5337_v42 = vld [vmem:[%s6755_s7 + $0x8] sm:$0xff] }
  0xc7   :  { %914 = vmatpush.msra.mxu3 %v4631_v15  ;;  %985 = vmatpush.msra.mxu2 %v4621_v14 }
  0xc8   :  { %1079 = vmatpush.msrb.mxu0 %v4597_v11  ;;  %1103 = vmatpush.msra.mxu1 %v4597_v11 }
  0xc9   :  { %915 = vmatpush.msra.mxu3 %v4653_v16  ;;  %986 = vmatpush.msra.mxu2 %v4631_v15 }
  0xca   :  { %1080 = vmatpush.msrb.mxu0 %v4604_v12  ;;  %1104 = vmatpush.msra.mxu1 %v4604_v12 }
  0xcb   :  { %916 = vmatpush.msra.mxu3 %v4658_v17  ;;  %987 = vmatpush.msra.mxu2 %v4653_v16 }
  0xcc   :  { %1081 = vmatpush.msrb.mxu0 %v4613_v13  ;;  %1105 = vmatpush.msra.mxu1 %v4613_v13 }
  0xcd   :  { %3998 = vmatmul.msk.f32.vlgmr.msra.gmra.mxu3 %vm584_vm2, %v897_v44  ;;  %988 = vmatpush.msra.mxu2 %v4658_v17 }
  0xce   :  { %1054 = vmatpush.msrb.mxu3 %v4588_v10  ;;  %1082 = vmatpush.msrb.mxu0 %v4621_v14 }
  0xcf   :  { %1106 = vmatpush.msra.mxu1 %v4621_v14  ;;  %4001 = vmatmul.msk.f32.vlgmr.msra.gmra.mxu2 %vm584_vm2, %v969_v46 }
  0xd0   :  { %1055 = vmatpush.msrb.mxu3 %v4597_v11  ;;  %1126 = vmatpush.msrb.mxu2 %v4588_v10 }
  0xd1   :  { %4131 = vset.pattern.permute.xlu2 %v4371_v57  ;;  %750 = vperm.xlu1 %4136, %v4691_v19  }
  0xd2   :  { %1083 = vmatpush.msrb.mxu0 %v4631_v15  ;;  %1107 = vmatpush.msra.mxu1 %v4631_v15 }
  0xd3   :  { %666 = vperm.xlu2 %4131, %v4691_v19   ;;  %1056 = vmatpush.msrb.mxu3 %v4604_v12 }
  0xd4   :  { %1127 = vmatpush.msrb.mxu2 %v4597_v11  ;;  %1084 = vmatpush.msrb.mxu0 %v4653_v16 }
  0xd5   :  { %1108 = vmatpush.msra.mxu1 %v4653_v16  ;;  %1057 = vmatpush.msrb.mxu3 %v4613_v13 }
  0xd6   :  { %1128 = vmatpush.msrb.mxu2 %v4604_v12  ;;  %1085 = vmatpush.msrb.mxu0 %v4658_v17 }
  0xd7   :  { %1109 = vmatpush.msra.mxu1 %v4658_v17  ;;  %1058 = vmatpush.msrb.mxu3 %v4621_v14 }
  0xd8   :  { %4003 = vmatmul.msk.f32.vlgmr.msrb.gmra.mxu0 %vm584_vm2, %v1066_v59  ;;  %4004 = vmatmul.msk.f32.vlgmr.msra.gmra.mxu1 %vm584_vm2, %v1090_v60  ;;  %v5353_v59 = vld [vmem:[%s6755_s7] sm:$0xff] }
  0xd9   :  { %1129 = vmatpush.msrb.mxu2 %v4613_v13  ;;  %1174 = vmatpush.msra.mxu0 %v4588_v10 }
  0xda   :  { %1198 = vmatpush.msrb.mxu1 %v4588_v10  ;;  %1059 = vmatpush.msrb.mxu3 %v4631_v15 }
  0xdb   :  { %1130 = vmatpush.msrb.mxu2 %v4621_v14  ;;  %1175 = vmatpush.msra.mxu0 %v4597_v11 }
  0xdc   :  { %1199 = vmatpush.msrb.mxu1 %v4597_v11  ;;  %4133 = vset.pattern.permute.xlu2 %v4372_v40 }
  0xdd   :  { %1060 = vmatpush.msrb.mxu3 %v4653_v16  ;;  %1131 = vmatpush.msrb.mxu2 %v4631_v15 }
  0xde   :  { %1176 = vmatpush.msra.mxu0 %v4604_v12  ;;  %1200 = vmatpush.msrb.mxu1 %v4604_v12 }
  0xdf   :  { %694 = vperm.xlu2 %4133, %v4691_v19   ;;  %1061 = vmatpush.msrb.mxu3 %v4658_v17  ;;  %v1162_v19 = vmul.f32 %v4777_v62, %v4788_v3  ;;  %v5186_v62 = vpop.f32.mrf.mxu1 }
  0xe0   :  { %1132 = vmatpush.msrb.mxu2 %v4653_v16  ;;  %1177 = vmatpush.msra.mxu0 %v4613_v13 }
  0xe1   :  { %1201 = vmatpush.msrb.mxu1 %v4613_v13  ;;  %4002 = vmatmul.msk.f32.vlgmr.msrb.gmra.mxu3 %vm584_vm2, %v1042_v41 }
  0xe2   :  { %1133 = vmatpush.msrb.mxu2 %v4658_v17  ;;  %1150 = vmatpush.msra.mxu3 %v4588_v10 }
  0xe3   :  { %1178 = vmatpush.msra.mxu0 %v4621_v14  ;;  %1202 = vmatpush.msrb.mxu1 %v4621_v14 }
  0xe4   :  { %4005 = vmatmul.msk.f32.vlgmr.msrb.gmra.mxu2 %vm584_vm2, %v1114_v61  ;;  %1151 = vmatpush.msra.mxu3 %v4597_v11 }
  0xe5   :  { %1271 = vmatpush.msra.mxu2 %v4588_v10  ;;  %1179 = vmatpush.msra.mxu0 %v4631_v15 }
  0xe6   :  { %1203 = vmatpush.msrb.mxu1 %v4631_v15  ;;  %1152 = vmatpush.msra.mxu3 %v4604_v12 }
  0xe7   :  { %1272 = vmatpush.msra.mxu2 %v4597_v11  ;;  %1180 = vmatpush.msra.mxu0 %v4653_v16 }
  0xe8   :  { %1204 = vmatpush.msrb.mxu1 %v4653_v16  ;;  %1153 = vmatpush.msra.mxu3 %v4613_v13 }
  0xe9   :  { %1273 = vmatpush.msra.mxu2 %v4604_v12  ;;  %1181 = vmatpush.msra.mxu0 %v4658_v17 }
  0xea   :  { %1205 = vmatpush.msrb.mxu1 %v4658_v17  ;;  %1154 = vmatpush.msra.mxu3 %v4621_v14 }
  0xeb   :  { %4007 = vmatmul.msk.f32.vlgmr.msra.gmra.mxu0 %vm584_vm2, %v1162_v19  ;;  %4008 = vmatmul.msk.f32.vlgmr.msrb.gmra.mxu1 %vm584_vm2, %v1186_v35 }
  0xec   :  { %1274 = vmatpush.msra.mxu2 %v4613_v13  ;;  %1319 = vmatpush.msrb.mxu0 %v4588_v10 }
  0xed   :  { %1343 = vmatpush.msra.mxu1 %v4588_v10  ;;  %1155 = vmatpush.msra.mxu3 %v4631_v15 }
  0xee   :  { %1275 = vmatpush.msra.mxu2 %v4621_v14  ;;  %1320 = vmatpush.msrb.mxu0 %v4597_v11 }
  0xef   :  { %1344 = vmatpush.msra.mxu1 %v4597_v11  ;;  %1156 = vmatpush.msra.mxu3 %v4653_v16 }
  0xf0   :  { %1276 = vmatpush.msra.mxu2 %v4631_v15  ;;  %1321 = vmatpush.msrb.mxu0 %v4604_v12 }
  0xf1   :  { %1345 = vmatpush.msra.mxu1 %v4604_v12  ;;  %1157 = vmatpush.msra.mxu3 %v4658_v17 }
  0xf2   :  { %1277 = vmatpush.msra.mxu2 %v4653_v16  ;;  %1322 = vmatpush.msrb.mxu0 %v4613_v13 }
  0xf3   :  { %1346 = vmatpush.msra.mxu1 %v4613_v13  ;;  %4006 = vmatmul.msk.f32.vlgmr.msra.gmra.mxu3 %vm584_vm2, %v4802_v6 }
  0xf4   :  { %1278 = vmatpush.msra.mxu2 %v4658_v17  ;;  %1295 = vmatpush.msrb.mxu3 %v4588_v10 }
  0xf5   :  { %1323 = vmatpush.msrb.mxu0 %v4621_v14  ;;  %1347 = vmatpush.msra.mxu1 %v4621_v14 }
  0xf6   :  { %4009 = vmatmul.msk.f32.vlgmr.msra.gmra.mxu2 %vm584_vm2, %v4734_v45  ;;  %1296 = vmatpush.msrb.mxu3 %v4597_v11  ;;  %v5132_v45 = vpop.f32.mrf.mxu3 }
  0xf7   :  { %1367 = vmatpush.msrb.mxu2 %v4588_v10  ;;  %1324 = vmatpush.msrb.mxu0 %v4631_v15 }
  0xf8   :  { %1348 = vmatpush.msra.mxu1 %v4631_v15  ;;  %1297 = vmatpush.msrb.mxu3 %v4604_v12 }
  0xf9   :  { %1368 = vmatpush.msrb.mxu2 %v4597_v11  ;;  %1325 = vmatpush.msrb.mxu0 %v4653_v16 }
  0xfa   :  { %1349 = vmatpush.msra.mxu1 %v4653_v16  ;;  %1298 = vmatpush.msrb.mxu3 %v4613_v13 }
  0xfb   :  { %1369 = vmatpush.msrb.mxu2 %v4604_v12  ;;  %1326 = vmatpush.msrb.mxu0 %v4658_v17 }
  0xfc   :  { %1350 = vmatpush.msra.mxu1 %v4658_v17  ;;  %1299 = vmatpush.msrb.mxu3 %v4621_v14 }
  0xfd   :  { %4011 = vmatmul.msk.f32.vlgmr.msrb.gmra.mxu0 %vm584_vm2, %v4740_v47  ;;  %4012 = vmatmul.msk.f32.vlgmr.msra.gmra.mxu1 %vm584_vm2, %v4805_v7  ;;  %v5138_v47 = vpop.f32.mrf.mxu2  ;;  %v5265_v7 = vld [vmem:[%s6755_s7 + $0x28] sm:$0xff] }
  0xfe   :  { %1370 = vmatpush.msrb.mxu2 %v4613_v13  ;;  %1415 = vmatpush.msra.mxu0 %v4588_v10 }
  0xff   :  { %1488 = vmatpush.msrb.mxu1 %v4588_v10  ;;  %1300 = vmatpush.msrb.mxu3 %v4631_v15 }
 0x100   :  { %1371 = vmatpush.msrb.mxu2 %v4621_v14  ;;  %1416 = vmatpush.msra.mxu0 %v4597_v11 }
 0x101   :  { %1489 = vmatpush.msrb.mxu1 %v4597_v11  ;;  %1301 = vmatpush.msrb.mxu3 %v4653_v16 }
 0x102   :  { %1372 = vmatpush.msrb.mxu2 %v4631_v15  ;;  %1417 = vmatpush.msra.mxu0 %v4604_v12 }
 0x103   :  { %1490 = vmatpush.msrb.mxu1 %v4604_v12  ;;  %1302 = vmatpush.msrb.mxu3 %v4658_v17 }
 0x104   :  { %1373 = vmatpush.msrb.mxu2 %v4653_v16  ;;  %1418 = vmatpush.msra.mxu0 %v4613_v13 }
 0x105   :  { %1491 = vmatpush.msrb.mxu1 %v4613_v13  ;;  %4010 = vmatmul.msk.f32.vlgmr.msrb.gmra.mxu3 %vm584_vm2, %v4743_v48  ;;  %v5154_v48 = vpop.f32.mrf.mxu3 }
 0x106   :  { %1374 = vmatpush.msrb.mxu2 %v4658_v17  ;;  %1391 = vmatpush.msra.mxu3 %v4588_v10 }
 0x107   :  { %1419 = vmatpush.msra.mxu0 %v4621_v14  ;;  %1492 = vmatpush.msrb.mxu1 %v4621_v14 }
 0x108   :  { %4013 = vmatmul.msk.f32.vlgmr.msrb.gmra.mxu2 %vm584_vm2, %v4810_v8  ;;  %1392 = vmatpush.msra.mxu3 %v4597_v11 }
 0x109   :  { %1512 = vmatpush.msra.mxu2 %v4588_v10  ;;  %1420 = vmatpush.msra.mxu0 %v4631_v15 }
 0x10a   :  { %1493 = vmatpush.msrb.mxu1 %v4631_v15  ;;  %1393 = vmatpush.msra.mxu3 %v4604_v12 }
 0x10b   :  { %1513 = vmatpush.msra.mxu2 %v4597_v11  ;;  %1421 = vmatpush.msra.mxu0 %v4653_v16 }
 0x10c   :  { %1494 = vmatpush.msrb.mxu1 %v4653_v16  ;;  %1394 = vmatpush.msra.mxu3 %v4613_v13 }
 0x10d   :  { %1514 = vmatpush.msra.mxu2 %v4604_v12  ;;  %1422 = vmatpush.msra.mxu0 %v4658_v17 }
 0x10e   :  { %1495 = vmatpush.msrb.mxu1 %v4658_v17  ;;  %1395 = vmatpush.msra.mxu3 %v4621_v14 }
 0x10f   :  { %4015 = vmatmul.msk.f32.vlgmr.msra.gmra.mxu0 %vm584_vm2, %v4813_v9  ;;  %4016 = vmatmul.msk.f32.vlgmr.msrb.gmra.mxu1 %vm584_vm2, %v4748_v49  ;;  %v5156_v49 = vpop.f32.mrf.mxu0 }
 0x110   :  { %1515 = vmatpush.msra.mxu2 %v4613_v13  ;;  %1560 = vmatpush.msrb.mxu0 %v4588_v10 }
 0x111   :  { %1584 = vmatpush.msra.mxu1 %v4588_v10  ;;  %1396 = vmatpush.msra.mxu3 %v4631_v15 }
 0x112   :  { %1516 = vmatpush.msra.mxu2 %v4621_v14  ;;  %1561 = vmatpush.msrb.mxu0 %v4597_v11 }
 0x113   :  { %1585 = vmatpush.msra.mxu1 %v4597_v11  ;;  %1397 = vmatpush.msra.mxu3 %v4653_v16 }
 0x114   :  { %1517 = vmatpush.msra.mxu2 %v4631_v15  ;;  %1562 = vmatpush.msrb.mxu0 %v4604_v12 }
 0x115   :  { %1586 = vmatpush.msra.mxu1 %v4604_v12  ;;  %1398 = vmatpush.msra.mxu3 %v4658_v17 }
 0x116   :  { %1518 = vmatpush.msra.mxu2 %v4653_v16  ;;  %1563 = vmatpush.msrb.mxu0 %v4613_v13 }
 0x117   :  { %1587 = vmatpush.msra.mxu1 %v4613_v13  ;;  %4014 = vmatmul.msk.f32.vlgmr.msra.gmra.mxu3 %vm584_vm2, %v4816_v18  ;;  %v5279_v18 = vld [vmem:[%s6755_s7 + $0x20] sm:$0xff] }
 0x118   :  { %1519 = vmatpush.msra.mxu2 %v4658_v17  ;;  %1536 = vmatpush.msrb.mxu3 %v4588_v10 }
 0x119   :  { %1564 = vmatpush.msrb.mxu0 %v4621_v14  ;;  %1588 = vmatpush.msra.mxu1 %v4621_v14 }
 0x11a   :  { %4017 = vmatmul.msk.f32.vlgmr.msra.gmra.mxu2 %vm584_vm2, %v4751_v50  ;;  %1537 = vmatpush.msrb.mxu3 %v4597_v11  ;;  %v5162_v50 = vpop.f32.mrf.mxu2 }
 0x11b   :  { %1608 = vmatpush.msrb.mxu2 %v4588_v10  ;;  %1565 = vmatpush.msrb.mxu0 %v4631_v15 }
 0x11c   :  { %1589 = vmatpush.msra.mxu1 %v4631_v15  ;;  %1538 = vmatpush.msrb.mxu3 %v4604_v12 }
 0x11d   :  { %1609 = vmatpush.msrb.mxu2 %v4597_v11  ;;  %1566 = vmatpush.msrb.mxu0 %v4653_v16 }
 0x11e   :  { %1590 = vmatpush.msra.mxu1 %v4653_v16  ;;  %1539 = vmatpush.msrb.mxu3 %v4613_v13 }
 0x11f   :  { %1610 = vmatpush.msrb.mxu2 %v4604_v12  ;;  %1567 = vmatpush.msrb.mxu0 %v4658_v17 }
 0x120   :  { %1591 = vmatpush.msra.mxu1 %v4658_v17  ;;  %1540 = vmatpush.msrb.mxu3 %v4621_v14 }
 0x121   :  { %4019 = vmatmul.msk.f32.vlgmr.msrb.gmra.mxu0 %vm584_vm2, %v4821_v20  ;;  %4020 = vmatmul.msk.f32.vlgmr.msra.gmra.mxu1 %vm584_vm2, %v4824_v21 }
 0x122   :  { %1611 = vmatpush.msrb.mxu2 %v4613_v13  ;;  %1705 = vmatpush.msra.mxu0 %v4588_v10 }
 0x123   :  { %1729 = vmatpush.msrb.mxu1 %v4588_v10  ;;  %1541 = vmatpush.msrb.mxu3 %v4631_v15 }
 0x124   :  { %1612 = vmatpush.msrb.mxu2 %v4621_v14  ;;  %1706 = vmatpush.msra.mxu0 %v4597_v11 }
 0x125   :  { %1730 = vmatpush.msrb.mxu1 %v4597_v11  ;;  %1542 = vmatpush.msrb.mxu3 %v4653_v16 }
 0x126   :  { %1613 = vmatpush.msrb.mxu2 %v4631_v15  ;;  %1707 = vmatpush.msra.mxu0 %v4604_v12 }
 0x127   :  { %1731 = vmatpush.msrb.mxu1 %v4604_v12  ;;  %1543 = vmatpush.msrb.mxu3 %v4658_v17 }
 0x128   :  { %1614 = vmatpush.msrb.mxu2 %v4653_v16  ;;  %1708 = vmatpush.msra.mxu0 %v4613_v13 }
 0x129   :  { %1732 = vmatpush.msrb.mxu1 %v4613_v13  ;;  %4018 = vmatmul.msk.f32.vlgmr.msrb.gmra.mxu3 %vm584_vm2, %v4754_v51  ;;  %v5178_v51 = vpop.permute.xlu1 %638 }
 0x12a   :  { %1615 = vmatpush.msrb.mxu2 %v4658_v17  ;;  %1632 = vmatpush.msra.mxu3 %v4588_v10 }
 0x12b   :  { %1709 = vmatpush.msra.mxu0 %v4621_v14  ;;  %1733 = vmatpush.msrb.mxu1 %v4621_v14  ;;  %v5180_v58 = vpop.f32.mrf.mxu3 }
 0x12c   :  { %4021 = vmatmul.msk.f32.vlgmr.msrb.gmra.mxu2 %vm584_vm2, %v4827_v22  ;;  %1633 = vmatpush.msra.mxu3 %v4597_v11  ;;  %v5300_v22 = vld [vmem:[%s6755_s7 + $0x18] sm:$0xff] }
 0x12d   :  { %1753 = vmatpush.msra.mxu2 %v4588_v10  ;;  %1710 = vmatpush.msra.mxu0 %v4631_v15 }
 0x12e   :  { %1734 = vmatpush.msrb.mxu1 %v4631_v15  ;;  %1634 = vmatpush.msra.mxu3 %v4604_v12  ;;  %v5218_v3 = vpop.f32.mrf.mxu1 }
 0x12f   :  { %1754 = vmatpush.msra.mxu2 %v4597_v11  ;;  %1711 = vmatpush.msra.mxu0 %v4653_v16 }
 0x130   :  { %1735 = vmatpush.msrb.mxu1 %v4653_v16  ;;  %1635 = vmatpush.msra.mxu3 %v4613_v13 }
 0x131   :  { %1755 = vmatpush.msra.mxu2 %v4604_v12  ;;  %1712 = vmatpush.msra.mxu0 %v4658_v17  ;;  %v5208_v63 = vpop.permute.xlu1 %2547 }
 0x132   :  { %1736 = vmatpush.msrb.mxu1 %v4658_v17  ;;  %1636 = vmatpush.msra.mxu3 %v4621_v14  ;;  %6760 = vst [vmem:[#allocation2_spill] sm:$0xff] %v5208_v63 }
 0x133   :  { %4023 = vmatmul.msk.f32.vlgmr.msra.gmra.mxu0 %vm584_vm2, %v4758_v52  ;;  %4024 = vmatmul.msk.f32.vlgmr.msrb.gmra.mxu1 %vm584_vm2, %v4761_v53  ;;  %v5188_v52 = vpop.f32.mrf.mxu0  ;;  %v633_v53 = vpop.f32.mrf.mxu2 }
 0x134   :  { %1756 = vmatpush.msra.mxu2 %v4613_v13  ;;  %1801 = vmatpush.msrb.mxu0 %v4588_v10  ;;  %v661_v0 = vpop.f32.mrf.mxu3 }
 0x135   :  { %1825 = vmatpush.msra.mxu1 %v4588_v10  ;;  %1637 = vmatpush.msra.mxu3 %v4631_v15 }
 0x136   :  { %1757 = vmatpush.msra.mxu2 %v4621_v14  ;;  %1802 = vmatpush.msrb.mxu0 %v4597_v11 }
 0x137   :  { %1826 = vmatpush.msra.mxu1 %v4597_v11  ;;  %1638 = vmatpush.msra.mxu3 %v4653_v16 }
 0x138   :  { %1758 = vmatpush.msra.mxu2 %v4631_v15  ;;  %1803 = vmatpush.msrb.mxu0 %v4604_v12  ;;  %v870_v6 = vpop.f32.mrf.mxu1 }
 0x139   :  { %1827 = vmatpush.msra.mxu1 %v4604_v12  ;;  %1639 = vmatpush.msra.mxu3 %v4658_v17  ;;  %v5287_v21 = vadd.f32 %v870_v6, %v5258_v5 }
 0x13a   :  { %1759 = vmatpush.msra.mxu2 %v4653_v16  ;;  %1804 = vmatpush.msrb.mxu0 %v4613_v13 }
 0x13b   :  { %1828 = vmatpush.msra.mxu1 %v4613_v13  ;;  %4022 = vmatmul.msk.f32.vlgmr.msra.gmra.mxu3 %vm584_vm2, %v4832_v23  ;;  %v5216_v2 = vpop.f32.mrf.mxu0  ;;  %v5304_v23 = vadd.f32 %v661_v0, %v5178_v51 }
 0x13c   :  { %1760 = vmatpush.msra.mxu2 %v4658_v17  ;;  %1777 = vmatpush.msrb.mxu3 %v4588_v10 }
 0x13d   :  { %1805 = vmatpush.msrb.mxu0 %v4621_v14  ;;  %1829 = vmatpush.msra.mxu1 %v4621_v14 }
 0x13e   :  { %4025 = vmatmul.msk.f32.vlgmr.msra.gmra.mxu2 %vm584_vm2, %v4764_v54  ;;  %1778 = vmatpush.msrb.mxu3 %v4597_v11  ;;  %v5222_v54 = vpop.permute.xlu2 %2575  ;;  %v5249_v4 = vpop.f32.mrf.mxu3 }
 0x13f   :  { %1849 = vmatpush.msrb.mxu2 %v4588_v10  ;;  %1806 = vmatpush.msrb.mxu0 %v4631_v15  ;;  %6761 = vst [vmem:[#allocation3_spill] sm:$0xff] %v5222_v54  ;;  %v5226_v10 = vpop.f32.mrf.mxu2 }
 0x140   :  { %1830 = vmatpush.msra.mxu1 %v4631_v15  ;;  %1779 = vmatpush.msrb.mxu3 %v4604_v12 }
 0x141   :  { %1850 = vmatpush.msrb.mxu2 %v4597_v11  ;;  %1807 = vmatpush.msrb.mxu0 %v4653_v16  ;;  %v5241_v11 = vld [vmem:[%s6755_s7 + $0x38] sm:$0xff] }
 0x142   :  { %1831 = vmatpush.msra.mxu1 %v4653_v16  ;;  %1780 = vmatpush.msrb.mxu3 %v4613_v13 }
 0x143   :  { %1851 = vmatpush.msrb.mxu2 %v4604_v12  ;;  %1808 = vmatpush.msrb.mxu0 %v4658_v17  ;;  %v5247_v12 = vpop.permute.xlu1 %2603  ;;  %v966_v41 = vpop.f32.mrf.mxu1 }
 0x144   :  { %1832 = vmatpush.msra.mxu1 %v4658_v17  ;;  %1781 = vmatpush.msrb.mxu3 %v4621_v14  ;;  %6762 = vst [vmem:[#allocation4_spill] sm:$0xff] %v5247_v12 }
 0x145   :  { %4027 = vmatmul.msk.f32.vlgmr.msrb.gmra.mxu0 %vm584_vm2, %v4835_v24  ;;  %4028 = vmatmul.msk.f32.vlgmr.msra.gmra.mxu1 %vm584_vm2, %v4838_v25 }
 0x146   :  { %1852 = vmatpush.msrb.mxu2 %v4613_v13  ;;  %1946 = vmatpush.msra.mxu0 %v5241_v11  ;;  %v5254_v13 = vld [vmem:[%s6755_s7 + $0x30] sm:$0xff]  ;;  %v5269_v8 = vpop.permute.xlu2 %666 }
 0x147   :  { %1970 = vmatpush.msrb.mxu1 %v5241_v11  ;;  %1782 = vmatpush.msrb.mxu3 %v4631_v15  ;;  %v894_v9 = vpop.f32.mrf.mxu2  ;;  %v5343_v44 = vadd.f32 %v5216_v2, %v5269_v8 }
 0x148   :  { %1853 = vmatpush.msrb.mxu2 %v4621_v14  ;;  %1947 = vmatpush.msra.mxu0 %v5254_v13  ;;  %v846_v14 = vpop.f32.mrf.mxu0  ;;  %v5307_v24 = vadd.f32 %v894_v9, %v5178_v51 }
 0x149   :  { %1971 = vmatpush.msrb.mxu1 %v5254_v13  ;;  %1783 = vmatpush.msrb.mxu3 %v4653_v16  ;;  %v5284_v20 = vadd.f32 %v846_v14, %v5212_v1 }
 0x14a   :  { %1854 = vmatpush.msrb.mxu2 %v4631_v15  ;;  %1948 = vmatpush.msra.mxu0 %v5265_v7  ;;  %v5274_v15 = vadd.f32 %v633_v53, %v5258_v5 }
 0x14b   :  { %1972 = vmatpush.msrb.mxu1 %v5265_v7  ;;  %1784 = vmatpush.msrb.mxu3 %v4658_v17 }
 0x14c   :  { %1855 = vmatpush.msrb.mxu2 %v4653_v16  ;;  %1949 = vmatpush.msra.mxu0 %v5279_v18  ;;  %v5294_v16 = vadd.f32 %v5180_v58, %v5212_v1 }
 0x14d   :  { %1973 = vmatpush.msrb.mxu1 %v5279_v18  ;;  %4026 = vmatmul.msk.f32.vlgmr.msrb.gmra.mxu3 %vm584_vm2, %v4843_v26  ;;  %v993_v26 = vmax.f32 %v5284_v20, %v5287_v21 }
 0x14e   :  { %1856 = vmatpush.msrb.mxu2 %v4658_v17  ;;  %1922 = vmatpush.msra.mxu3 %v5241_v11  ;;  %v776_v25 = vmax.f32 %v5294_v16, %v5274_v15  ;;  %v5348_v56 = vpop.permute.xlu2 %694 }
 0x14f   :  { %1950 = vmatpush.msra.mxu0 %v5300_v22  ;;  %1974 = vmatpush.msrb.mxu1 %v5300_v22  ;;  %v994_v33 = vmax.f32 %v993_v26, %v5307_v24  ;;  %v5369_v61 = vadd.f32 %v5218_v3, %v5348_v56 }
 0x150   :  { %4029 = vmatmul.msk.f32.vlgmr.msrb.gmra.mxu2 %vm584_vm2, %v4846_v27  ;;  %v918_v17 = vpop.f32.mrf.mxu3  ;;  %1923 = vmatpush.msra.mxu3 %v5254_v13  ;;  %v5328_v27 = vpop.permute.xlu1 %722  ;;  %v777_v32 = vmax.f32 %v776_v25, %v5304_v23 }
 0x151   :  { %1994 = vmatpush.msra.mxu2 %v5241_v11  ;;  %v5319_v30 = vadd.f32 %v918_v17, %v5269_v8  ;;  %1951 = vmatpush.msra.mxu0 %v5324_v31  ;;  %v942_v43 = vpop.f32.mrf.mxu0  ;;  %v5388_v53 = vadd.f32 %v5226_v10, %v5328_v27 }
 0x152   :  { %1975 = vmatpush.msrb.mxu1 %v5324_v31  ;;  %1924 = vmatpush.msra.mxu3 %v5265_v7  ;;  %v778_v60 = vmax.f32 %v777_v32, %v5343_v44  ;;  %v5362_v40 = vadd.f32 %v942_v43, %v5348_v56  ;;  %v990_v58 = vpop.f32.mrf.mxu2 }
 0x153   :  { %1995 = vmatpush.msra.mxu2 %v5254_v13  ;;  %1952 = vmatpush.msra.mxu0 %v5337_v42  ;;  %v995_v46 = vmax.f32 %v994_v33, %v5319_v30 }
 0x154   :  { %1976 = vmatpush.msrb.mxu1 %v5337_v42  ;;  %1925 = vmatpush.msra.mxu3 %v5279_v18 }
 0x155   :  { %1996 = vmatpush.msra.mxu2 %v5265_v7  ;;  %1953 = vmatpush.msra.mxu0 %v5353_v59  ;;  %v996_v19 = vmax.f32 %v995_v46, %v5362_v40  ;;  %v1111_v9 = vpop.f32.mrf.mxu1  ;;  %v5464_v46 = vld [vmem:[%s6765_s3] sm:$0x1f] }
 0x156   :  { %1977 = vmatpush.msrb.mxu1 %v5353_v59  ;;  %1926 = vmatpush.msra.mxu3 %v5300_v22 }
 0x157   :  { %4031 = vmatmul.msk.f32.vlgmr.msra.gmra.mxu0 %vm584_vm2, %v4850_v28  ;;  %4032 = vmatmul.msk.f32.vlgmr.msrb.gmra.mxu1 %vm584_vm2, %v4856_v29  ;;  %v779_v28 = vmax.f32 %v778_v60, %v5369_v61  ;;  %v5380_v29 = vadd.f32 %v966_v41, %v5328_v27 }
 0x158   :  { %1997 = vmatpush.msra.mxu2 %v5279_v18  ;;  %2042 = vmatpush.msrb.mxu0 %v5241_v11  ;;  %v5382_v35 = vpop.permute.xlu1 %750 }
 0x159   :  { %2066 = vmatpush.msra.mxu1 %v5241_v11  ;;  %1927 = vmatpush.msra.mxu3 %v5324_v31  ;;  %v997_v0 = vmax.f32 %v996_v19, %v5380_v29  ;;  %v780_v2 = vmax.f32 %v779_v28, %v5388_v53  ;;  %v5398_v3 = vadd.f32 %v5249_v4, %v5382_v35  ;;  %v5413_v4 = vld [vmem:[%s6763_s9] sm:$0x1f]  ;;  %v1087_v6 = vpop.f32.mrf.mxu0 }
 0x15a   :  { %1998 = vmatpush.msra.mxu2 %v5300_v22  ;;  %2043 = vmatpush.msrb.mxu0 %v5254_v13  ;;  %v5403_v10 = vadd.f32 %v990_v58, %v5382_v35  ;;  %v5437_v26 = vadd.f32 %v1087_v6, %v5258_v5 }
 0x15b   :  { %2067 = vmatpush.msra.mxu1 %v5254_v13  ;;  %1928 = vmatpush.msra.mxu3 %v5337_v42 }
 0x15c   :  { %1999 = vmatpush.msra.mxu2 %v5324_v31  ;;  %2044 = vmatpush.msrb.mxu0 %v5265_v7  ;;  %v5416_v14 = vmax.f32 %v997_v0, %v5403_v10 }
 0x15d   :  { %2068 = vmatpush.msra.mxu1 %v5265_v7  ;;  %1929 = vmatpush.msra.mxu3 %v5353_v59 }
 0x15e   :  { %2000 = vmatpush.msra.mxu2 %v5337_v42  ;;  %2045 = vmatpush.msrb.mxu0 %v5279_v18  ;;  %v1002_v25 = vsub.f32 %v5287_v21, %v5416_v14  ;;  %v1005_v58 = vsub.f32 %v5307_v24, %v5416_v14  ;;  %v4357_v24 = vld [vmem:[%s6757_s10] sm:$0xff] }
 0x15f   :  { %2069 = vmatpush.msra.mxu1 %v5279_v18  ;;  %4030 = vmatmul.msk.f32.vlgmr.msra.gmra.mxu3 %vm584_vm2, %v4768_v55  ;;  %v5422_v55 = vmax.f32 %v780_v2, %v5398_v3  ;;  %v5496_v2 = vld [vmem:[%s6764_s11 + $0x10] sm:$0xff] }
 0x160   :  { %2001 = vmatpush.msra.mxu2 %v5353_v59  ;;  %2018 = vmatpush.msrb.mxu3 %v5241_v11 }
 0x161   :  { %2046 = vmatpush.msrb.mxu0 %v5300_v22  ;;  %2070 = vmatpush.msra.mxu1 %v5300_v22  ;;  %v782_v33 = vsub.f32 %v5294_v16, %v5422_v55  ;;  %v785_v43 = vsub.f32 %v5274_v15, %v5422_v55  ;;  %v5459_v16 = vadd.f32 %v1111_v9, %v5178_v51  ;;  %v1006_v9 = vmul.f32 1.442695, %v1005_v58 }
 0x162   :  { %4033 = vmatmul.msk.f32.vlgmr.msra.gmra.mxu2 %vm584_vm2, %v4884_v34  ;;  %2019 = vmatpush.msrb.mxu3 %v5254_v13  ;;  %v999_v34 = vsub.f32 %v5284_v20, %v5416_v14  ;;  %v5451_v20 = vld [vmem:[%s6764_s11] sm:$0xff]  ;;  %v788_v6 = vsub.f32 %v5304_v23, %v5422_v55  ;;  %v797_v58 = vsub.f32 %v5388_v53, %v5422_v55 }
 0x163   :  { %2047 = vmatpush.msrb.mxu0 %v5324_v31  ;;  %2071 = vmatpush.msra.mxu1 %v5324_v31  ;;  %v783_v28 = vmul.f32 1.442695, %v782_v33 }
 0x164   :  { %4042 = vmatpush.msk.msrb.mxu2 %vm2153_vm3, %v5413_v4  ;;  %2020 = vmatpush.msrb.mxu3 %v5265_v7  ;;  %v1063_v17 = vpop.f32.mrf.mxu3  ;;  %v1000_v15 = vmul.f32 1.442695, %v999_v34  ;;  %v5510_v34 = vld [vmem:[%s6764_s11 + $0x18] sm:$0xff] }
 0x165   :  { %2048 = vmatpush.msrb.mxu0 %v5337_v42  ;;  %2072 = vmatpush.msra.mxu1 %v5337_v42  ;;  %v5442_v32 = vadd.f32 %v1063_v17, %v5212_v1  ;;  %v791_v17 = vsub.f32 %v5343_v44, %v5422_v55  ;;  %v1011_v44 = vsub.f32 %v5362_v40, %v5416_v14 }
 0x166   :  { %4048 = vmatpush.msk.msra.mxu2 %vm2153_vm3, %v5413_v4  ;;  %2021 = vmatpush.msrb.mxu3 %v5279_v18  ;;  %4149 = vpow2.f32 %v1000_v15  ;;  %v5549_v15 = vld [vmem:[%s6764_s11 + $0x20] sm:$0xff] }
 0x167   :  { %2049 = vmatpush.msrb.mxu0 %v5353_v59  ;;  %v1135_v21 = vpop.f32.mrf.mxu2  ;;  %2073 = vmatpush.msra.mxu1 %v5353_v59  ;;  %v1210_v60 = vmax.f32 %v5442_v32, %v5437_v26  ;;  %v792_v40 = vmul.f32 1.442695, %v791_v17  ;;  %v1012_v53 = vmul.f32 1.442695, %v1011_v44 }
 0x168   :  { %4035 = vmatmul.msk.f32.vlgmr.msrb.gmra.mxu0 %vm584_vm2, %v4888_v36  ;;  %2022 = vmatpush.msrb.mxu3 %v5300_v22  ;;  %v1003_v36 = vmul.f32 1.442695, %v1002_v25  ;;  %v5476_v41 = vadd.f32 %v1135_v21, %v5269_v8  ;;  %v794_v21 = vsub.f32 %v5369_v61, %v5422_v55  ;;  %v5555_v61 = vld [vmem:[%s6766_s6] ss:$0 sm:$0xff] }
 0x169   :  { %4036 = vmatmul.msk.f32.vlgmr.msra.gmra.mxu1 %vm584_vm2, %v4892_v37  ;;  %4046 = vmatpush.msk.msra.mxu0 %vm2153_vm3, %v5413_v4  ;;  %v5479_v19 = vmax.f32 %v1210_v60, %v5459_v16  ;;  %v786_v37 = vmul.f32 1.442695, %v785_v43  ;;  %v5542_v43 = vld [vmem:[%s6764_s11 + $0x28] sm:$0xff] }
 0x16a   :  { %4043 = vmatmul.msk.f32.vlgmr.msrb.gmra.mxu2 %vm2149_vm4, %v5451_v20  ;;  %2023 = vmatpush.msrb.mxu3 %v5324_v31  ;;  %4151 = vpow2.f32 %v1003_v36 }
 0x16b   :  { %4054 = vmatpush.msk.msrb.mxu1 %vm2153_vm3, %v5464_v46  ;;  %4052 = vmatpush.msk.msrb.mxu0 %vm2153_vm3, %v5413_v4  ;;  %v1212_v0 = vmax.f32 %v5479_v19, %v5476_v41  ;;  %4153 = vpow2.f32 %v783_v28  ;;  %v1183_v28 = vpop.f32.mrf.mxu0  ;;  %v800_v19 = vsub.f32 %v5398_v3, %v5422_v55 }
 0x16c   :  { %4056 = vmatpush.msk.msrb.mxu2 %vm2153_vm3, %v5464_v46  ;;  %2024 = vmatpush.msrb.mxu3 %v5337_v42  ;;  %4155 = vpow2.f32 %v786_v37  ;;  %v4150_v23 = vpop.eup %4149  ;;  %v1184_v17 = vadd.f32 %v1183_v28, %v5328_v27 }
 0x16d   :  { %4062 = vmatpush.msk.msra.mxu1 %vm2153_vm3, %v5464_v46  ;;  %4134 = vset.pattern.permute.xlu0 %v4371_v57  ;;  %v1008_v57 = vsub.f32 %v5319_v30, %v5416_v14  ;;  %v789_v30 = vmul.f32 1.442695, %v788_v6  ;;  %4157 = vpow2.f32 %v1006_v9  ;;  %v795_v9 = vmul.f32 1.442695, %v794_v21 }
 0x16e   :  { %2659 = vperm.xlu2 %4133, %v4357_v24   ;;  %2025 = vmatpush.msrb.mxu3 %v5353_v59  ;;  %v5579_v21 = vadd.f32 %v5555_v61, %v5132_v45 }
 0x16f   :  { %2631 = vperm.xlu0 %4134, %v4357_v24   ;;  %4034 = vmatmul.msk.f32.vlgmr.msrb.gmra.mxu3 %vm584_vm2, %v4898_v39  ;;  %v1009_v25 = vmul.f32 1.442695, %v1008_v57  ;;  %4159 = vpow2.f32 %v789_v30  ;;  %v1014_v30 = vsub.f32 %v5380_v29, %v5416_v14  ;;  %v1017_v29 = vsub.f32 %v5403_v10, %v5416_v14 }
 0x170   :  { %4047 = vmatmul.msk.f32.vlgmr.msra.gmra.mxu0 %vm2149_vm4, %v5496_v2  ;;  %4044 = vmatpush.msk.msra.mxu3 %vm2153_vm3, %v5413_v4  ;;  %v4152_v39 = vpop.eup %4151 }
 0x171   :  { %4055 = vmatmul.msk.f32.vlgmr.msrb.gmra.mxu1 %vm2149_vm4, %v5451_v20  ;;  %4060 = vmatpush.msk.msra.mxu0 %vm2153_vm3, %v5464_v46  ;;  %v4154_v33 = vpop.eup %4153  ;;  %v1021_v36 = vadd.f32 %v4152_v39, %v4150_v23  ;;  %4161 = vpow2.f32 %v1009_v25  ;;  %v1015_v10 = vmul.f32 1.442695, %v1014_v30 }
 0x172   :  { %4049 = vmatmul.msk.f32.vlgmr.msra.gmra.mxu2 %vm2149_vm4, %v5510_v34  ;;  %4050 = vmatpush.msk.msrb.mxu3 %vm2153_vm3, %v5413_v4  ;;  %v5537_v4 = vld [vmem:[%s6764_s11 + $0x8] sm:$0xff]  ;;  %v4156_v60 = vpop.eup %4155  ;;  %4163 = vpow2.f32 %v792_v40 }
 0x173   :  { %4064 = vmatpush.msk.msra.mxu2 %vm2153_vm3, %v5464_v46  ;;  %v804_v57 = vadd.f32 %v4156_v60, %v4154_v33  ;;  %4165 = vpow2.f32 %v795_v9 }
 0x174   :  { %4167 = vpow2.f32 %v1012_v53 }
 0x176   :  { %4137 = vset.pattern.permute.xlu2 %v4369_v38  ;;  %v1159_v37 = vpop.f32.mrf.mxu3 }
 0x177   :  { %2687 = vperm.xlu2 %4137, %v4357_v24   ;;  %4138 = vset.pattern.permute.xlu0 %v4369_v38  ;;  %v1160_v6 = vadd.f32 %v1159_v37, %v5348_v56  ;;  %v1207_v24 = vpop.f32.mrf.mxu1  ;;  %v4158_v38 = vpop.eup %4157  ;;  %v798_v37 = vmul.f32 1.442695, %v797_v58  ;;  %v1022_v58 = vmul.f32 %v4152_v39, %v5579_v21 }
 0x178   :  { %4045 = vmatmul.msk.f32.vlgmr.msra.gmra.mxu3 %vm2149_vm4, %v5537_v4  ;;  %4053 = vmatmul.msk.f32.vlgmr.msrb.gmra.mxu0 %vm2149_vm4, %v5542_v43  ;;  %v1024_v44 = vadd.f32 %v4158_v38, %v1021_v36  ;;  %v1208_v28 = vadd.f32 %v1207_v24, %v5382_v35  ;;  %v4160_v63 = vpop.eup %4159  ;;  %v1018_v36 = vmul.f32 1.442695, %v1017_v29 }
 0x179   :  { %4063 = vmatmul.msk.f32.vlgmr.msra.gmra.mxu1 %vm2149_vm4, %v5549_v15  ;;  %4058 = vmatpush.msk.msra.mxu3 %vm2153_vm3, %v5464_v46  ;;  %v1213_v25 = vmax.f32 %v1212_v0, %v1160_v6  ;;  %v5583_v46 = vadd.f32 %v5555_v61, %v5138_v47  ;;  %v805_v0 = vmul.f32 %v4156_v60, %v5579_v21  ;;  %v5592_v47 = vpop.eup %4161  ;;  %4169 = vpow2.f32 %v798_v37 }
 0x17a   :  { %4057 = vmatmul.msk.f32.vlgmr.msrb.gmra.mxu2 %vm2149_vm4, %v5537_v4  ;;  %v807_v54 = vadd.f32 %v4160_v63, %v804_v57  ;;  %v1027_v9 = vadd.f32 %v5592_v47, %v1024_v44  ;;  %v4164_v57 = vpop.eup %4163  ;;  %4171 = vpow2.f32 %v1015_v10 }
 0x17b   :  { %v1214_v12 = vmax.f32 %v1213_v25, %v1184_v17  ;;  %v803_v45 = vmul.f32 %v4154_v33, %v5583_v46  ;;  %v1020_v40 = vmul.f32 %v4150_v23, %v5583_v46  ;;  %v5607_v25 = vpop.eup %4165  ;;  %4173 = vpow2.f32 %v1018_v36 }
 0x17c   :  { %v4168_v29 = vpop.eup %4167 }
 0x17d   :  { %v1215_v14 = vmax.f32 %v1214_v12, %v1208_v28  ;;  %v1030_v44 = vadd.f32 %v4168_v29, %v1027_v9  ;;  %v806_v10 = vadd.f32 %v805_v0, %v803_v45  ;;  %v1328_v9 = vpop.f32.mrf.mxu0 }
 0x17f   :  { %v1216_v3 = vsub.f32 %v5442_v32, %v1215_v14  ;;  %v1219_v55 = vsub.f32 %v5437_v26, %v1215_v14  ;;  %v1222_v12 = vsub.f32 %v5459_v16, %v1215_v14  ;;  %v1225_v33 = vsub.f32 %v5476_v41, %v1215_v14 }
 0x180   :  { %4051 = vmatmul.msk.f32.vlgmr.msrb.gmra.mxu3 %vm2149_vm4, %v5549_v15  ;;  %4061 = vmatmul.msk.f32.vlgmr.msra.gmra.mxu0 %vm2149_vm4, %v5510_v34  ;;  %v1228_v23 = vsub.f32 %v1160_v6, %v1215_v14  ;;  %v1231_v60 = vsub.f32 %v1184_v17, %v1215_v14  ;;  %v1234_v39 = vsub.f32 %v1208_v28, %v1215_v14  ;;  %v801_v41 = vmul.f32 1.442695, %v800_v19  ;;  %v1280_v6 = vpop.f32.mrf.mxu2  ;;  %v5613_v28 = vpop.eup %4169 }
 0x181   :  { %v1217_v24 = vmul.f32 1.442695, %v1216_v3  ;;  %v1220_v53 = vmul.f32 1.442695, %v1219_v55  ;;  %v1223_v30 = vmul.f32 1.442695, %v1222_v12  ;;  %v810_v32 = vadd.f32 %v4164_v57, %v807_v54  ;;  %v4172_v3 = vpop.eup %4171 }
 0x182   :  { %4065 = vmatmul.msk.f32.vlgmr.msra.gmra.mxu2 %vm2149_vm4, %v5542_v43  ;;  %v1226_v26 = vmul.f32 1.442695, %v1225_v33  ;;  %v5611_v16 = vadd.f32 %v5555_v61, %v5156_v49  ;;  %v1023_v17 = vadd.f32 %v1022_v58, %v1020_v40  ;;  %v1229_v37 = vmul.f32 1.442695, %v1228_v23  ;;  %v5628_v45 = vpop.eup %4173  ;;  %v1352_v23 = vpop.f32.mrf.mxu1 }
 0x183   :  { %4175 = vpow2.f32 %v1217_v24  ;;  %v813_v54 = vadd.f32 %v5607_v25, %v810_v32  ;;  %v1232_v36 = vmul.f32 1.442695, %v1231_v60  ;;  %v5619_v49 = vadd.f32 %v5555_v61, %v5186_v62 }
 0x184   :  { %4177 = vpow2.f32 %v1220_v53  ;;  %v1025_v14 = vmul.f32 %v4158_v38, %v5611_v16  ;;  %v5623_v19 = vadd.f32 %v5555_v61, %v5162_v50  ;;  %v808_v40 = vmul.f32 %v4160_v63, %v5611_v16 }
 0x185   :  { %4179 = vpow2.f32 %v1223_v30  ;;  %v1033_v0 = vadd.f32 %v4172_v3, %v1030_v44  ;;  %v1235_v58 = vmul.f32 1.442695, %v1234_v39  ;;  %v811_v33 = vmul.f32 %v4164_v57, %v5619_v49 }
 0x186   :  { %4181 = vpow2.f32 %v1226_v26  ;;  %v1026_v38 = vadd.f32 %v1025_v14, %v1023_v17  ;;  %v809_v12 = vadd.f32 %v808_v40, %v806_v10  ;;  %v5632_v50 = vadd.f32 %v1280_v6, %v5212_v1 }
 0x187   :  { %4183 = vpow2.f32 %v801_v41  ;;  %v816_v24 = vadd.f32 %v5613_v28, %v813_v54  ;;  %v1028_v53 = vmul.f32 %v5592_v47, %v5619_v49  ;;  %v5643_v26 = vadd.f32 %v1328_v9, %v5178_v51 }
 0x188   :  { %4059 = vmatmul.msk.f32.vlgmr.msra.gmra.mxu3 %vm2149_vm4, %v5496_v2  ;;  %4185 = vpow2.f32 %v1229_v37  ;;  %v1304_v55 = vpop.f32.mrf.mxu3  ;;  %v1036_v37 = vadd.f32 %v5628_v45, %v1033_v0  ;;  %v5649_v47 = vadd.f32 %v1352_v23, %v5269_v8 }
 0x189   :  { %v4176_v62 = vpop.eup %4175  ;;  %v5635_v63 = vadd.f32 %v1304_v55, %v5258_v5  ;;  %4187 = vpow2.f32 %v1232_v36  ;;  %v1029_v44 = vadd.f32 %v1028_v53, %v1026_v38  ;;  %v812_v55 = vadd.f32 %v811_v33, %v809_v12 }
 0x18a   :  { %v4178_v60 = vpop.eup %4177  ;;  %v1237_v39 = vmul.f32 %v4176_v62, %v5583_v46  ;;  %4189 = vpow2.f32 %v1235_v58  ;;  %v814_v12 = vmul.f32 %v5607_v25, %v5623_v19 }
 0x18b   :  { %v4180_v30 = vpop.eup %4179  ;;  %v1238_v32 = vadd.f32 %v4178_v60, %v4176_v62  ;;  %v1239_v57 = vmul.f32 %v4178_v60, %v5579_v21  ;;  %v1427_v41 = vmax.f32 %v5632_v50, %v5635_v63  ;;  %v1376_v6 = vpop.f32.mrf.mxu2  ;;  %v1031_v60 = vmul.f32 %v4168_v29, %v5623_v19 }
 0x18c   :  { %v4182_v17 = vpop.eup %4181  ;;  %v1242_v36 = vmul.f32 %v4180_v30, %v5611_v16  ;;  %v5655_v38 = vadd.f32 %v1376_v6, %v5348_v56  ;;  %4191 = vrcp.f32 %v1036_v37  ;;  %v5669_v6 = vadd.f32 %v5555_v61, %v5188_v52 }
 0x18d   :  { %v4184_v10 = vpop.eup %4183  ;;  %v1240_v54 = vadd.f32 %v1239_v57, %v1237_v39  ;;  %v1241_v14 = vadd.f32 %v4180_v30, %v1238_v32  ;;  %v1428_v40 = vmax.f32 %v1427_v41, %v5643_v26  ;;  %v1245_v23 = vmul.f32 %v4182_v17, %v5619_v49 }
 0x18e   :  { %v4186_v9 = vpop.eup %4185  ;;  %v819_v62 = vadd.f32 %v4184_v10, %v816_v24  ;;  %v5661_v30 = vadd.f32 %v5555_v61, %v5154_v48  ;;  %v1032_v33 = vadd.f32 %v1031_v60, %v1029_v44  ;;  %v1037_v52 = vmul.f32 %v5628_v45, %v5669_v6 }
 0x18f   :  { %v1243_v0 = vadd.f32 %v1242_v36, %v1240_v54  ;;  %v1244_v58 = vadd.f32 %v4182_v17, %v1241_v14  ;;  %v1429_v53 = vmax.f32 %v1428_v40, %v5649_v47  ;;  %v4188_v39 = vpop.eup %4187  ;;  %v1248_v32 = vmul.f32 %v4186_v9, %v5623_v19 }
 0x190   :  { %v4190_v41 = vpop.eup %4189  ;;  %v815_v17 = vadd.f32 %v814_v12, %v812_v55  ;;  %v1034_v48 = vmul.f32 %v4172_v3, %v5661_v30  ;;  %4193 = vrcp.f32 %v819_v62  ;;  %v1251_v25 = vmul.f32 %v4188_v39, %v5661_v30 }
 0x191   :  { %v1246_v29 = vadd.f32 %v1245_v23, %v1243_v0  ;;  %v1247_v24 = vadd.f32 %v4186_v9, %v1244_v58  ;;  %v1430_v57 = vmax.f32 %v1429_v53, %v5655_v38  ;;  %v817_v44 = vmul.f32 %v5613_v28, %v5661_v30  ;;  %v1424_v58 = vpop.f32.mrf.mxu0  ;;  %v1497_v28 = vpop.f32.mrf.mxu1 }
 0x192   :  { %v1035_v37 = vadd.f32 %v1034_v48, %v1032_v33  ;;  %v1254_v9 = vmul.f32 %v4190_v41, %v5669_v6  ;;  %v4192_v60 = vpop.eup %4191  ;;  %v820_v3 = vmul.f32 %v4184_v10, %v5669_v6  ;;  %v5682_v45 = vadd.f32 %v1497_v28, %v5212_v1 }
 0x193   :  { %v1249_v54 = vadd.f32 %v1248_v32, %v1246_v29  ;;  %v1250_v14 = vadd.f32 %v4188_v39, %v1247_v24  ;;  %v818_v0 = vadd.f32 %v817_v44, %v815_v17  ;;  %v1425_v32 = vadd.f32 %v1424_v58, %v5382_v35 }
 0x194   :  { %v1038_v55 = vadd.f32 %v1037_v52, %v1035_v37 }
 0x195   :  { %v1252_v36 = vadd.f32 %v1251_v25, %v1249_v54  ;;  %v1253_v40 = vadd.f32 %v4190_v41, %v1250_v14  ;;  %v821_v23 = vadd.f32 %v820_v3, %v818_v0 }
 0x196   :  { %v4194_v62 = vpop.eup %4193  ;;  %v1040_v53 = vmul.f32 %v4192_v60, %v1038_v55 }
 0x197   :  { %v1255_v61 = vadd.f32 %v1254_v9, %v1252_v36  ;;  %4195 = vrcp.f32 %v1253_v40  ;;  %v823_v33 = vmul.f32 %v4194_v62, %v821_v23 }
 0x199   :  { %v1041_v17 = vadd.f32 %v1040_v53, %v823_v33 }
 0x19a   :  { %v1400_v39 = vpop.f32.mrf.mxu3 }
 0x19b   :  { %v1401_v12 = vadd.f32 %v1400_v39, %v5328_v27 }
 0x19d   :  { %v1521_v29 = vpop.f32.mrf.mxu2  ;;  %v4196_v24 = vpop.eup %4195  ;;  %v1431_v41 = vmax.f32 %v1430_v57, %v1401_v12 }
 0x19e   :  { %v5685_v10 = vadd.f32 %v1521_v29, %v5258_v5  ;;  %v1257_v48 = vmul.f32 %v4196_v24, %v1255_v61 }
 0x19f   :  { %v1432_v54 = vmax.f32 %v1431_v41, %v1425_v32 }
 0x1a0   :  { %v1644_v14 = vmax.f32 %v5682_v45, %v5685_v10  ;;  %v5689_v25 = vadd.f32 %v1257_v48, %v1041_v17 }
 0x1a1   :  { %v1433_v44 = vsub.f32 %v5632_v50, %v1432_v54  ;;  %v1436_v37 = vsub.f32 %v5635_v63, %v1432_v54  ;;  %v1439_v36 = vsub.f32 %v5643_v26, %v1432_v54  ;;  %v1442_v40 = vsub.f32 %v5649_v47, %v1432_v54  ;;  %v1569_v50 = vpop.f32.mrf.mxu0  ;;  %v1593_v63 = vpop.f32.mrf.mxu1 }
 0x1a2   :  { %v1445_v57 = vsub.f32 %v5655_v38, %v1432_v54  ;;  %v1448_v9 = vsub.f32 %v1401_v12, %v1432_v54  ;;  %v1451_v60 = vsub.f32 %v1425_v32, %v1432_v54  ;;  %v5702_v29 = vadd.f32 %v1569_v50, %v5269_v8 }
 0x1a3   :  { %v1434_v0 = vmul.f32 1.442695, %v1433_v44  ;;  %v1437_v52 = vmul.f32 1.442695, %v1436_v37  ;;  %v1440_v61 = vmul.f32 1.442695, %v1439_v36  ;;  %v5707_v37 = vadd.f32 %v1593_v63, %v5348_v56 }
 0x1a4   :  { %v1443_v3 = vmul.f32 1.442695, %v1442_v40  ;;  %v1446_v55 = vmul.f32 1.442695, %v1445_v57  ;;  %v1449_v62 = vmul.f32 1.442695, %v1448_v9 }
 0x1a5   :  { %4197 = vpow2.f32 %v1434_v0  ;;  %v1452_v26 = vmul.f32 1.442695, %v1451_v60 }
 0x1a6   :  { %4199 = vpow2.f32 %v1437_v52 }
 0x1a7   :  { %4201 = vpow2.f32 %v1440_v61 }
 0x1a8   :  { %4203 = vpow2.f32 %v1443_v3 }
 0x1a9   :  { %4205 = vpow2.f32 %v1446_v55  ;;  %v2133_v55 = vld [vmem:[%s6717_s15] sm:$0x1f] }
 0x1aa   :  { %4207 = vpow2.f32 %v1449_v62  ;;  %4070 = vmatpush.msk.msrb.mxu1 %vm2153_vm3, %v2133_v55  ;;  %4068 = vmatpush.msk.msrb.mxu0 %vm2153_vm3, %v2133_v55 }
 0x1ab   :  { %v4198_v58 = vpop.eup %4197  ;;  %4209 = vpow2.f32 %v1452_v26  ;;  %4072 = vmatpush.msk.msrb.mxu2 %vm2153_vm3, %v2133_v55  ;;  %4071 = vmatmul.msk.f32.vlgmr.msrb.gmra.mxu1 %vm2149_vm4, %v5496_v2 }
 0x1ac   :  { %v4200_v47 = vpop.eup %4199  ;;  %v1454_v38 = vmul.f32 %v4198_v58, %v5583_v46  ;;  %v1545_v23 = vpop.f32.mrf.mxu3  ;;  %2561 = vmatpush.msra.mxu1 %v5241_v11  ;;  %4076 = vmatpush.msk.msra.mxu0 %vm2153_vm3, %v2133_v55 }
 0x1ad   :  { %v4202_v53 = vpop.eup %4201  ;;  %v1455_v28 = vadd.f32 %v4200_v47, %v4198_v58  ;;  %v1456_v39 = vmul.f32 %v4200_v47, %v5579_v21  ;;  %v5699_v12 = vadd.f32 %v1545_v23, %v5178_v51  ;;  %4069 = vmatmul.msk.f32.vlgmr.msrb.gmra.mxu0 %vm2149_vm4, %v5537_v4  ;;  %2589 = vmatpush.msra.mxu2 %v5241_v11 }
 0x1ae   :  { %v4204_v33 = vpop.eup %4203  ;;  %v1459_v17 = vmul.f32 %v4202_v53, %v5611_v16  ;;  %2562 = vmatpush.msra.mxu1 %v5254_v13  ;;  %2645 = vmatpush.msrb.mxu0 %v5241_v11 }
 0x1af   :  { %v4206_v24 = vpop.eup %4205  ;;  %v1457_v32 = vadd.f32 %v1456_v39, %v1454_v38  ;;  %v1458_v41 = vadd.f32 %v4202_v53, %v1455_v28  ;;  %v1645_v48 = vmax.f32 %v1644_v14, %v5699_v12  ;;  %v1617_v54 = vpop.f32.mrf.mxu2  ;;  %v1462_v0 = vmul.f32 %v4204_v33, %v5619_v49  ;;  %4066 = vmatpush.msk.msrb.mxu3 %vm2153_vm3, %v2133_v55 }
 0x1b0   :  { %v1714_v44 = vpop.f32.mrf.mxu0  ;;  %v1738_v40 = vpop.f32.mrf.mxu1  ;;  %v1465_v61 = vmul.f32 %v4206_v24, %v5623_v19  ;;  %v5716_v14 = vadd.f32 %v1617_v54, %v5328_v27  ;;  %2563 = vmatpush.msra.mxu1 %v5265_v7  ;;  %2590 = vmatpush.msra.mxu2 %v5254_v13 }
 0x1b1   :  { %v5710_v36 = vadd.f32 %v1714_v44, %v5212_v1  ;;  %v4208_v57 = vpop.eup %4207  ;;  %v1460_v9 = vadd.f32 %v1459_v17, %v1457_v32  ;;  %v1461_v60 = vadd.f32 %v4204_v33, %v1458_v41  ;;  %v1646_v52 = vmax.f32 %v1645_v48, %v5702_v29  ;;  %2646 = vmatpush.msrb.mxu0 %v5254_v13 }
 0x1b2   :  { %v5719_v3 = vadd.f32 %v1738_v40, %v5258_v5  ;;  %v4210_v26 = vpop.eup %4209  ;;  %v1468_v58 = vmul.f32 %v4208_v57, %v5661_v30  ;;  %2564 = vmatpush.msra.mxu1 %v5279_v18  ;;  %4074 = vmatpush.msk.msra.mxu3 %vm2153_vm3, %v2133_v55 }
 0x1b3   :  { %v1463_v62 = vadd.f32 %v1462_v0, %v1460_v9  ;;  %v1464_v50 = vadd.f32 %v4206_v24, %v1461_v60  ;;  %v1647_v63 = vmax.f32 %v1646_v52, %v5707_v37  ;;  %v1471_v33 = vmul.f32 %v4210_v26, %v5669_v6  ;;  %2591 = vmatpush.msra.mxu2 %v5265_v7 }
 0x1b4   :  { %v1861_v47 = vmax.f32 %v5710_v36, %v5719_v3  ;;  %2647 = vmatpush.msrb.mxu0 %v5265_v7  ;;  %2565 = vmatpush.msra.mxu1 %v5300_v22 }
 0x1b5   :  { %v1466_v38 = vadd.f32 %v1465_v61, %v1463_v62  ;;  %v1467_v23 = vadd.f32 %v4208_v57, %v1464_v50  ;;  %v1648_v53 = vmax.f32 %v1647_v63, %v5716_v14  ;;  %4067 = vmatmul.msk.f32.vlgmr.msrb.gmra.mxu3 %vm2149_vm4, %v5451_v20  ;;  %2592 = vmatpush.msra.mxu2 %v5279_v18 }
 0x1b6   :  { %2648 = vmatpush.msrb.mxu0 %v5279_v18  ;;  %2566 = vmatpush.msra.mxu1 %v5324_v31 }
 0x1b7   :  { %v1469_v28 = vadd.f32 %v1468_v58, %v1466_v38  ;;  %v1470_v39 = vadd.f32 %v4210_v26, %v1467_v23  ;;  %2617 = vmatpush.msrb.mxu3 %v5241_v11  ;;  %2593 = vmatpush.msra.mxu2 %v5300_v22 }
 0x1b8   :  { %2649 = vmatpush.msrb.mxu0 %v5300_v22  ;;  %2567 = vmatpush.msra.mxu1 %v5337_v42 }
 0x1b9   :  { %v1472_v2 = vadd.f32 %v1471_v33, %v1469_v28  ;;  %4211 = vrcp.f32 %v1470_v39  ;;  %4073 = vmatmul.msk.f32.vlgmr.msrb.gmra.mxu2 %vm2149_vm4, %v5510_v34  ;;  %4077 = vmatmul.msk.f32.vlgmr.msra.gmra.mxu0 %vm2149_vm4, %v5542_v43 }
 0x1ba   :  { %2594 = vmatpush.msra.mxu2 %v5324_v31  ;;  %2650 = vmatpush.msrb.mxu0 %v5324_v31 }
 0x1bb   :  { %2568 = vmatpush.msra.mxu1 %v5353_v59  ;;  %2618 = vmatpush.msrb.mxu3 %v5254_v13 }
 0x1bc   :  { %2595 = vmatpush.msra.mxu2 %v5337_v42  ;;  %2651 = vmatpush.msrb.mxu0 %v5337_v42 }
 0x1bd   :  { %2673 = vmatpush.msrb.mxu1 %v5241_v11  ;;  %2619 = vmatpush.msrb.mxu3 %v5265_v7 }
 0x1be   :  { %v1641_v4 = vpop.f32.mrf.mxu3  ;;  %2596 = vmatpush.msra.mxu2 %v5353_v59  ;;  %2652 = vmatpush.msrb.mxu0 %v5353_v59 }
 0x1bf   :  { %v4212_v24 = vpop.eup %4211  ;;  %v1642_v32 = vadd.f32 %v1641_v4, %v5382_v35  ;;  %2674 = vmatpush.msrb.mxu1 %v5254_v13  ;;  %2620 = vmatpush.msrb.mxu3 %v5279_v18 }
 0x1c0   :  { %v1474_v41 = vmul.f32 %v4212_v24, %v1472_v2  ;;  %2701 = vmatpush.msrb.mxu2 %v5241_v11  ;;  %2791 = vmatpush.msra.mxu0 %v5241_v11 }
 0x1c1   :  { %v1762_v17 = vpop.f32.mrf.mxu2  ;;  %v1649_v20 = vmax.f32 %v1648_v53, %v1642_v32  ;;  %2675 = vmatpush.msrb.mxu1 %v5265_v7  ;;  %2621 = vmatpush.msrb.mxu3 %v5300_v22 }
 0x1c2   :  { %v5764_v48 = vadd.f32 %v1762_v17, %v5178_v51  ;;  %v5769_v54 = vadd.f32 %v1474_v41, %v5689_v25  ;;  %2702 = vmatpush.msrb.mxu2 %v5254_v13  ;;  %2792 = vmatpush.msra.mxu0 %v5254_v13  ;;  %v1810_v50 = vpop.f32.mrf.mxu0 }
 0x1c3   :  { %v1650_v44 = vsub.f32 %v5682_v45, %v1649_v20  ;;  %v1653_v34 = vsub.f32 %v5685_v10, %v1649_v20  ;;  %v1656_v40 = vsub.f32 %v5699_v12, %v1649_v20  ;;  %v1659_v57 = vsub.f32 %v5702_v29, %v1649_v20  ;;  %2676 = vmatpush.msrb.mxu1 %v5279_v18 }
 0x1c4   :  { %v1662_v9 = vsub.f32 %v5707_v37, %v1649_v20  ;;  %v1665_v25 = vsub.f32 %v5716_v14, %v1649_v20  ;;  %v1668_v60 = vsub.f32 %v1642_v32, %v1649_v20  ;;  %v5782_v0 = vmax.f32 %v1861_v47, %v5764_v48  ;;  %2703 = vmatpush.msrb.mxu2 %v5265_v7  ;;  %v1834_v47 = vpop.f32.mrf.mxu1 }
 0x1c5   :  { %v1651_v43 = vmul.f32 1.442695, %v1650_v44  ;;  %v1654_v45 = vmul.f32 1.442695, %v1653_v34  ;;  %v1657_v52 = vmul.f32 1.442695, %v1656_v40  ;;  %2677 = vmatpush.msrb.mxu1 %v5300_v22  ;;  %2793 = vmatpush.msra.mxu0 %v5265_v7  ;;  %v1811_v53 = vadd.f32 %v1810_v50, %v5348_v56 }
 0x1c6   :  { %v1660_v10 = vmul.f32 1.442695, %v1659_v57  ;;  %v1663_v12 = vmul.f32 1.442695, %v1662_v9  ;;  %v1666_v29 = vmul.f32 1.442695, %v1665_v25  ;;  %2704 = vmatpush.msrb.mxu2 %v5279_v18  ;;  %2622 = vmatpush.msrb.mxu3 %v5324_v31  ;;  %v1835_v24 = vadd.f32 %v1834_v47, %v5328_v27 }
 0x1c7   :  { %4213 = vpow2.f32 %v1651_v43  ;;  %v1669_v37 = vmul.f32 1.442695, %v1668_v60  ;;  %2678 = vmatpush.msrb.mxu1 %v5324_v31  ;;  %2794 = vmatpush.msra.mxu0 %v5279_v18  ;;  %v5833_v25 = vld [vmem:[%s6755_s7 + $0x38] sm:$0xff] }
 0x1c8   :  { %4215 = vpow2.f32 %v1654_v45  ;;  %2705 = vmatpush.msrb.mxu2 %v5300_v22  ;;  %2623 = vmatpush.msrb.mxu3 %v5337_v42 }
 0x1c9   :  { %4217 = vpow2.f32 %v1657_v52  ;;  %2679 = vmatpush.msrb.mxu1 %v5337_v42  ;;  %2795 = vmatpush.msra.mxu0 %v5300_v22 }
 0x1ca   :  { %4219 = vpow2.f32 %v1660_v10  ;;  %2706 = vmatpush.msrb.mxu2 %v5324_v31  ;;  %2624 = vmatpush.msrb.mxu3 %v5353_v59 }
 0x1cb   :  { %4221 = vpow2.f32 %v1663_v12  ;;  %2680 = vmatpush.msrb.mxu1 %v5353_v59  ;;  %2796 = vmatpush.msra.mxu0 %v5324_v31 }
 0x1cc   :  { %4223 = vpow2.f32 %v1666_v29  ;;  %2707 = vmatpush.msrb.mxu2 %v5337_v42  ;;  %4075 = vmatmul.msk.f32.vlgmr.msra.gmra.mxu3 %vm2149_vm4, %v5549_v15  ;;  %v5841_v15 = vld [vmem:[%s6755_s7 + $0x30] sm:$0xff] }
 0x1cd   :  { %v4214_v11 = vpop.eup %4213  ;;  %4225 = vpow2.f32 %v1669_v37  ;;  %2797 = vmatpush.msra.mxu0 %v5337_v42  ;;  %2767 = vmatpush.msra.mxu3 %v5833_v25 }
 0x1ce   :  { %v4216_v61 = vpop.eup %4215  ;;  %v1671_v14 = vmul.f32 %v4214_v11, %v5583_v46  ;;  %2708 = vmatpush.msrb.mxu2 %v5353_v59 }
 0x1cf   :  { %v4218_v13 = vpop.eup %4217  ;;  %v1672_v55 = vadd.f32 %v4216_v61, %v4214_v11  ;;  %v1673_v62 = vmul.f32 %v4216_v61, %v5579_v21  ;;  %2798 = vmatpush.msra.mxu0 %v5353_v59  ;;  %2768 = vmatpush.msra.mxu3 %v5841_v15  ;;  %v5849_v59 = vld [vmem:[%s6755_s7 + $0x28] sm:$0xff] }
 0x1d0   :  { %v4220_v7 = vpop.eup %4219  ;;  %v1786_v63 = vpop.f32.mrf.mxu3  ;;  %v1676_v18 = vmul.f32 %v4218_v13, %v5611_v16 }
 0x1d1   :  { %v1674_v26 = vadd.f32 %v1673_v62, %v1671_v14  ;;  %v1675_v58 = vadd.f32 %v4218_v13, %v1672_v55  ;;  %v1787_v38 = vadd.f32 %v1786_v63, %v5269_v8  ;;  %v4222_v23 = vpop.eup %4221  ;;  %v1679_v22 = vmul.f32 %v4220_v7, %v5619_v49  ;;  %2769 = vmatpush.msra.mxu3 %v5849_v59 }
 0x1d2   :  { %v4224_v28 = vpop.eup %4223  ;;  %v1682_v17 = vmul.f32 %v4222_v23, %v5623_v19 }
 0x1d3   :  { %v1677_v39 = vadd.f32 %v1676_v18, %v1674_v26  ;;  %v1678_v33 = vadd.f32 %v4220_v7, %v1675_v58  ;;  %v1863_v2 = vmax.f32 %v5782_v0, %v1787_v38  ;;  %v1858_v4 = vpop.f32.mrf.mxu2  ;;  %v4226_v44 = vpop.eup %4225  ;;  %v1685_v34 = vmul.f32 %v4224_v28, %v5661_v30  ;;  %v5868_v26 = vld [vmem:[%s6755_s7 + $0x10] sm:$0xff] }
 0x1d4   :  { %v1859_v40 = vadd.f32 %v1858_v4, %v5382_v35  ;;  %v1688_v0 = vmul.f32 %v4226_v44, %v5669_v6  ;;  %v1955_v61 = vpop.f32.mrf.mxu0  ;;  %v1979_v62 = vpop.f32.mrf.mxu1 }
 0x1d5   :  { %v1680_v32 = vadd.f32 %v1679_v22, %v1677_v39  ;;  %v1681_v41 = vadd.f32 %v4222_v23, %v1678_v33  ;;  %v1864_v20 = vmax.f32 %v1863_v2, %v1811_v53 }
 0x1d7   :  { %v1683_v31 = vadd.f32 %v1682_v17, %v1680_v32  ;;  %v1684_v57 = vadd.f32 %v4224_v28, %v1681_v41  ;;  %v1865_v9 = vmax.f32 %v1864_v20, %v1835_v24 }
 0x1d9   :  { %v1686_v42 = vadd.f32 %v1685_v34, %v1683_v31  ;;  %v1687_v60 = vadd.f32 %v4226_v44, %v1684_v57  ;;  %v1866_v43 = vmax.f32 %v1865_v9, %v1859_v40 }
 0x1db   :  { %v1689_v45 = vadd.f32 %v1688_v0, %v1686_v42  ;;  %4227 = vrcp.f32 %v1687_v60  ;;  %v1867_v52 = vsub.f32 %v5710_v36, %v1866_v43  ;;  %v1870_v10 = vsub.f32 %v5719_v3, %v1866_v43  ;;  %v5856_v36 = vld [vmem:[%s6755_s7 + $0x20] sm:$0xff] }
 0x1dc   :  { %v1873_v12 = vsub.f32 %v5764_v48, %v1866_v43  ;;  %v1876_v29 = vsub.f32 %v1787_v38, %v1866_v43  ;;  %v1879_v37 = vsub.f32 %v1811_v53, %v1866_v43  ;;  %v1882_v11 = vsub.f32 %v1835_v24, %v1866_v43  ;;  %2770 = vmatpush.msra.mxu3 %v5856_v36  ;;  %v5862_v48 = vld [vmem:[%s6755_s7 + $0x18] sm:$0xff]  ;;  %v5880_v53 = vld [vmem:[%s6755_s7 + $0x8] sm:$0xff]  ;;  %v5894_v24 = vld [vmem:[%s6755_s7] sm:$0xff] }
 0x1dd   :  { %v1868_v14 = vmul.f32 1.442695, %v1867_v52  ;;  %v1871_v13 = vmul.f32 1.442695, %v1870_v10  ;;  %v1885_v55 = vsub.f32 %v1859_v40, %v1866_v43  ;;  %v5872_v38 = vadd.f32 %v1955_v61, %v5258_v5  ;;  %v5908_v42 = vld [vmem:[%s6715_s12] ss:$0 sm:$0xff] }
 0x1de   :  { %v1874_v3 = vmul.f32 1.442695, %v1873_v12  ;;  %v1877_v50 = vmul.f32 1.442695, %v1876_v29  ;;  %2771 = vmatpush.msra.mxu3 %v5862_v48  ;;  %v1880_v7 = vmul.f32 1.442695, %v1879_v37  ;;  %v5887_v5 = vadd.f32 %v1979_v62, %v5178_v51 }
 0x1df   :  { %4229 = vpow2.f32 %v1868_v14  ;;  %v1883_v18 = vmul.f32 1.442695, %v1882_v11  ;;  %v1886_v39 = vmul.f32 1.442695, %v1885_v55 }
 0x1e0   :  { %4231 = vpow2.f32 %v1871_v13  ;;  %2772 = vmatpush.msra.mxu3 %v5868_v26 }
 0x1e1   :  { %v4228_v63 = vpop.eup %4227  ;;  %4233 = vpow2.f32 %v1874_v3 }
 0x1e2   :  { %v1691_v58 = vmul.f32 %v4228_v63, %v1689_v45  ;;  %4235 = vpow2.f32 %v1877_v50  ;;  %v1931_v47 = vpop.f32.mrf.mxu3  ;;  %2773 = vmatpush.msra.mxu3 %v5880_v53 }
 0x1e3   :  { %v5875_v23 = vadd.f32 %v1931_v47, %v5212_v1  ;;  %4237 = vpow2.f32 %v1880_v7 }
 0x1e4   :  { %v5884_v28 = vadd.f32 %v1691_v58, %v5769_v54  ;;  %2774 = vmatpush.msra.mxu3 %v5894_v24  ;;  %4239 = vpow2.f32 %v1883_v18 }
 0x1e5   :  { %v2003_v33 = vpop.f32.mrf.mxu2  ;;  %v2051_v22 = vpop.f32.mrf.mxu0  ;;  %v2078_v1 = vmax.f32 %v5875_v23, %v5872_v38  ;;  %4241 = vpow2.f32 %v1886_v39 }
 0x1e6   :  { %v4230_v2 = vpop.eup %4229  ;;  %v2075_v4 = vpop.f32.mrf.mxu1  ;;  %v5900_v20 = vadd.f32 %v2003_v33, %v5269_v8  ;;  %v5913_v8 = vld [vmem:[%s6716_s14] ss:$0 sm:$0xff] }
 0x1e7   :  { %v4232_v54 = vpop.eup %4231  ;;  %v1888_v32 = vmul.f32 %v4230_v2, %v5583_v46  ;;  %v2079_v44 = vmax.f32 %v2078_v1, %v5887_v5 }
 0x1e8   :  { %v4234_v41 = vpop.eup %4233  ;;  %v1889_v17 = vadd.f32 %v4232_v54, %v4230_v2  ;;  %v1890_v51 = vmul.f32 %v4232_v54, %v5579_v21  ;;  %v2052_v54 = vadd.f32 %v2051_v22, %v5328_v27 }
 0x1e9   :  { %v4236_v34 = vpop.eup %4235  ;;  %v1893_v57 = vmul.f32 %v4234_v41, %v5611_v16  ;;  %v2080_v9 = vmax.f32 %v2079_v44, %v5900_v20 }
 0x1ea   :  { %v1891_v40 = vadd.f32 %v1890_v51, %v1888_v32  ;;  %v1892_v31 = vadd.f32 %v4234_v41, %v1889_v17  ;;  %v4238_v60 = vpop.eup %4237  ;;  %v1896_v45 = vmul.f32 %v4236_v34, %v5619_v49 }
 0x1eb   :  { %v4240_v52 = vpop.eup %4239  ;;  %v1899_v11 = vmul.f32 %v4238_v60, %v5623_v19 }
 0x1ec   :  { %v1894_v0 = vadd.f32 %v1893_v57, %v1891_v40  ;;  %v1895_v43 = vadd.f32 %v4236_v34, %v1892_v31  ;;  %v4242_v13 = vpop.eup %4241  ;;  %v1902_v50 = vmul.f32 %v4240_v52, %v5661_v30 }
 0x1ed   :  { %v2174_v10 = vpop.f32.mrf.mxu2  ;;  %v5916_v12 = vpop.f32.mrf.mxu0  ;;  %v1905_v18 = vmul.f32 %v4242_v13, %v5669_v6 }
 0x1ee   :  { %v1897_v29 = vadd.f32 %v1896_v45, %v1894_v0  ;;  %v1898_v37 = vadd.f32 %v4238_v60, %v1895_v43  ;;  %v5920_v61 = vadd.f32 %v5908_v42, %v2174_v10  ;;  %v2315_v14 = vpop.f32.mrf.mxu1 }
 0x1ef   :  { %v5923_v55 = vadd.f32 %v5913_v8, %v2315_v14 }
 0x1f0   :  { %v1900_v62 = vadd.f32 %v1899_v11, %v1897_v29  ;;  %v1901_v3 = vadd.f32 %v4240_v52, %v1898_v37 }
 0x1f1   :  { %v2544_v7 = vmul.f32 %v5923_v55, %v5920_v61 }
 0x1f2   :  { %v1903_v63 = vadd.f32 %v1902_v50, %v1900_v62  ;;  %v1904_v58 = vadd.f32 %v4242_v13, %v1901_v3  ;;  %v2027_v47 = vpop.f32.mrf.mxu3 }
 0x1f3   :  { %4078 = vmatmul.msk.f32.vlgmr.msra.gmra.mxu1 %vm584_vm2, %v2544_v7  ;;  %v2028_v33 = vadd.f32 %v2027_v47, %v5348_v56  ;;  %v2076_v56 = vadd.f32 %v2075_v4, %v5382_v35 }
 0x1f4   :  { %v1906_v39 = vadd.f32 %v1905_v18, %v1903_v63  ;;  %4243 = vrcp.f32 %v1904_v58  ;;  %2815 = vmatpush.msra.mxu1 %v5833_v25 }
 0x1f5   :  { %v2243_v2 = vpop.f32.mrf.mxu2  ;;  %v2289_v1 = vpop.f32.mrf.mxu0  ;;  %v2081_v32 = vmax.f32 %v2080_v9, %v2028_v33 }
 0x1f6   :  { %2816 = vmatpush.msra.mxu1 %v5841_v15  ;;  %v5935_v41 = vadd.f32 %v5908_v42, %v2243_v2  ;;  %v5938_v17 = vadd.f32 %v5908_v42, %v2289_v1  ;;  %v2395_v51 = vpop.f32.mrf.mxu1 }
 0x1f7   :  { %v5941_v44 = vadd.f32 %v5913_v8, %v2395_v51  ;;  %v2082_v34 = vmax.f32 %v2081_v32, %v2052_v54 }
 0x1f8   :  { %2817 = vmatpush.msra.mxu1 %v5849_v59  ;;  %v5947_v27 = vmul.f32 %v5923_v55, %v5935_v41  ;;  %v5997_v47 = vmul.f32 %v5923_v55, %v5938_v17 }
 0x1f9   :  { %v2657_v22 = vmul.f32 %v5941_v44, %v5920_v61  ;;  %v5953_v40 = vmul.f32 %v5941_v44, %v5935_v41  ;;  %v2083_v57 = vmax.f32 %v2082_v34, %v2076_v56  ;;  %v6007_v1 = vmul.f32 %v5941_v44, %v5938_v17 }
 0x1fa   :  { %v4244_v31 = vpop.eup %4243  ;;  %2818 = vmatpush.msra.mxu1 %v5856_v36 }
 0x1fb   :  { %v1908_v9 = vmul.f32 %v4244_v31, %v1906_v39  ;;  %v5956_v35 = vpop.f32.mrf.mxu3  ;;  %4082 = vmatmul.msk.f32.vlgmr.msrb.gmra.mxu1 %vm584_vm2, %v2657_v22  ;;  %v2084_v4 = vsub.f32 %v5875_v23, %v2083_v57  ;;  %v2087_v60 = vsub.f32 %v5872_v38, %v2083_v57  ;;  %v2090_v0 = vsub.f32 %v5887_v5, %v2083_v57 }
 0x1fc   :  { %v2093_v43 = vsub.f32 %v5900_v20, %v2083_v57  ;;  %2819 = vmatpush.msra.mxu1 %v5862_v48  ;;  %v2096_v52 = vsub.f32 %v2028_v33, %v2083_v57  ;;  %v2099_v10 = vsub.f32 %v2052_v54, %v2083_v57  ;;  %v2102_v29 = vsub.f32 %v2076_v56, %v2083_v57 }
 0x1fd   :  { %v5965_v45 = vadd.f32 %v1908_v9, %v5884_v28  ;;  %v2335_v37 = vpop.f32.mrf.mxu2  ;;  %v2375_v11 = vpop.f32.mrf.mxu0  ;;  %v2085_v14 = vmul.f32 1.442695, %v2084_v4  ;;  %v2088_v13 = vmul.f32 1.442695, %v2087_v60  ;;  %v2091_v62 = vmul.f32 1.442695, %v2090_v0 }
 0x1fe   :  { %2820 = vmatpush.msra.mxu1 %v5868_v26  ;;  %v2094_v38 = vmul.f32 1.442695, %v2093_v43  ;;  %v5969_v23 = vadd.f32 %v5913_v8, %v2335_v37  ;;  %v2097_v5 = vmul.f32 1.442695, %v2096_v52  ;;  %v5972_v20 = vadd.f32 %v5913_v8, %v2375_v11 }
 0x1ff   :  { %4245 = vpow2.f32 %v2085_v14  ;;  %v2100_v3 = vmul.f32 1.442695, %v2099_v10  ;;  %v2103_v39 = vmul.f32 1.442695, %v2102_v29  ;;  %v6038_v43 = vadd.f32 %v5908_v42, %v5956_v35 }
 0x200   :  { %2821 = vmatpush.msra.mxu1 %v5880_v53  ;;  %4247 = vpow2.f32 %v2088_v13  ;;  %v2573_v28 = vmul.f32 %v5969_v23, %v5920_v61  ;;  %v2629_v50 = vmul.f32 %v5972_v20, %v5920_v61  ;;  %v5984_v63 = vmul.f32 %v5972_v20, %v5935_v41 }
 0x201   :  { %4249 = vpow2.f32 %v2091_v62  ;;  %v5993_v18 = vmul.f32 %v5969_v23, %v5938_v17  ;;  %v6003_v2 = vmul.f32 %v5972_v20, %v5938_v17  ;;  %v2779_v14 = vmul.f32 %v5969_v23, %v6038_v43 }
 0x202   :  { %2822 = vmatpush.msra.mxu1 %v5894_v24  ;;  %4251 = vpow2.f32 %v2094_v38  ;;  %4079 = vmatmul.msk.f32.vlgmr.msra.gmra.mxu2 %vm584_vm2, %v2573_v28 }
 0x203   :  { %v2266_v7 = vpop.f32.mrf.mxu3  ;;  %4253 = vpow2.f32 %v2097_v5  ;;  %4081 = vmatmul.msk.f32.vlgmr.msrb.gmra.mxu0 %vm584_vm2, %v2629_v50  ;;  %2839 = vmatpush.msra.mxu2 %v5833_v25 }
 0x204   :  { %2953 = vmatpush.msrb.mxu1 %v5833_v25  ;;  %v5987_v58 = vadd.f32 %v5908_v42, %v2266_v7  ;;  %2887 = vmatpush.msrb.mxu0 %v5833_v25  ;;  %4255 = vpow2.f32 %v2100_v3 }
 0x205   :  { %v2415_v33 = vpop.f32.mrf.mxu2  ;;  %v4246_v54 = vpop.eup %4245  ;;  %2840 = vmatpush.msra.mxu2 %v5841_v15  ;;  %4257 = vpow2.f32 %v2103_v39 }
 0x206   :  { %2954 = vmatpush.msrb.mxu1 %v5841_v15  ;;  %v6011_v32 = vadd.f32 %v5913_v8, %v2415_v33  ;;  %v6015_v51 = vmul.f32 %v5923_v55, %v5987_v58  ;;  %v6019_v56 = vmul.f32 %v5941_v44, %v5987_v58  ;;  %v4248_v34 = vpop.eup %4247  ;;  %v2105_v22 = vmul.f32 %v4246_v54, %v5583_v46 }
 0x207   :  { %2888 = vmatpush.msrb.mxu0 %v5841_v15  ;;  %v6026_v31 = vmul.f32 %v5969_v23, %v5987_v58  ;;  %v6030_v57 = vmul.f32 %v5972_v20, %v5987_v58  ;;  %v4250_v9 = vpop.eup %4249  ;;  %v2106_v4 = vadd.f32 %v4248_v34, %v4246_v54  ;;  %v2107_v60 = vmul.f32 %v4248_v34, %v5579_v21 }
 0x208   :  { %2955 = vmatpush.msrb.mxu1 %v5849_v59  ;;  %2841 = vmatpush.msra.mxu2 %v5849_v59  ;;  %v2685_v46 = vmul.f32 %v6011_v32, %v5920_v61  ;;  %v4252_v0 = vpop.eup %4251  ;;  %v6044_v52 = vmul.f32 %v6011_v32, %v5935_v41  ;;  %v2110_v37 = vmul.f32 %v4250_v9, %v5611_v16 }
 0x209   :  { %2889 = vmatpush.msrb.mxu0 %v5849_v59  ;;  %v4254_v21 = vpop.eup %4253  ;;  %v2108_v10 = vadd.f32 %v2107_v60, %v2105_v22  ;;  %v2109_v29 = vadd.f32 %v4250_v9, %v2106_v4  ;;  %v6050_v11 = vmul.f32 %v6011_v32, %v5987_v58  ;;  %v6058_v13 = vmul.f32 %v6011_v32, %v5938_v17 }
 0x20a   :  { %2956 = vmatpush.msrb.mxu1 %v5856_v36  ;;  %2842 = vmatpush.msra.mxu2 %v5856_v36  ;;  %v4256_v62 = vpop.eup %4255  ;;  %v2113_v5 = vmul.f32 %v4252_v0, %v5619_v49  ;;  %v2116_v3 = vmul.f32 %v4254_v21, %v5623_v19  ;;  %v6105_v4 = vadd.f32 %v5908_v42, %v5916_v12 }
 0x20b   :  { %2890 = vmatpush.msrb.mxu0 %v5856_v36  ;;  %v2355_v35 = vpop.f32.mrf.mxu3  ;;  %v2111_v16 = vadd.f32 %v2110_v37, %v2108_v10  ;;  %v2112_v38 = vadd.f32 %v4252_v0, %v2109_v29  ;;  %4083 = vmatmul.msk.f32.vlgmr.msrb.gmra.mxu2 %vm584_vm2, %v2685_v46  ;;  %v4258_v39 = vpop.eup %4257  ;;  %v2755_v42 = vmul.f32 %v5923_v55, %v6038_v43  ;;  %v3686_v37 = vld [vmem:[%s6721_s0] sm:$0xff] }
 0x20c   :  { %2957 = vmatpush.msrb.mxu1 %v5862_v48  ;;  %v6062_v28 = vadd.f32 %v5913_v8, %v2355_v35  ;;  %4085 = vmatmul.msk.f32.vlgmr.msra.gmra.mxu0 %vm584_vm2, %v2779_v14  ;;  %v2119_v8 = vmul.f32 %v4256_v62, %v5661_v30  ;;  %v2122_v9 = vmul.f32 %v4258_v39, %v5669_v6  ;;  %v6768_v14 = vld [vmem:[#allocation2_spill] sm:$0xff] }
 0x20d   :  { %2843 = vmatpush.msra.mxu2 %v5862_v48  ;;  %v2114_v50 = vadd.f32 %v2113_v5, %v2111_v16  ;;  %v2115_v7 = vadd.f32 %v4254_v21, %v2112_v38  ;;  %2891 = vmatpush.msrb.mxu0 %v5862_v48  ;;  %v2827_v6 = vmul.f32 %v5972_v20, %v6038_v43 }
 0x20e   :  { %2958 = vmatpush.msrb.mxu1 %v5868_v26  ;;  %v2601_v49 = vmul.f32 %v6062_v28, %v5920_v61  ;;  %v2803_v19 = vmul.f32 %v6062_v28, %v6038_v43  ;;  %v6078_v33 = vmul.f32 %v6062_v28, %v5987_v58  ;;  %v6084_v61 = vmul.f32 %v6062_v28, %v5938_v17 }
 0x20f   :  { %2844 = vmatpush.msra.mxu2 %v5868_v26  ;;  %v2117_v54 = vadd.f32 %v2116_v3, %v2114_v50  ;;  %v2118_v34 = vadd.f32 %v4256_v62, %v2115_v7  ;;  %2892 = vmatpush.msrb.mxu0 %v5868_v26  ;;  %v2875_v17 = vmul.f32 %v6011_v32, %v6038_v43  ;;  %v6409_v62 = vpop.permute.xlu0 %2631 }
 0x210   :  { %2959 = vmatpush.msrb.mxu1 %v5880_v53  ;;  %4080 = vmatmul.msk.f32.vlgmr.msrb.gmra.mxu3 %vm584_vm2, %v2601_v49  ;;  %v2941_v46 = vmul.f32 %v5923_v55, %v6105_v4  ;;  %v2851_v55 = vmul.f32 %v5941_v44, %v6038_v43  ;;  %v2965_v21 = vmul.f32 %v5969_v23, %v6105_v4 }
 0x211   :  { %2845 = vmatpush.msra.mxu2 %v5880_v53  ;;  %v2120_v30 = vadd.f32 %v2119_v8, %v2117_v54  ;;  %v2121_v22 = vadd.f32 %v4258_v39, %v2118_v34  ;;  %2893 = vmatpush.msrb.mxu0 %v5880_v53  ;;  %v3013_v43 = vmul.f32 %v5972_v20, %v6105_v4 }
 0x212   :  { %4086 = vmatmul.msk.f32.vlgmr.msra.gmra.mxu1 %vm584_vm2, %v2803_v19  ;;  %2863 = vmatpush.msrb.mxu3 %v5833_v25  ;;  %v3175_v20 = vmul.f32 %v6062_v28, %v5935_v41  ;;  %v3061_v10 = vmul.f32 %v6011_v32, %v6105_v4  ;;  %v3151_v29 = vmul.f32 %v5969_v23, %v5935_v41  ;;  %v3695_v41 = vld [vmem:[%s6719_s19 + $0x38] sm:$0xff]  ;;  %v3692_v23 = vld [vmem:[%s6719_s19 + $0x20] sm:$0xff]  ;;  %v3689_v32 = vld [vmem:[%s6719_s19 + $0x8] sm:$0xff] }
 0x213   :  { %2960 = vmatpush.msrb.mxu1 %v5894_v24  ;;  %v2123_v58 = vadd.f32 %v2122_v9, %v2120_v30  ;;  %4259 = vrcp.f32 %v2121_v22  ;;  %2846 = vmatpush.msra.mxu2 %v5894_v24 }
 0x214   :  { %2894 = vmatpush.msrb.mxu0 %v5894_v24  ;;  %2864 = vmatpush.msrb.mxu3 %v5841_v15 }
 0x215   :  { %3049 = vmatpush.msra.mxu1 %v5833_v25  ;;  %2977 = vmatpush.msrb.mxu2 %v5833_v25 }
 0x216   :  { %3025 = vmatpush.msra.mxu0 %v5833_v25  ;;  %4087 = vmatmul.msk.f32.vlgmr.msra.gmra.mxu2 %vm584_vm2, %v2827_v6 }
 0x217   :  { %4089 = vmatmul.msk.f32.vlgmr.msrb.gmra.mxu0 %vm584_vm2, %v2875_v17  ;;  %3050 = vmatpush.msra.mxu1 %v5841_v15 }
 0x218   :  { %2865 = vmatpush.msrb.mxu3 %v5849_v59  ;;  %2978 = vmatpush.msrb.mxu2 %v5841_v15 }
 0x219   :  { %3026 = vmatpush.msra.mxu0 %v5841_v15  ;;  %v4260_v60 = vpop.eup %4259  ;;  %3051 = vmatpush.msra.mxu1 %v5849_v59 }
 0x21a   :  { %2866 = vmatpush.msrb.mxu3 %v5856_v36  ;;  %v2125_v12 = vmul.f32 %v4260_v60, %v2123_v58  ;;  %2979 = vmatpush.msrb.mxu2 %v5849_v59 }
 0x21b   :  { %3027 = vmatpush.msra.mxu0 %v5849_v59  ;;  %3052 = vmatpush.msra.mxu1 %v5856_v36 }
 0x21c   :  { %4084 = vmatmul.msk.f32.vlgmr.msra.gmra.mxu3 %vm584_vm2, %v2755_v42  ;;  %4090 = vmatmul.msk.f32.vlgmr.msrb.gmra.mxu1 %vm584_vm2, %v2941_v46  ;;  %v6126_v0 = vadd.f32 %v2125_v12, %v5965_v45  ;;  %v3037_v45 = vmul.f32 %v5941_v44, %v6105_v4  ;;  %v2989_v44 = vmul.f32 %v6062_v28, %v6105_v4 }
 0x21d   :  { %2867 = vmatpush.msrb.mxu3 %v5862_v48  ;;  %2980 = vmatpush.msrb.mxu2 %v5856_v36 }
 0x21e   :  { %3028 = vmatpush.msra.mxu0 %v5856_v36  ;;  %3053 = vmatpush.msra.mxu1 %v5862_v48 }
 0x21f   :  { %2868 = vmatpush.msrb.mxu3 %v5868_v26  ;;  %2981 = vmatpush.msrb.mxu2 %v5862_v48 }
 0x220   :  { %3029 = vmatpush.msra.mxu0 %v5862_v48  ;;  %3054 = vmatpush.msra.mxu1 %v5868_v26 }
 0x221   :  { %2869 = vmatpush.msrb.mxu3 %v5880_v53  ;;  %2982 = vmatpush.msrb.mxu2 %v5868_v26 }
 0x222   :  { %3030 = vmatpush.msra.mxu0 %v5868_v26  ;;  %3055 = vmatpush.msra.mxu1 %v5880_v53 }
 0x223   :  { %2870 = vmatpush.msrb.mxu3 %v5894_v24  ;;  %2983 = vmatpush.msrb.mxu2 %v5880_v53 }
 0x224   :  { %3031 = vmatpush.msra.mxu0 %v5880_v53  ;;  %3056 = vmatpush.msra.mxu1 %v5894_v24 }
 0x225   :  { %3001 = vmatpush.msra.mxu3 %v5833_v25  ;;  %2984 = vmatpush.msrb.mxu2 %v5894_v24 }
 0x226   :  { %4088 = vmatmul.msk.f32.vlgmr.msrb.gmra.mxu3 %vm584_vm2, %v2851_v55  ;;  %3032 = vmatpush.msra.mxu0 %v5894_v24  ;;  %v4144_v55 = vld [vmem:[%s6718_s16] ss:$0 sm:$0xff] }
 0x227   :  { %4094 = vmatmul.msk.f32.vlgmr.msra.gmra.mxu1 %vm584_vm2, %v3037_v45  ;;  %4091 = vmatmul.msk.f32.vlgmr.msrb.gmra.mxu2 %vm584_vm2, %v2965_v21 }
 0x228   :  { %3187 = vmatpush.msrb.mxu1 %v5833_v25  ;;  %3002 = vmatpush.msra.mxu3 %v5841_v15 }
 0x229   :  { %4093 = vmatmul.msk.f32.vlgmr.msra.gmra.mxu0 %vm584_vm2, %v3013_v43  ;;  %3073 = vmatpush.msra.mxu2 %v5833_v25 }
 0x22a   :  { %3163 = vmatpush.msrb.mxu0 %v5833_v25  ;;  %3188 = vmatpush.msrb.mxu1 %v5841_v15 }
 0x22b   :  { %3003 = vmatpush.msra.mxu3 %v5849_v59  ;;  %3074 = vmatpush.msra.mxu2 %v5841_v15 }
 0x22c   :  { %3164 = vmatpush.msrb.mxu0 %v5841_v15  ;;  %3189 = vmatpush.msrb.mxu1 %v5849_v59 }
 0x22d   :  { %3004 = vmatpush.msra.mxu3 %v5856_v36  ;;  %3075 = vmatpush.msra.mxu2 %v5849_v59 }
 0x22e   :  { %3165 = vmatpush.msrb.mxu0 %v5849_v59  ;;  %3190 = vmatpush.msrb.mxu1 %v5856_v36 }
 0x22f   :  { %3005 = vmatpush.msra.mxu3 %v5862_v48  ;;  %3076 = vmatpush.msra.mxu2 %v5856_v36 }
 0x230   :  { %3166 = vmatpush.msrb.mxu0 %v5856_v36  ;;  %3191 = vmatpush.msrb.mxu1 %v5862_v48 }
 0x231   :  { %3006 = vmatpush.msra.mxu3 %v5868_v26  ;;  %3077 = vmatpush.msra.mxu2 %v5862_v48 }
 0x232   :  { %3167 = vmatpush.msrb.mxu0 %v5862_v48  ;;  %3192 = vmatpush.msrb.mxu1 %v5868_v26 }
 0x233   :  { %3007 = vmatpush.msra.mxu3 %v5880_v53  ;;  %3078 = vmatpush.msra.mxu2 %v5868_v26 }
 0x234   :  { %3168 = vmatpush.msrb.mxu0 %v5868_v26  ;;  %3193 = vmatpush.msrb.mxu1 %v5880_v53 }
 0x235   :  { %3008 = vmatpush.msra.mxu3 %v5894_v24  ;;  %3079 = vmatpush.msra.mxu2 %v5880_v53 }
 0x236   :  { %3169 = vmatpush.msrb.mxu0 %v5880_v53  ;;  %4092 = vmatmul.msk.f32.vlgmr.msra.gmra.mxu3 %vm584_vm2, %v2989_v44 }
 0x237   :  { %3194 = vmatpush.msrb.mxu1 %v5894_v24  ;;  %3139 = vmatpush.msrb.mxu3 %v5833_v25 }
 0x238   :  { %3080 = vmatpush.msra.mxu2 %v5894_v24  ;;  %3170 = vmatpush.msrb.mxu0 %v5894_v24 }
 0x239   :  { %4098 = vmatmul.msk.f32.vlgmr.msrb.gmra.mxu1 %vm584_vm2, %v3175_v20  ;;  %4095 = vmatmul.msk.f32.vlgmr.msra.gmra.mxu2 %vm584_vm2, %v3061_v10 }
 0x23a   :  { %3325 = vmatpush.msra.mxu1 %v5833_v25  ;;  %3140 = vmatpush.msrb.mxu3 %v5841_v15 }
 0x23b   :  { %4097 = vmatmul.msk.f32.vlgmr.msrb.gmra.mxu0 %vm584_vm2, %v3151_v29  ;;  %3211 = vmatpush.msrb.mxu2 %v5833_v25 }
 0x23c   :  { %3259 = vmatpush.msra.mxu0 %v5833_v25  ;;  %3326 = vmatpush.msra.mxu1 %v5841_v15 }
 0x23d   :  { %3141 = vmatpush.msrb.mxu3 %v5849_v59  ;;  %3212 = vmatpush.msrb.mxu2 %v5841_v15 }
 0x23e   :  { %3260 = vmatpush.msra.mxu0 %v5841_v15  ;;  %3327 = vmatpush.msra.mxu1 %v5849_v59 }
 0x23f   :  { %3142 = vmatpush.msrb.mxu3 %v5856_v36  ;;  %3213 = vmatpush.msrb.mxu2 %v5849_v59 }
 0x240   :  { %3261 = vmatpush.msra.mxu0 %v5849_v59  ;;  %3328 = vmatpush.msra.mxu1 %v5856_v36 }
 0x241   :  { %3143 = vmatpush.msrb.mxu3 %v5862_v48  ;;  %3214 = vmatpush.msrb.mxu2 %v5856_v36 }
 0x242   :  { %3262 = vmatpush.msra.mxu0 %v5856_v36  ;;  %3329 = vmatpush.msra.mxu1 %v5862_v48 }
 0x243   :  { %3144 = vmatpush.msrb.mxu3 %v5868_v26  ;;  %3215 = vmatpush.msrb.mxu2 %v5862_v48 }
 0x244   :  { %3263 = vmatpush.msra.mxu0 %v5862_v48  ;;  %3330 = vmatpush.msra.mxu1 %v5868_v26 }
 0x245   :  { %3145 = vmatpush.msrb.mxu3 %v5880_v53  ;;  %3216 = vmatpush.msrb.mxu2 %v5868_v26 }
 0x246   :  { %3264 = vmatpush.msra.mxu0 %v5868_v26  ;;  %3331 = vmatpush.msra.mxu1 %v5880_v53 }
 0x247   :  { %3146 = vmatpush.msrb.mxu3 %v5894_v24  ;;  %3217 = vmatpush.msrb.mxu2 %v5880_v53 }
 0x248   :  { %3265 = vmatpush.msra.mxu0 %v5880_v53  ;;  %4096 = vmatmul.msk.f32.vlgmr.msrb.gmra.mxu3 %vm584_vm2, %v5947_v27  ;;  %v3694_v27 = vld [vmem:[%s6719_s19 + $0x30] sm:$0xff] }
 0x249   :  { %3332 = vmatpush.msra.mxu1 %v5894_v24  ;;  %3235 = vmatpush.msra.mxu3 %v5833_v25 }
 0x24a   :  { %3218 = vmatpush.msrb.mxu2 %v5894_v24  ;;  %3266 = vmatpush.msra.mxu0 %v5894_v24 }
 0x24b   :  { %4102 = vmatmul.msk.f32.vlgmr.msra.gmra.mxu1 %vm584_vm2, %v6015_v51  ;;  %4099 = vmatmul.msk.f32.vlgmr.msrb.gmra.mxu2 %vm584_vm2, %v5984_v63  ;;  %v3691_v63 = vld [vmem:[%s6719_s19 + $0x18] sm:$0xff]  ;;  %v3688_v51 = vld [vmem:[%s6719_s19] sm:$0xff] }
 0x24c   :  { %3421 = vmatpush.msrb.mxu1 %v5833_v25  ;;  %3236 = vmatpush.msra.mxu3 %v5841_v15 }
 0x24d   :  { %4101 = vmatmul.msk.f32.vlgmr.msra.gmra.mxu0 %vm584_vm2, %v6044_v52  ;;  %3349 = vmatpush.msra.mxu2 %v5833_v25  ;;  %v6379_v52 = vpop.f32.mrf.mxu1 }
 0x24e   :  { %3397 = vmatpush.msrb.mxu0 %v5833_v25  ;;  %3422 = vmatpush.msrb.mxu1 %v5841_v15 }
 0x24f   :  { %3237 = vmatpush.msra.mxu3 %v5849_v59  ;;  %3350 = vmatpush.msra.mxu2 %v5841_v15 }
 0x250   :  { %3398 = vmatpush.msrb.mxu0 %v5841_v15  ;;  %3423 = vmatpush.msrb.mxu1 %v5849_v59 }
 0x251   :  { %3238 = vmatpush.msra.mxu3 %v5856_v36  ;;  %3351 = vmatpush.msra.mxu2 %v5849_v59 }
 0x252   :  { %3399 = vmatpush.msrb.mxu0 %v5849_v59  ;;  %3424 = vmatpush.msrb.mxu1 %v5856_v36 }
 0x253   :  { %3239 = vmatpush.msra.mxu3 %v5862_v48  ;;  %3352 = vmatpush.msra.mxu2 %v5856_v36 }
 0x254   :  { %3400 = vmatpush.msrb.mxu0 %v5856_v36  ;;  %3425 = vmatpush.msrb.mxu1 %v5862_v48 }
 0x255   :  { %3240 = vmatpush.msra.mxu3 %v5868_v26  ;;  %3353 = vmatpush.msra.mxu2 %v5862_v48 }
 0x256   :  { %3401 = vmatpush.msrb.mxu0 %v5862_v48  ;;  %3426 = vmatpush.msrb.mxu1 %v5868_v26 }
 0x257   :  { %3241 = vmatpush.msra.mxu3 %v5880_v53  ;;  %3354 = vmatpush.msra.mxu2 %v5868_v26 }
 0x258   :  { %3402 = vmatpush.msrb.mxu0 %v5868_v26  ;;  %3427 = vmatpush.msrb.mxu1 %v5880_v53 }
 0x259   :  { %3242 = vmatpush.msra.mxu3 %v5894_v24  ;;  %3355 = vmatpush.msra.mxu2 %v5880_v53 }
 0x25a   :  { %3403 = vmatpush.msrb.mxu0 %v5880_v53  ;;  %4100 = vmatmul.msk.f32.vlgmr.msra.gmra.mxu3 %vm584_vm2, %v5953_v40  ;;  %v3693_v40 = vld [vmem:[%s6719_s19 + $0x28] sm:$0xff] }
 0x25b   :  { %3428 = vmatpush.msrb.mxu1 %v5894_v24  ;;  %3373 = vmatpush.msrb.mxu3 %v5833_v25 }
 0x25c   :  { %3356 = vmatpush.msra.mxu2 %v5894_v24  ;;  %3404 = vmatpush.msrb.mxu0 %v5894_v24 }
 0x25d   :  { %4106 = vmatmul.msk.f32.vlgmr.msrb.gmra.mxu1 %vm584_vm2, %v6019_v56  ;;  %4103 = vmatmul.msk.f32.vlgmr.msra.gmra.mxu2 %vm584_vm2, %v6026_v31  ;;  %v2127_v56 = vmul.f32 0.14285715, %v6126_v0  ;;  %v6370_v31 = vpop.f32.mrf.mxu0 }
 0x25e   :  { %3559 = vmatpush.msra.mxu1 %v5833_v25  ;;  %3374 = vmatpush.msrb.mxu3 %v5841_v15 }
 0x25f   :  { %4105 = vmatmul.msk.f32.vlgmr.msrb.gmra.mxu0 %vm584_vm2, %v6030_v57  ;;  %3445 = vmatpush.msrb.mxu2 %v5833_v25  ;;  %v3687_v57 = vld [vmem:[%s6720_s18] sm:$0x7f] }
 0x260   :  { %3535 = vmatpush.msra.mxu0 %v5833_v25  ;;  %3560 = vmatpush.msra.mxu1 %v5841_v15 }
 0x261   :  { %3375 = vmatpush.msrb.mxu3 %v5849_v59  ;;  %3446 = vmatpush.msrb.mxu2 %v5841_v15 }
 0x262   :  { %3536 = vmatpush.msra.mxu0 %v5841_v15  ;;  %3561 = vmatpush.msra.mxu1 %v5849_v59 }
 0x263   :  { %3376 = vmatpush.msrb.mxu3 %v5856_v36  ;;  %3447 = vmatpush.msrb.mxu2 %v5849_v59 }
 0x264   :  { %3537 = vmatpush.msra.mxu0 %v5849_v59  ;;  %3562 = vmatpush.msra.mxu1 %v5856_v36 }
 0x265   :  { %3377 = vmatpush.msrb.mxu3 %v5862_v48  ;;  %3448 = vmatpush.msrb.mxu2 %v5856_v36 }
 0x266   :  { %3538 = vmatpush.msra.mxu0 %v5856_v36  ;;  %3563 = vmatpush.msra.mxu1 %v5862_v48 }
 0x267   :  { %3378 = vmatpush.msrb.mxu3 %v5868_v26  ;;  %3449 = vmatpush.msrb.mxu2 %v5862_v48 }
 0x268   :  { %3539 = vmatpush.msra.mxu0 %v5862_v48  ;;  %3564 = vmatpush.msra.mxu1 %v5868_v26 }
 0x269   :  { %3379 = vmatpush.msrb.mxu3 %v5880_v53  ;;  %3450 = vmatpush.msrb.mxu2 %v5868_v26 }
 0x26a   :  { %3540 = vmatpush.msra.mxu0 %v5868_v26  ;;  %3565 = vmatpush.msra.mxu1 %v5880_v53 }
 0x26b   :  { %3380 = vmatpush.msrb.mxu3 %v5894_v24  ;;  %3451 = vmatpush.msrb.mxu2 %v5880_v53 }
 0x26c   :  { %3541 = vmatpush.msra.mxu0 %v5880_v53  ;;  %4104 = vmatmul.msk.f32.vlgmr.msrb.gmra.mxu3 %vm584_vm2, %v6078_v33 }
 0x26d   :  { %3566 = vmatpush.msra.mxu1 %v5894_v24  ;;  %3511 = vmatpush.msra.mxu3 %v5833_v25 }
 0x26e   :  { %3452 = vmatpush.msrb.mxu2 %v5894_v24  ;;  %3542 = vmatpush.msra.mxu0 %v5894_v24 }
 0x26f   :  { %4110 = vmatmul.msk.f32.vlgmr.msra.gmra.mxu1 %vm584_vm2, %v6084_v61  ;;  %4107 = vmatmul.msk.f32.vlgmr.msrb.gmra.mxu2 %vm584_vm2, %v6050_v11  ;;  %v6405_v11 = vpop.permute.xlu2 %2659 }
 0x270   :  { %3707 = vmatpush.msrb.mxu1 %v3695_v41  ;;  %3512 = vmatpush.msra.mxu3 %v5841_v15 }
 0x271   :  { %4109 = vmatmul.msk.f32.vlgmr.msra.gmra.mxu0 %vm584_vm2, %v5993_v18  ;;  %3583 = vmatpush.msra.mxu2 %v5833_v25  ;;  %v3690_v18 = vld [vmem:[%s6719_s19 + $0x10] sm:$0xff] }
 0x272   :  { %3631 = vmatpush.msrb.mxu0 %v5833_v25  ;;  %3708 = vmatpush.msrb.mxu1 %v3694_v27  ;;  %v6427_v27 = vadd.f32 %v4144_v55, %v6370_v31 }
 0x273   :  { %3513 = vmatpush.msra.mxu3 %v5849_v59  ;;  %3584 = vmatpush.msra.mxu2 %v5841_v15 }
 0x274   :  { %3632 = vmatpush.msrb.mxu0 %v5841_v15  ;;  %3709 = vmatpush.msrb.mxu1 %v3693_v40 }
 0x275   :  { %3514 = vmatpush.msra.mxu3 %v5856_v36  ;;  %3585 = vmatpush.msra.mxu2 %v5849_v59 }
 0x276   :  { %3633 = vmatpush.msrb.mxu0 %v5849_v59  ;;  %3710 = vmatpush.msrb.mxu1 %v3692_v23 }
 0x277   :  { %3515 = vmatpush.msra.mxu3 %v5862_v48  ;;  %3586 = vmatpush.msra.mxu2 %v5856_v36  ;;  %v6413_v50 = vpop.permute.xlu2 %2687 }
 0x278   :  { %3634 = vmatpush.msrb.mxu0 %v5856_v36  ;;  %3711 = vmatpush.msrb.mxu1 %v3691_v63 }
 0x279   :  { %3516 = vmatpush.msra.mxu3 %v5868_v26  ;;  %3587 = vmatpush.msra.mxu2 %v5862_v48 }
 0x27a   :  { %3635 = vmatpush.msrb.mxu0 %v5862_v48  ;;  %3712 = vmatpush.msrb.mxu1 %v3690_v18 }
 0x27b   :  { %3517 = vmatpush.msra.mxu3 %v5880_v53  ;;  %3588 = vmatpush.msra.mxu2 %v5868_v26 }
 0x27c   :  { %3636 = vmatpush.msrb.mxu0 %v5868_v26  ;;  %3713 = vmatpush.msrb.mxu1 %v3689_v32 }
 0x27d   :  { %3518 = vmatpush.msra.mxu3 %v5894_v24  ;;  %3589 = vmatpush.msra.mxu2 %v5880_v53 }
 0x27e   :  { %3637 = vmatpush.msrb.mxu0 %v5880_v53  ;;  %4108 = vmatmul.msk.f32.vlgmr.msra.gmra.mxu3 %vm584_vm2, %v5997_v47  ;;  %v6388_v47 = vpop.f32.mrf.mxu2 }
 0x27f   :  { %3714 = vmatpush.msrb.mxu1 %v3688_v51  ;;  %3607 = vmatpush.msrb.mxu3 %v5833_v25  ;;  %v2441_v25 = vpop.f32.mrf.mxu3 }
 0x280   :  { %3590 = vmatpush.msra.mxu2 %v5894_v24  ;;  %3638 = vmatpush.msrb.mxu0 %v5894_v24  ;;  %v6423_v10 = vadd.f32 %v4144_v55, %v2441_v25 }
 0x281   :  { %4114 = vmatmul.msk.f32.vlgmr.msrb.gmra.mxu1 %vm584_vm2, %v2127_v56  ;;  %4111 = vmatmul.msk.f32.vlgmr.msra.gmra.mxu2 %vm584_vm2, %v6003_v2  ;;  %v6395_v2 = vpop.f32.mrf.mxu0 }
 0x282   :  { %3608 = vmatpush.msrb.mxu3 %v5841_v15  ;;  %4113 = vmatmul.msk.f32.vlgmr.msrb.gmra.mxu0 %vm584_vm2, %v6058_v13  ;;  %v2570_v15 = vpop.f32.mrf.mxu1 }
 0x283   :  { %4115 = vmatpush.msk.msrb.mxu2 %vm124_vm0, %v3687_v57  ;;  %v2571_v13 = vadd.f32 %v2570_v15, %v6768_v14  ;;  %v6432_v57 = vadd.f32 %v4144_v55, %v6379_v52 }
 0x284   :  { %3609 = vmatpush.msrb.mxu3 %v5849_v59 }
 0x286   :  { %3610 = vmatpush.msrb.mxu3 %v5856_v36  ;;  %v2598_v36 = vpop.f32.mrf.mxu2 }
 0x287   :  { %v6400_v59 = vpop.f32.mrf.mxu3 }
 0x288   :  { %3611 = vmatpush.msrb.mxu3 %v5862_v48  ;;  %v6767_v48 = vld [vmem:[#allocation3_spill] sm:$0xff] }
 0x289   :  { %4116 = vmatmul.msk.f32.vlgmr.msrb.gmra.mxu2 %vm120_vm1, %v3686_v37  ;;  %v2599_v35 = vadd.f32 %v2598_v36, %v6767_v48  ;;  %v6437_v36 = vadd.f32 %v4144_v55, %v6388_v47  ;;  %v6445_v47 = vadd.f32 %v4144_v55, %v6395_v2 }
 0x28a   :  { %3612 = vmatpush.msrb.mxu3 %v5868_v26  ;;  %v2654_v26 = vpop.f32.mrf.mxu0  ;;  %v2682_v28 = vpop.f32.mrf.mxu1 }
 0x28b   :  { %v2713_v38 = vmax.f32 %v2571_v13, %v2599_v35  ;;  %v2683_v7 = vadd.f32 %v2682_v28, %v6405_v11 }
 0x28c   :  { %3613 = vmatpush.msrb.mxu3 %v5880_v53  ;;  %v6769_v53 = vld [vmem:[#allocation4_spill] sm:$0xff] }
 0x28e   :  { %3614 = vmatpush.msrb.mxu3 %v5894_v24  ;;  %v2655_v24 = vadd.f32 %v2654_v26, %v6409_v62 }
 0x28f   :  { %4112 = vmatmul.msk.f32.vlgmr.msrb.gmra.mxu3 %vm584_vm2, %v6007_v1  ;;  %v2710_v1 = vpop.f32.mrf.mxu2 }
 0x290   :  { %v2711_v39 = vadd.f32 %v2710_v1, %v6413_v50 }
 0x292   :  { %v2800_v19 = vpop.f32.mrf.mxu0  ;;  %v2824_v17 = vpop.f32.mrf.mxu1 }
 0x293   :  { %v2626_v16 = vpop.f32.mrf.mxu3  ;;  %v2801_v9 = vadd.f32 %v2800_v19, %v6767_v48  ;;  %v2825_v45 = vadd.f32 %v2824_v17, %v6769_v53 }
 0x294   :  { %v2627_v5 = vadd.f32 %v2626_v16, %v6769_v53 }
 0x296   :  { %v2714_v3 = vmax.f32 %v2713_v38, %v2627_v5  ;;  %v6441_v38 = vadd.f32 %v4144_v55, %v6400_v59 }
 0x298   :  { %v2715_v49 = vmax.f32 %v2714_v3, %v2655_v24 }
 0x299   :  { %v2848_v43 = vpop.f32.mrf.mxu2 }
 0x29a   :  { %v2716_v8 = vmax.f32 %v2715_v49, %v2683_v7  ;;  %v2849_v29 = vadd.f32 %v2848_v43, %v6409_v62  ;;  %v2896_v40 = vpop.f32.mrf.mxu0  ;;  %v2962_v19 = vpop.f32.mrf.mxu1 }
 0x29b   :  { %v2897_v15 = vadd.f32 %v2896_v40, %v6413_v50 }
 0x29c   :  { %v2717_v33 = vmax.f32 %v2716_v8, %v2711_v39 }
 0x29e   :  { %v2718_v54 = vsub.f32 %v2571_v13, %v2717_v33  ;;  %v2721_v34 = vsub.f32 %v2599_v35, %v2717_v33  ;;  %v2724_v61 = vsub.f32 %v2627_v5, %v2717_v33  ;;  %v2727_v30 = vsub.f32 %v2655_v24, %v2717_v33 }
 0x29f   :  { %v2776_v22 = vpop.f32.mrf.mxu3  ;;  %v2730_v58 = vsub.f32 %v2683_v7, %v2717_v33  ;;  %v2733_v46 = vsub.f32 %v2711_v39, %v2717_v33 }
 0x2a0   :  { %v2777_v6 = vadd.f32 %v2776_v22, %v6768_v14  ;;  %v2719_v4 = vmul.f32 1.442695, %v2718_v54  ;;  %v2722_v60 = vmul.f32 1.442695, %v2721_v34  ;;  %v2725_v42 = vmul.f32 1.442695, %v2724_v61 }
 0x2a1   :  { %v2728_v12 = vmul.f32 1.442695, %v2727_v30  ;;  %v2731_v21 = vmul.f32 1.442695, %v2730_v58  ;;  %v2734_v44 = vmul.f32 1.442695, %v2733_v46 }
 0x2a2   :  { %v2899_v0 = vmax.f32 %v2777_v6, %v2801_v9  ;;  %4261 = vpow2.f32 %v2719_v4 }
 0x2a3   :  { %4263 = vpow2.f32 %v2722_v60 }
 0x2a4   :  { %4265 = vpow2.f32 %v2725_v42  ;;  %v2900_v20 = vmax.f32 %v2899_v0, %v2825_v45 }
 0x2a5   :  { %4267 = vpow2.f32 %v2728_v12  ;;  %v2963_v12 = vadd.f32 %v2962_v19, %v6768_v14 }
 0x2a6   :  { %4269 = vpow2.f32 %v2731_v21  ;;  %v2901_v51 = vmax.f32 %v2900_v20, %v2849_v29  ;;  %v3034_v0 = vpop.f32.mrf.mxu0 }
 0x2a7   :  { %4271 = vpow2.f32 %v2734_v44  ;;  %v3035_v40 = vadd.f32 %v3034_v0, %v6409_v62 }
 0x2a8   :  { %v4262_v41 = vpop.eup %4261 }
 0x2a9   :  { %v2872_v23 = vpop.f32.mrf.mxu3  ;;  %v4264_v63 = vpop.eup %4263  ;;  %v2736_v18 = vmul.f32 %v4262_v41, %v6423_v10 }
 0x2aa   :  { %v2873_v32 = vadd.f32 %v2872_v23, %v6405_v11  ;;  %v4266_v56 = vpop.eup %4265  ;;  %v2738_v25 = vmul.f32 %v4264_v63, %v6427_v27  ;;  %v2737_v5 = vadd.f32 %v4264_v63, %v4262_v41 }
 0x2ab   :  { %v4268_v37 = vpop.eup %4267  ;;  %v2741_v13 = vmul.f32 %v4266_v56, %v6432_v57 }
 0x2ac   :  { %v2902_v31 = vmax.f32 %v2901_v51, %v2873_v32  ;;  %v2739_v35 = vadd.f32 %v2738_v25, %v2736_v18  ;;  %v4270_v26 = vpop.eup %4269  ;;  %v2744_v28 = vmul.f32 %v4268_v37, %v6437_v36  ;;  %v2740_v58 = vadd.f32 %v4266_v56, %v2737_v5 }
 0x2ad   :  { %v4272_v24 = vpop.eup %4271  ;;  %v2747_v8 = vmul.f32 %v4270_v26, %v6441_v38 }
 0x2ae   :  { %v2903_v16 = vmax.f32 %v2902_v31, %v2897_v15  ;;  %v2742_v52 = vadd.f32 %v2741_v13, %v2739_v35  ;;  %v2750_v61 = vmul.f32 %v4272_v24, %v6445_v47  ;;  %v2743_v42 = vadd.f32 %v4268_v37, %v2740_v58 }
 0x2b0   :  { %v2904_v3 = vsub.f32 %v2777_v6, %v2903_v16  ;;  %v2907_v1 = vsub.f32 %v2801_v9, %v2903_v16  ;;  %v2910_v7 = vsub.f32 %v2825_v45, %v2903_v16  ;;  %v2913_v49 = vsub.f32 %v2849_v29, %v2903_v16  ;;  %v2986_v6 = vpop.f32.mrf.mxu2  ;;  %v3058_v45 = vpop.f32.mrf.mxu1 }
 0x2b1   :  { %v2745_v39 = vadd.f32 %v2744_v28, %v2742_v52  ;;  %v2916_v59 = vsub.f32 %v2873_v32, %v2903_v16  ;;  %v2919_v22 = vsub.f32 %v2897_v15, %v2903_v16  ;;  %v2987_v60 = vadd.f32 %v2986_v6, %v6767_v48 }
 0x2b2   :  { %v2905_v33 = vmul.f32 1.442695, %v2904_v3  ;;  %v2908_v54 = vmul.f32 1.442695, %v2907_v1  ;;  %v2911_v30 = vmul.f32 1.442695, %v2910_v7  ;;  %v2746_v29 = vadd.f32 %v4270_v26, %v2743_v42 }
 0x2b3   :  { %v2748_v34 = vadd.f32 %v2747_v8, %v2745_v39  ;;  %v2914_v9 = vmul.f32 1.442695, %v2913_v49  ;;  %v2917_v2 = vmul.f32 1.442695, %v2916_v59  ;;  %v2920_v4 = vmul.f32 1.442695, %v2919_v22 }
 0x2b4   :  { %4273 = vpow2.f32 %v2905_v33  ;;  %v3085_v43 = vmax.f32 %v2963_v12, %v2987_v60  ;;  %v3059_v56 = vadd.f32 %v3058_v45, %v6405_v11  ;;  %v2749_v13 = vadd.f32 %v4272_v24, %v2746_v29 }
 0x2b5   :  { %v6449_v17 = vadd.f32 %v2750_v61, %v2748_v34  ;;  %4275 = vpow2.f32 %v2908_v54 }
 0x2b6   :  { %4277 = vpow2.f32 %v2911_v30 }
 0x2b7   :  { %4279 = vpow2.f32 %v2914_v9 }
 0x2b8   :  { %4281 = vpow2.f32 %v2917_v2 }
 0x2b9   :  { %v3010_v55 = vpop.f32.mrf.mxu3  ;;  %4283 = vpow2.f32 %v2920_v4 }
 0x2ba   :  { %v4274_v46 = vpop.eup %4273  ;;  %v3011_v44 = vadd.f32 %v3010_v55, %v6769_v53  ;;  %4285 = vrcp.f32 %v2749_v13 }
 0x2bb   :  { %v2922_v21 = vmul.f32 %v4274_v46, %v6423_v10  ;;  %v4276_v20 = vpop.eup %4275 }
 0x2bc   :  { %v4278_v41 = vpop.eup %4277  ;;  %v2923_v23 = vadd.f32 %v4276_v20, %v4274_v46  ;;  %v2924_v63 = vmul.f32 %v4276_v20, %v6427_v27  ;;  %v3086_v18 = vmax.f32 %v3085_v43, %v3011_v44  ;;  %v3082_v32 = vpop.f32.mrf.mxu2 }
 0x2bd   :  { %v4280_v51 = vpop.eup %4279  ;;  %v2927_v15 = vmul.f32 %v4278_v41, %v6432_v57  ;;  %v3083_v26 = vadd.f32 %v3082_v32, %v6413_v50 }
 0x2be   :  { %v2925_v25 = vadd.f32 %v2924_v63, %v2922_v21  ;;  %v2926_v37 = vadd.f32 %v4278_v41, %v2923_v23  ;;  %v3087_v31 = vmax.f32 %v3086_v18, %v3035_v40  ;;  %v4282_v35 = vpop.eup %4281  ;;  %v2930_v28 = vmul.f32 %v4280_v51, %v6437_v36  ;;  %v3172_v23 = vpop.f32.mrf.mxu0 }
 0x2bf   :  { %v4284_v16 = vpop.eup %4283  ;;  %v2933_v49 = vmul.f32 %v4282_v35, %v6441_v38 }
 0x2c0   :  { %v2928_v5 = vadd.f32 %v2927_v15, %v2925_v25  ;;  %v2929_v52 = vadd.f32 %v4280_v51, %v2926_v37  ;;  %v3088_v3 = vmax.f32 %v3087_v31, %v3059_v56  ;;  %v2936_v8 = vmul.f32 %v4284_v16, %v6445_v47  ;;  %v4286_v4 = vpop.eup %4285 }
 0x2c2   :  { %v2931_v1 = vadd.f32 %v2930_v28, %v2928_v5  ;;  %v2932_v7 = vadd.f32 %v4282_v35, %v2929_v52  ;;  %v3089_v39 = vmax.f32 %v3088_v3, %v3083_v26  ;;  %v3196_v35 = vpop.f32.mrf.mxu1 }
 0x2c3   :  { %v3197_v52 = vadd.f32 %v3196_v35, %v6769_v53 }
 0x2c4   :  { %v2934_v19 = vadd.f32 %v2933_v49, %v2931_v1  ;;  %v2935_v33 = vadd.f32 %v4284_v16, %v2932_v7  ;;  %v3090_v54 = vsub.f32 %v2963_v12, %v3089_v39  ;;  %v3093_v24 = vsub.f32 %v2987_v60, %v3089_v39 }
 0x2c5   :  { %v3096_v59 = vsub.f32 %v3011_v44, %v3089_v39  ;;  %v3099_v34 = vsub.f32 %v3035_v40, %v3089_v39  ;;  %v3102_v61 = vsub.f32 %v3059_v56, %v3089_v39  ;;  %v3105_v2 = vsub.f32 %v3083_v26, %v3089_v39 }
 0x2c6   :  { %v2937_v30 = vadd.f32 %v2936_v8, %v2934_v19  ;;  %4287 = vrcp.f32 %v2935_v33  ;;  %v3091_v22 = vmul.f32 1.442695, %v3090_v54  ;;  %v3094_v58 = vmul.f32 1.442695, %v3093_v24 }
 0x2c7   :  { %v3097_v9 = vmul.f32 1.442695, %v3096_v59  ;;  %v3100_v6 = vmul.f32 1.442695, %v3099_v34  ;;  %v3103_v42 = vmul.f32 1.442695, %v3102_v61  ;;  %v2753_v60 = vmul.f32 %v4286_v4, %v6449_v17 }
 0x2c8   :  { %4289 = vpow2.f32 %v3091_v22  ;;  %v3106_v46 = vmul.f32 1.442695, %v3105_v2  ;;  %v3173_v56 = vadd.f32 %v3172_v23, %v6767_v48 }
 0x2c9   :  { %4291 = vpow2.f32 %v3094_v58 }
 0x2ca   :  { %4293 = vpow2.f32 %v3097_v9  ;;  %v3268_v19 = vpop.f32.mrf.mxu0 }
 0x2cb   :  { %4295 = vpow2.f32 %v3100_v6  ;;  %v3148_v44 = vpop.f32.mrf.mxu3  ;;  %v3269_v34 = vadd.f32 %v3268_v19, %v6413_v50 }
 0x2cc   :  { %v4288_v0 = vpop.eup %4287  ;;  %4297 = vpow2.f32 %v3103_v42  ;;  %v3149_v17 = vadd.f32 %v3148_v44, %v6768_v14 }
 0x2cd   :  { %v2939_v12 = vmul.f32 %v4288_v0, %v2937_v30  ;;  %4299 = vpow2.f32 %v3106_v46 }
 0x2ce   :  { %v4290_v55 = vpop.eup %4289  ;;  %v3271_v5 = vmax.f32 %v3149_v17, %v3173_v56  ;;  %v3220_v7 = vpop.f32.mrf.mxu2 }
 0x2cf   :  { %v4292_v45 = vpop.eup %4291  ;;  %v2940_v21 = vadd.f32 %v2939_v12, %v2753_v60  ;;  %v3108_v43 = vmul.f32 %v4290_v55, %v6423_v10  ;;  %v3221_v8 = vadd.f32 %v3220_v7, %v6409_v62 }
 0x2d0   :  { %v4294_v20 = vpop.eup %4293  ;;  %v3109_v29 = vadd.f32 %v4292_v45, %v4290_v55  ;;  %v3110_v41 = vmul.f32 %v4292_v45, %v6427_v27  ;;  %v3272_v39 = vmax.f32 %v3271_v5, %v3197_v52  ;;  %v3334_v45 = vpop.f32.mrf.mxu1 }
 0x2d1   :  { %v4296_v40 = vpop.eup %4295  ;;  %v3113_v32 = vmul.f32 %v4294_v20, %v6432_v57 }
 0x2d2   :  { %v3111_v63 = vadd.f32 %v3110_v41, %v3108_v43  ;;  %v3112_v18 = vadd.f32 %v4294_v20, %v3109_v29  ;;  %v4298_v51 = vpop.eup %4297  ;;  %v3116_v15 = vmul.f32 %v4296_v40, %v6437_v36  ;;  %v3273_v54 = vmax.f32 %v3272_v39, %v3221_v8 }
 0x2d3   :  { %v4300_v31 = vpop.eup %4299  ;;  %v3119_v16 = vmul.f32 %v4298_v51, %v6441_v38  ;;  %v3335_v41 = vadd.f32 %v3334_v45, %v6768_v14 }
 0x2d4   :  { %v3114_v25 = vadd.f32 %v3113_v32, %v3111_v63  ;;  %v3115_v37 = vadd.f32 %v4296_v40, %v3112_v18  ;;  %v3122_v1 = vmul.f32 %v4300_v31, %v6445_v47 }
 0x2d6   :  { %v3117_v13 = vadd.f32 %v3116_v15, %v3114_v25  ;;  %v3118_v26 = vadd.f32 %v4298_v51, %v3115_v37 }
 0x2d8   :  { %v3120_v28 = vadd.f32 %v3119_v16, %v3117_v13  ;;  %v3121_v3 = vadd.f32 %v4300_v31, %v3118_v26 }
 0x2da   :  { %v3123_v49 = vadd.f32 %v3122_v1, %v3120_v28  ;;  %4301 = vrcp.f32 %v3121_v3 }
 0x2dc   :  { %v3406_v40 = vpop.f32.mrf.mxu0 }
 0x2dd   :  { %v3244_v33 = vpop.f32.mrf.mxu3  ;;  %v3407_v31 = vadd.f32 %v3406_v40, %v6409_v62 }
 0x2de   :  { %v3245_v24 = vadd.f32 %v3244_v33, %v6405_v11 }
 0x2e0   :  { %v4302_v59 = vpop.eup %4301  ;;  %v3274_v61 = vmax.f32 %v3273_v54, %v3245_v24  ;;  %v3358_v44 = vpop.f32.mrf.mxu2 }
 0x2e1   :  { %v3125_v30 = vmul.f32 %v4302_v59, %v3123_v49 }
 0x2e2   :  { %v3275_v22 = vmax.f32 %v3274_v61, %v3269_v34 }
 0x2e3   :  { %v6476_v58 = vadd.f32 %v3125_v30, %v2940_v21  ;;  %v3359_v21 = vadd.f32 %v3358_v44, %v6767_v48 }
 0x2e4   :  { %v3276_v9 = vsub.f32 %v3149_v17, %v3275_v22  ;;  %v3279_v6 = vsub.f32 %v3173_v56, %v3275_v22  ;;  %v3282_v2 = vsub.f32 %v3197_v52, %v3275_v22  ;;  %v3285_v4 = vsub.f32 %v3221_v8, %v3275_v22  ;;  %v3430_v17 = vpop.f32.mrf.mxu1 }
 0x2e5   :  { %v3288_v42 = vsub.f32 %v3245_v24, %v3275_v22  ;;  %v3291_v55 = vsub.f32 %v3269_v34, %v3275_v22  ;;  %v3457_v25 = vmax.f32 %v3335_v41, %v3359_v21  ;;  %v3431_v52 = vadd.f32 %v3430_v17, %v6405_v11 }
 0x2e6   :  { %v3277_v46 = vmul.f32 1.442695, %v3276_v9  ;;  %v3280_v0 = vmul.f32 1.442695, %v3279_v6  ;;  %v3283_v12 = vmul.f32 1.442695, %v3282_v2 }
 0x2e7   :  { %v3286_v60 = vmul.f32 1.442695, %v3285_v4  ;;  %v3289_v43 = vmul.f32 1.442695, %v3288_v42  ;;  %v3292_v20 = vmul.f32 1.442695, %v3291_v55 }
 0x2e8   :  { %4303 = vpow2.f32 %v3277_v46 }
 0x2e9   :  { %4305 = vpow2.f32 %v3280_v0 }
 0x2ea   :  { %4307 = vpow2.f32 %v3283_v12 }
 0x2eb   :  { %4309 = vpow2.f32 %v3286_v60 }
 0x2ec   :  { %4311 = vpow2.f32 %v3289_v43 }
 0x2ed   :  { %4313 = vpow2.f32 %v3292_v20 }
 0x2ee   :  { %v4304_v29 = vpop.eup %4303 }
 0x2ef   :  { %v4306_v23 = vpop.eup %4305  ;;  %v3294_v63 = vmul.f32 %v4304_v29, %v6423_v10  ;;  %v3382_v18 = vpop.f32.mrf.mxu3 }
 0x2f0   :  { %v4308_v32 = vpop.eup %4307  ;;  %v3295_v51 = vadd.f32 %v4306_v23, %v4304_v29  ;;  %v3296_v56 = vmul.f32 %v4306_v23, %v6427_v27  ;;  %v3383_v37 = vadd.f32 %v3382_v18, %v6769_v53  ;;  %v3544_v23 = vpop.f32.mrf.mxu0 }
 0x2f1   :  { %v4310_v15 = vpop.eup %4309  ;;  %v3299_v16 = vmul.f32 %v4308_v32, %v6432_v57 }
 0x2f2   :  { %v4312_v35 = vpop.eup %4311  ;;  %v3297_v13 = vadd.f32 %v3296_v56, %v3294_v63  ;;  %v3298_v26 = vadd.f32 %v4308_v32, %v3295_v51  ;;  %v3458_v5 = vmax.f32 %v3457_v25, %v3383_v37  ;;  %v3454_v28 = vpop.f32.mrf.mxu2  ;;  %v3302_v7 = vmul.f32 %v4310_v15, %v6437_v36 }
 0x2f3   :  { %v4314_v39 = vpop.eup %4313  ;;  %v3305_v8 = vmul.f32 %v4312_v35, %v6441_v38  ;;  %v3455_v54 = vadd.f32 %v3454_v28, %v6413_v50  ;;  %v3545_v25 = vadd.f32 %v3544_v23, %v6767_v48  ;;  %v3797_v23 = vld [vmem:[%s6724_s22 + $0x70] sm:$0xff] }
 0x2f4   :  { %v3300_v3 = vadd.f32 %v3299_v16, %v3297_v13  ;;  %v3301_v1 = vadd.f32 %v4310_v15, %v3298_v26  ;;  %v3459_v49 = vmax.f32 %v3458_v5, %v3407_v31  ;;  %v3308_v61 = vmul.f32 %v4314_v39, %v6445_v47 }
 0x2f6   :  { %v3303_v19 = vadd.f32 %v3302_v7, %v3300_v3  ;;  %v3304_v33 = vadd.f32 %v4312_v35, %v3301_v1  ;;  %v3460_v24 = vmax.f32 %v3459_v49, %v3431_v52  ;;  %v3568_v35 = vpop.f32.mrf.mxu1 }
 0x2f7   :  { %v3569_v28 = vadd.f32 %v3568_v35, %v6769_v53  ;;  %v3793_v35 = vld [vmem:[%s6724_s22 + $0x50] sm:$0xff] }
 0x2f8   :  { %v3306_v59 = vadd.f32 %v3305_v8, %v3303_v19  ;;  %v3307_v34 = vadd.f32 %v4314_v39, %v3304_v33  ;;  %v3461_v30 = vmax.f32 %v3460_v24, %v3455_v54  ;;  %v3752_v19 = vld [vmem:[%s6723_s20 + $0x38] sm:$0xff] }
 0x2f9   :  { %3764 = vmatpush.msra.mxu3 %v3752_v19 }
 0x2fa   :  { %v3309_v22 = vadd.f32 %v3308_v61, %v3306_v59  ;;  %4315 = vrcp.f32 %v3307_v34  ;;  %v3462_v9 = vsub.f32 %v3335_v41, %v3461_v30  ;;  %v3465_v6 = vsub.f32 %v3359_v21, %v3461_v30  ;;  %v3751_v59 = vld [vmem:[%s6723_s20 + $0x30] sm:$0xff] }
 0x2fb   :  { %v3468_v2 = vsub.f32 %v3383_v37, %v3461_v30  ;;  %v3471_v4 = vsub.f32 %v3407_v31, %v3461_v30  ;;  %v3474_v42 = vsub.f32 %v3431_v52, %v3461_v30  ;;  %v3477_v55 = vsub.f32 %v3455_v54, %v3461_v30  ;;  %3765 = vmatpush.msra.mxu3 %v3751_v59  ;;  %v3750_v30 = vld [vmem:[%s6723_s20 + $0x28] sm:$0xff] }
 0x2fc   :  { %v3463_v46 = vmul.f32 1.442695, %v3462_v9  ;;  %v3466_v0 = vmul.f32 1.442695, %v3465_v6  ;;  %v3748_v6 = vld [vmem:[%s6723_s20 + $0x18] sm:$0xff] }
 0x2fd   :  { %v3469_v12 = vmul.f32 1.442695, %v3468_v2  ;;  %v3472_v60 = vmul.f32 1.442695, %v3471_v4  ;;  %v3475_v45 = vmul.f32 1.442695, %v3474_v42  ;;  %3766 = vmatpush.msra.mxu3 %v3750_v30 }
 0x2fe   :  { %4317 = vpow2.f32 %v3463_v46  ;;  %v3478_v20 = vmul.f32 1.442695, %v3477_v55  ;;  %v3747_v42 = vld [vmem:[%s6723_s20 + $0x10] sm:$0xff]  ;;  %v3784_v30 = vld [vmem:[%s6724_s22 + $0x8] sm:$0xff] }
 0x2ff   :  { %4319 = vpow2.f32 %v3466_v0  ;;  %v3640_v53 = vpop.f32.mrf.mxu0 }
 0x300   :  { %v4316_v43 = vpop.eup %4315  ;;  %4321 = vpow2.f32 %v3469_v12 }
 0x301   :  { %v3311_v44 = vmul.f32 %v4316_v43, %v3309_v22  ;;  %4323 = vpow2.f32 %v3472_v60  ;;  %v3520_v21 = vpop.f32.mrf.mxu3  ;;  %v3641_v22 = vadd.f32 %v3640_v53, %v6413_v50 }
 0x302   :  { %4325 = vpow2.f32 %v3475_v45  ;;  %v3521_v51 = vadd.f32 %v3520_v21, %v6768_v14  ;;  %v3746_v45 = vld [vmem:[%s6723_s20 + $0x8] sm:$0xff] }
 0x303   :  { %v3312_v29 = vadd.f32 %v3311_v44, %v6476_v58  ;;  %4327 = vpow2.f32 %v3478_v20 }
 0x304   :  { %v4318_v41 = vpop.eup %4317  ;;  %v3643_v5 = vmax.f32 %v3521_v51, %v3545_v25  ;;  %v3592_v7 = vpop.f32.mrf.mxu2 }
 0x305   :  { %v4320_v40 = vpop.eup %4319  ;;  %v3480_v63 = vmul.f32 %v4318_v41, %v6423_v10  ;;  %v3593_v54 = vadd.f32 %v3592_v7, %v6409_v62  ;;  %v3749_v62 = vld [vmem:[%s6723_s20 + $0x20] sm:$0xff] }
 0x306   :  { %v4322_v18 = vpop.eup %4321  ;;  %v3481_v32 = vadd.f32 %v4320_v40, %v4318_v41  ;;  %v3482_v17 = vmul.f32 %v4320_v40, %v6427_v27  ;;  %v3644_v8 = vmax.f32 %v3643_v5, %v3569_v28  ;;  %3767 = vmatpush.msra.mxu3 %v3749_v62  ;;  %v3745_v40 = vld [vmem:[%s6723_s20] sm:$0xff]  ;;  %v3879_v62 = vld [vmem:[%s6727_s26 + $0x78] sm:$0xff] }
 0x307   :  { %v4324_v56 = vpop.eup %4323  ;;  %v3485_v58 = vmul.f32 %v4322_v18, %v6432_v57  ;;  %3884 = vmatpush.msra.mxu1 %v3879_v62 }
 0x308   :  { %v3483_v37 = vadd.f32 %v3482_v17, %v3480_v63  ;;  %v3484_v15 = vadd.f32 %v4322_v18, %v3481_v32  ;;  %v4326_v31 = vpop.eup %4325  ;;  %v3488_v16 = vmul.f32 %v4324_v56, %v6437_v36  ;;  %v3645_v34 = vmax.f32 %v3644_v8, %v3593_v54  ;;  %3768 = vmatpush.msra.mxu3 %v3748_v6  ;;  %v3796_v18 = vld [vmem:[%s6724_s22 + $0x68] sm:$0xff]  ;;  %v3795_v17 = vld [vmem:[%s6724_s22 + $0x60] sm:$0xff]  ;;  %v3838_v6 = vld [vmem:[%s6726_s24 + $0x70] sm:$0xff] }
 0x309   :  { %v4328_v52 = vpop.eup %4327  ;;  %v3491_v14 = vmul.f32 %v4326_v31, %v6441_v38 }
 0x30a   :  { %v3486_v13 = vadd.f32 %v3485_v58, %v3483_v37  ;;  %v3487_v26 = vadd.f32 %v4324_v56, %v3484_v15  ;;  %v3494_v39 = vmul.f32 %v4328_v52, %v6445_v47  ;;  %3769 = vmatpush.msra.mxu3 %v3747_v42  ;;  %v3794_v56 = vld [vmem:[%s6724_s22 + $0x58] sm:$0xff]  ;;  %v3836_v42 = vld [vmem:[%s6726_s24 + $0x60] sm:$0xff] }
 0x30c   :  { %v3489_v3 = vadd.f32 %v3488_v16, %v3486_v13  ;;  %v3490_v1 = vadd.f32 %v4326_v31, %v3487_v26  ;;  %3770 = vmatpush.msra.mxu3 %v3746_v45  ;;  %v3873_v45 = vld [vmem:[%s6727_s26 + $0x48] sm:$0xff] }
 0x30e   :  { %v3492_v48 = vadd.f32 %v3491_v14, %v3489_v3  ;;  %v3493_v49 = vadd.f32 %v4328_v52, %v3490_v1  ;;  %3771 = vmatpush.msra.mxu3 %v3745_v40  ;;  %v3792_v52 = vld [vmem:[%s6724_s22 + $0x48] sm:$0xff]  ;;  %v3791_v1 = vld [vmem:[%s6724_s22 + $0x40] sm:$0xff]  ;;  %v3870_v40 = vld [vmem:[%s6727_s26 + $0x30] sm:$0xff] }
 0x310   :  { %v3495_v33 = vadd.f32 %v3494_v39, %v3492_v48  ;;  %4329 = vrcp.f32 %v3493_v49  ;;  %v3790_v49 = vld [vmem:[%s6724_s22 + $0x38] sm:$0xff] }
 0x312   :  { %v3616_v24 = vpop.f32.mrf.mxu3 }
 0x313   :  { %v3617_v61 = vadd.f32 %v3616_v24, %v6405_v11 }
 0x315   :  { %v3646_v9 = vmax.f32 %v3645_v34, %v3617_v61  ;;  %v3786_v34 = vld [vmem:[%s6724_s22 + $0x18] sm:$0xff] }
 0x316   :  { %v4330_v2 = vpop.eup %4329 }
 0x317   :  { %v3647_v4 = vmax.f32 %v3646_v9, %v3641_v22  ;;  %v3497_v11 = vmul.f32 %v4330_v2, %v3495_v33  ;;  %v3839_v9 = vld [vmem:[%s6726_s24 + $0x78] sm:$0xff]  ;;  %v3878_v2 = vld [vmem:[%s6727_s26 + $0x70] sm:$0xff] }
 0x318   :  { %3844 = vmatpush.msra.mxu2 %v3839_v9  ;;  %3885 = vmatpush.msra.mxu1 %v3878_v2 }
 0x319   :  { %v3648_v46 = vsub.f32 %v3521_v51, %v3647_v4  ;;  %v3651_v50 = vsub.f32 %v3545_v25, %v3647_v4  ;;  %v3654_v0 = vsub.f32 %v3569_v28, %v3647_v4  ;;  %v3657_v12 = vsub.f32 %v3593_v54, %v3647_v4  ;;  %v3787_v54 = vld [vmem:[%s6724_s22 + $0x20] sm:$0xff] }
 0x31a   :  { %v6521_v60 = vadd.f32 %v3497_v11, %v3312_v29  ;;  %v3660_v55 = vsub.f32 %v3617_v61, %v3647_v4  ;;  %v3663_v41 = vsub.f32 %v3641_v22, %v3647_v4  ;;  %v3798_v29 = vld [vmem:[%s6724_s22 + $0x78] sm:$0xff]  ;;  %v3785_v61 = vld [vmem:[%s6724_s22 + $0x10] sm:$0xff]  ;;  %v3783_v22 = vld [vmem:[%s6724_s22] sm:$0xff]  ;;  %3845 = vmatpush.msra.mxu2 %v3838_v6 }
 0x31b   :  { %v3649_v43 = vmul.f32 1.442695, %v3648_v46  ;;  %v3652_v44 = vmul.f32 1.442695, %v3651_v50  ;;  %v3655_v20 = vmul.f32 1.442695, %v3654_v0  ;;  %3803 = vmatpush.msra.mxu0 %v3798_v29 }
 0x31c   :  { %v3658_v21 = vmul.f32 1.442695, %v3657_v12  ;;  %v3661_v63 = vmul.f32 1.442695, %v3660_v55  ;;  %v3664_v32 = vmul.f32 1.442695, %v3663_v41 }
 0x31d   :  { %4331 = vpow2.f32 %v3649_v43  ;;  %3804 = vmatpush.msra.mxu0 %v3797_v23  ;;  %v3837_v4 = vld [vmem:[%s6726_s24 + $0x68] sm:$0xff]  ;;  %v3876_v46 = vld [vmem:[%s6727_s26 + $0x60] sm:$0xff]  ;;  %v3835_v50 = vld [vmem:[%s6726_s24 + $0x58] sm:$0xff] }
 0x31e   :  { %4333 = vpow2.f32 %v3652_v44  ;;  %v3877_v11 = vld [vmem:[%s6727_s26 + $0x68] sm:$0xff]  ;;  %3846 = vmatpush.msra.mxu2 %v3837_v4  ;;  %v3875_v0 = vld [vmem:[%s6727_s26 + $0x58] sm:$0xff]  ;;  %v3834_v12 = vld [vmem:[%s6726_s24 + $0x50] sm:$0xff] }
 0x31f   :  { %4335 = vpow2.f32 %v3655_v20  ;;  %3805 = vmatpush.msra.mxu0 %v3796_v18  ;;  %3886 = vmatpush.msra.mxu1 %v3877_v11  ;;  %v3833_v55 = vld [vmem:[%s6726_s24 + $0x48] sm:$0xff]  ;;  %v3832_v43 = vld [vmem:[%s6726_s24 + $0x40] sm:$0xff]  ;;  %v3831_v20 = vld [vmem:[%s6726_s24 + $0x38] sm:$0xff]  ;;  %v3742_v18 = vpop.f32.mrf.mxu2 }
 0x320   :  { %4337 = vpow2.f32 %v3658_v21  ;;  %3847 = vmatpush.msra.mxu2 %v3836_v42  ;;  %v3872_v44 = vld [vmem:[%s6727_s26 + $0x40] sm:$0xff]  ;;  %v3871_v21 = vld [vmem:[%s6727_s26 + $0x38] sm:$0xff]  ;;  %v3830_v41 = vld [vmem:[%s6726_s24 + $0x30] sm:$0xff] }
 0x321   :  { %4339 = vpow2.f32 %v3661_v63  ;;  %3806 = vmatpush.msra.mxu0 %v3795_v17  ;;  %3887 = vmatpush.msra.mxu1 %v3876_v46  ;;  %v3829_v29 = vld [vmem:[%s6726_s24 + $0x28] sm:$0xff]  ;;  %v3828_v63 = vld [vmem:[%s6726_s24 + $0x20] sm:$0xff]  ;;  %v3827_v17 = vld [vmem:[%s6726_s24 + $0x18] sm:$0xff] }
 0x322   :  { %4341 = vpow2.f32 %v3664_v32  ;;  %3848 = vmatpush.msra.mxu2 %v3835_v50  ;;  %v3869_v23 = vld [vmem:[%s6727_s26 + $0x28] sm:$0xff]  ;;  %v3868_v32 = vld [vmem:[%s6727_s26 + $0x20] sm:$0xff] }
 0x323   :  { %v4332_v51 = vpop.eup %4331  ;;  %3807 = vmatpush.msra.mxu0 %v3794_v56  ;;  %3888 = vmatpush.msra.mxu1 %v3875_v0  ;;  %v3867_v56 = vld [vmem:[%s6727_s26 + $0x18] sm:$0xff] }
 0x324   :  { %v4334_v25 = vpop.eup %4333  ;;  %v3666_v37 = vmul.f32 %v4332_v51, %v6423_v10  ;;  %3849 = vmatpush.msra.mxu2 %v3834_v12 }
 0x325   :  { %v4336_v15 = vpop.eup %4335  ;;  %v3667_v58 = vadd.f32 %v4334_v25, %v4332_v51  ;;  %v3668_v31 = vmul.f32 %v4334_v25, %v6427_v27  ;;  %3808 = vmatpush.msra.mxu0 %v3793_v35  ;;  %v3716_v51 = vpop.f32.mrf.mxu1 }
 0x326   :  { %v4338_v13 = vpop.eup %4337  ;;  %v3671_v5 = vmul.f32 %v4336_v15, %v6432_v57  ;;  %3850 = vmatpush.msra.mxu2 %v3833_v55  ;;  %v3743_v25 = vadd.f32 %v3742_v18, %v3716_v51 }
 0x327   :  { %v3669_v26 = vadd.f32 %v3668_v31, %v3666_v37  ;;  %v3670_v16 = vadd.f32 %v4336_v15, %v3667_v58  ;;  %v4340_v10 = vpop.eup %4339  ;;  %v3674_v27 = vmul.f32 %v4338_v13, %v6437_v36  ;;  %3809 = vmatpush.msra.mxu0 %v3792_v52  ;;  %v3789_v36 = vld [vmem:[%s6724_s22 + $0x30] sm:$0xff]  ;;  %v4145_v37 = vld [vmem:[%s6722_s21] ss:$0 sm:$0xff] }
 0x328   :  { %v4342_v14 = vpop.eup %4341  ;;  %v3677_v57 = vmul.f32 %v4340_v10, %v6441_v38  ;;  %v3788_v38 = vld [vmem:[%s6724_s22 + $0x28] sm:$0xff]  ;;  %3851 = vmatpush.msra.mxu2 %v3832_v43  ;;  %v3824_v52 = vld [vmem:[%s6726_s24] sm:$0xff] }
 0x329   :  { %v3672_v28 = vadd.f32 %v3671_v5, %v3669_v26  ;;  %v3673_v3 = vadd.f32 %v4338_v13, %v3670_v16  ;;  %3810 = vmatpush.msra.mxu0 %v3791_v1  ;;  %v3680_v19 = vmul.f32 %v4342_v14, %v6445_v47  ;;  %v3826_v13 = vld [vmem:[%s6726_s24 + $0x10] sm:$0xff]  ;;  %v3825_v16 = vld [vmem:[%s6726_s24 + $0x8] sm:$0xff]  ;;  %s4373_s24 = smov 4  }
 0x32a   :  { %3852 = vmatpush.msra.mxu2 %v3831_v20  ;;  %v3866_v26 = vld [vmem:[%s6727_s26 + $0x10] sm:$0xff]  ;;  %v3865_v5 = vld [vmem:[%s6727_s26 + $0x8] sm:$0xff] }
 0x32b   :  { %v3675_v7 = vadd.f32 %v3674_v27, %v3672_v28  ;;  %v3676_v48 = vadd.f32 %v4340_v10, %v3673_v3  ;;  %3811 = vmatpush.msra.mxu0 %v3790_v49  ;;  %v3864_v10 = vld [vmem:[%s6727_s26] sm:$0xff] }
 0x32c   :  { %3853 = vmatpush.msra.mxu2 %v3830_v41  ;;  %v4146_v28 = vld [vmem:[%s6725_s23] ss:$0 sm:$0xff] }
 0x32d   :  { %v3678_v39 = vadd.f32 %v3677_v57, %v3675_v7  ;;  %v3679_v8 = vadd.f32 %v4342_v14, %v3676_v48  ;;  %3812 = vmatpush.msra.mxu0 %v3789_v36  ;;  %v4147_v14 = vld [vmem:[%s6728_s27] ss:$0 sm:$0xff] }
 0x32e   :  { %3854 = vmatpush.msra.mxu2 %v3829_v29  ;;  %v4148_v57 = vld [vmem:[%s6729_s25] ss:$0 sm:$0xff] }
 0x32f   :  { %v3681_v33 = vadd.f32 %v3680_v19, %v3678_v39  ;;  %4343 = vrcp.f32 %v3679_v8  ;;  %3813 = vmatpush.msra.mxu0 %v3788_v38 }
 0x330   :  { %3855 = vmatpush.msra.mxu2 %v3828_v63 }
 0x331   :  { %3814 = vmatpush.msra.mxu0 %v3787_v54 }
 0x332   :  { %3856 = vmatpush.msra.mxu2 %v3827_v17 }
 0x333   :  { %3815 = vmatpush.msra.mxu0 %v3786_v34 }
 0x334   :  { %3857 = vmatpush.msra.mxu2 %v3826_v13 }
 0x335   :  { %v4344_v53 = vpop.eup %4343  ;;  %3816 = vmatpush.msra.mxu0 %v3785_v61 }
 0x336   :  { %v3683_v47 = vmul.f32 %v4344_v53, %v3681_v33  ;;  %3858 = vmatpush.msra.mxu2 %v3825_v16 }
 0x337   :  { %3817 = vmatpush.msra.mxu0 %v3784_v30 }
 0x338   :  { %v3684_v24 = vadd.f32 %v3683_v47, %v6521_v60  ;;  %v3874_v60 = vld [vmem:[%s6727_s26 + $0x50] sm:$0xff]  ;;  %3859 = vmatpush.msra.mxu2 %v3824_v52 }
 0x339   :  { %3818 = vmatpush.msra.mxu0 %v3783_v22  ;;  %3889 = vmatpush.msra.mxu1 %v3874_v60 }
 0x33a   :  { %v3685_v59 = vmul.f32 0.16666667, %v3684_v24 }
 0x33b   :  { %3890 = vmatpush.msra.mxu1 %v3873_v45 }
 0x33c   :  { %4117 = vmatmul.msk.f32.vlgmr.msra.gmra.mxu3 %vm584_vm2, %v3685_v59 }
 0x33d   :  { %3891 = vmatpush.msra.mxu1 %v3872_v44 }
 0x33f   :  { %3892 = vmatpush.msra.mxu1 %v3871_v21 }
 0x341   :  { %3893 = vmatpush.msra.mxu1 %v3870_v40 }
 0x343   :  { %3894 = vmatpush.msra.mxu1 %v3869_v23 }
 0x345   :  { %3895 = vmatpush.msra.mxu1 %v3868_v32 }
 0x347   :  { %3896 = vmatpush.msra.mxu1 %v3867_v56 }
 0x349   :  { %3897 = vmatpush.msra.mxu1 %v3866_v26 }
 0x34b   :  { %3898 = vmatpush.msra.mxu1 %v3865_v5 }
 0x34d   :  { %3899 = vmatpush.msra.mxu1 %v3864_v10 }
 0x3bf   :  { %v3773_v15 = vpop.f32.mrf.mxu3 }
 0x3c0   :  { %v3776_v58 = vadd.f32 %v3773_v15, %v3743_v25 }
 0x3c2   :  { %v3781_v31 = vadd.f32 %v4145_v37, %v3776_v58 }
 0x3c4   :  { %v3782_v35 = vmax.f32 %v3781_v31, 0.0 }
 0x3c6   :  { %3819 = vmatmul.f32.vlgmr.msra.gmra.mxu0 %v3782_v35 }
 0x443   :  { %v3820_v3 = vpop.f32.mrf.mxu0 }
 0x444   :  { %v3821_v27 = vadd.f32 %v4146_v28, %v3820_v3 }
 0x446   :  { %v3823_v1 = vmax.f32 %v3821_v27, 0.0 }
 0x448   :  { %3860 = vmatmul.f32.vlgmr.msra.gmra.mxu2 %v3823_v1  ;;  %3900 = vmatmul.f32.vlgmr.msra.gmra.mxu1 %v3823_v1 }
 0x4c5   :  { %v3901_v7 = vpop.f32.mrf.mxu1 }
 0x4c6   :  { %v3902_v48 = vadd.f32 %v4147_v14, %v3901_v7 }
 0x4c8   :  { %3931 = vrot.lane.b32.xlu2 %v3902_v48, %s4373_s24 }
 0x4cb   :  { %v3861_v49 = vpop.f32.mrf.mxu2 }
 0x4cc   :  { %v3862_v39 = vadd.f32 %v4148_v57, %v3861_v49 }
 0x4ce   :  { %v3905_v8 = vsel %vm3904_vm5, %v3862_v39, -inf }
 0x4cf   :  { %3906 = vmax.xlane.f32.xlu0 %v3905_v8 }
 0x522   :  { %v3932_v4 = vpop.permute.xlu2 %3931 }
 0x542   :  { %v3907_v19 = vpop.xlane.xlu0 %3906 }
 0x543   :  { %v3908_v36 = vsub.f32 %v3862_v39, %v3907_v19 }
 0x545   :  { %v3909_v33 = vmul.f32 1.442695, %v3908_v36 }
 0x547   :  { %4345 = vpow2.f32 %v3909_v33 }
 0x54d   :  { %v4346_v38 = vpop.eup %4345 }
 0x54e   :  { %v3911_v54 = vsel %vm3904_vm5, %v4346_v38, 0.0 }
 0x54f   :  { %3912 = vadd.xlane.f32.xlu1 %v3911_v54 }
 0x5c2   :  { %v3913_v53 = vpop.xlane.xlu1 %3912 }
 0x5c3   :  { %4347 = vrcp.f32 %v3913_v53  ;;  %v3925_v34 = vand.u32 2147483648, %v3913_v53  ;;  %v3923_v30 = vand.u32 2147483647, %v3913_v53  ;;  %vm3919_vm7 = vweird.f32 %v3913_v53 }
 0x5c5   :  { %v3926_v9 = vor.u32 1.1754944e-38, %v3925_v34  ;;  %vm3924_vm9 = vcmp.eq.f32.partialorder %v3923_v30, 8.507059e+37 }
 0x5c9   :  { %v4348_v47 = vpop.eup %4347 }
 0x5ca   :  { %v3915_v24 = vmul.f32 %v4348_v47, %v3913_v53  ;;  %vm3920_vm6 = vweird.f32 %v4348_v47 }
 0x5cb   :  { %vm3921_vm8 = vmor %vm3919_vm7, %vm3920_vm6 }
 0x5cc   :  { %v3916_v59 = vsub.f32 1.0, %v3915_v24 }
 0x5ce   :  { %v3917_v61 = vmul.f32 %v4348_v47, %v3916_v59 }
 0x5d0   :  { %v3918_v22 = vadd.f32 %v4348_v47, %v3917_v61 }
 0x5d2   :  { %v3922_v62 = vsel %vm3921_vm8, %v4348_v47, %v3918_v22 }
 0x5d3   :  { %v3927_v6 = vsel %vm3924_vm9, %v3926_v9, %v3922_v62 }
 0x5d4   :  { %v3928_v2 = vmul.f32 %v4346_v38, %v3927_v6 }
 0x5d6   :  { %3929 = vst.msk [vmem:[%s6730_s28] sm:$0xff] %vm3904_vm5, %v3928_v2 }
 0x5d7   :  { %3935 = vst.msk [vmem:[%s6730_s28] sm:$0xff] %vm3934_vm10, %v3932_v4 }

</bundles_post_ra>
